<compile_context>
chip_gen: v6e
topology: v6e:2x2x1
jax: 0.10.0
libtpu: 0.0.40
codegen_flags: <defaults>
</compile_context>

<pallas_src>
import jax
import jax.numpy as jnp
from jax.experimental import pallas as pl
from jax.experimental.pallas import tpu as pltpu


def resblock_kernel(x_ref, w1_ref, b1_ref, w2_ref, b2_ref, out_ref, slab_ref):
    # x_ref   : (1, H, W, Cp)          bf16  channel-padded input (conv source + residual)
    # w*_ref  : (3, 3*Cp, Cp)          bf16  per-dy weight matrices, rows = dx*Cp + cin
    # b*_ref  : (1, Cp)                f32
    # out_ref : (1, tile_h, W, Cp)     f32
    # slab_ref: (tile_h + 4, W, 3*Cp)  bf16  im2col-lite slab, reused by conv1 then conv2
    rows_slab, w, k3 = slab_ref.shape
    tile_h = rows_slab - 4
    cp = k3 // 3
    cdt = slab_ref.dtype

    t = pl.program_id(1)
    n_t = pl.num_programs(1)
    row0 = t * tile_h
    is_first = t == 0
    is_last = t == n_t - 1

    # ---------------- slab fill helpers ----------------
    def fill_dx_blocks(dst_row, src):
        """Write the 3 dx-shifted channel blocks of slab rows [dst_row, dst_row+cnt)
        directly from `src` (cnt, W, Cp); column borders get the conv zero padding."""
        cnt = src.shape[0]
        zcol = jnp.zeros((cnt, 1, cp), cdt)
        # dx = 1 (centre tap): source column w.
        slab_ref[dst_row:dst_row + cnt, :, cp:2 * cp] = src
        # dx = 0: source column w-1; column 0 is the conv zero padding.
        slab_ref[dst_row:dst_row + cnt, 1:w, 0:cp] = src[:, 0:w - 1, :]
        slab_ref[dst_row:dst_row + cnt, 0:1, 0:cp] = zcol
        # dx = 2: source column w+1; column W-1 is the conv zero padding.
        slab_ref[dst_row:dst_row + cnt, 0:w - 1, 2 * cp:3 * cp] = src[:, 1:w, :]
        slab_ref[dst_row:dst_row + cnt, w - 1:w, 2 * cp:3 * cp] = zcol

    def fill_from_x(dst_row, src_row, cnt):
        src = jnp.maximum(x_ref[0, pl.ds(src_row, cnt), :, :], 0.0).astype(cdt)
        fill_dx_blocks(dst_row, src)

    def zero_rows(dst_row, cnt):
        slab_ref[dst_row:dst_row + cnt, :, :] = jnp.zeros((cnt, w, k3), cdt)

    # ---------------- 3x3 conv = 3 MXU matmuls over leading-dim-sliced slab views ------
    def conv3x3(wmat_ref, out_rows):
        m = out_rows * w
        d0 = jnp.dot(slab_ref[0:out_rows, :, :].reshape(m, k3), wmat_ref[0],
                     preferred_element_type=jnp.float32)
        d1 = jnp.dot(slab_ref[1:out_rows + 1, :, :].reshape(m, k3), wmat_ref[1],
                     preferred_element_type=jnp.float32)
        d2 = jnp.dot(slab_ref[2:out_rows + 2, :, :].reshape(m, k3), wmat_ref[2],
                     preferred_element_type=jnp.float32)
        return d0 + d1 + d2          # single expression: no accumulator scratch RMW

    # ---- conv1 slab: relu(x) rows [row0-2, row0+tile_h+2), zeros outside the image ----
    @pl.when(is_first)
    def _():
        zero_rows(0, 2)

    @pl.when(t > 0)
    def _():
        fill_from_x(0, row0 - 2, 2)

    fill_from_x(2, row0, tile_h)

    @pl.when(is_last)
    def _():
        zero_rows(tile_h + 2, 2)

    @pl.when(t < n_t - 1)
    def _():
        fill_from_x(tile_h + 2, row0 + tile_h, 2)

    # conv1 over tile_h + 2 output rows (1-row recompute halo each side for conv2).
    r1 = conv3x3(w1_ref, tile_h + 2) + b1_ref[...]          # ((tile_h+2)*W, Cp) f32

    # ---- conv2 slab: relu(r1) rows [row0-1, row0+tile_h+1); out-of-image rows are pad --
    r1r = jnp.maximum(r1, 0.0).astype(cdt).reshape(tile_h + 2, w, cp)
    fill_dx_blocks(0, r1r)

    @pl.when(is_first)
    def _():
        zero_rows(0, 1)              # r1 row -1 is conv zero padding

    @pl.when(is_last)
    def _():
        zero_rows(tile_h + 1, 1)     # r1 row H is conv zero padding

    r2 = conv3x3(w2_ref, tile_h) + b2_ref[...]              # (tile_h*W, Cp) f32

    # ---- residual add; downsample is None for indim == outdim, stride == 1 ----
    x_res = x_ref[0, pl.ds(row0, tile_h), :, :].astype(jnp.float32)
    out_ref[0] = x_res + r2.reshape(tile_h, w, cp)


def _derive_vmem_limit(per_step_bytes):
    """Derive vmem_limit_bytes from the per-step footprint and the chip's VMEM capacity."""
    try:
        cap = int(pltpu.get_tpu_info().vmem_capacity_bytes)
    except Exception:
        cap = 64 * 1024 * 1024       # conservative (v7x per-core VMEM)
    want = per_step_bytes + (16 << 20)          # headroom for compiler temporaries
    return int(min(max(want, 32 << 20), (cap * 7) // 8))


def resblock_pallas(x_nchw, w1_oihw, b1, w2_oihw, b2,
                    *, lane=128, compute_dtype=jnp.bfloat16, tile_h=None):
    """ResBlock forward. Takes PyTorch-layout (NCHW / OIHW) f32 arrays, returns NCHW f32.

    Conv operands (and the residual read) are bf16; accumulation is f32.
    """
    N, C, H, W = x_nchw.shape
    assert w1_oihw.shape == (C, C, 3, 3) and w2_oihw.shape == (C, C, 3, 3), (
        "kernel implements the indim == outdim, stride == 1 branch (downsample is None)")

    if tile_h is None:
        tile_h = min(H, 32)
        while H % tile_h:
            tile_h -= 1
    assert H % tile_h == 0 and tile_h >= 1
    n_t = H // tile_h

    Cp = ((C + lane - 1) // lane) * lane        # lane-dense channel count (>= 128)

    # Layout plumbing: NCHW -> NHWC, channel pad to the lane width, bf16 conv operands.
    # (No spatial padding here: the conv zero border is produced inside the kernel.)
    x_nhwc = jnp.transpose(x_nchw, (0, 2, 3, 1))
    x_in = jnp.pad(x_nhwc, ((0, 0), (0, 0), (0, 0), (0, Cp - C))).astype(compute_dtype)

    def prep_w(w_oihw):
        w_hwio = jnp.transpose(w_oihw, (2, 3, 1, 0))                   # (ky, kx, cin, cout)
        w_hwio = jnp.pad(w_hwio, ((0, 0), (0, 0), (0, Cp - C), (0, Cp - C)))
        # (dy, dx*Cp + cin, cout) matches the slab channel layout.
        return w_hwio.reshape(3, 3 * Cp, Cp).astype(compute_dtype)

    w1p, w2p = prep_w(w1_oihw), prep_w(w2_oihw)
    b1p = jnp.pad(b1, (0, Cp - C)).reshape(1, Cp).astype(jnp.float32)
    b2p = jnp.pad(b2, (0, Cp - C)).reshape(1, Cp).astype(jnp.float32)

    grid_spec = pltpu.PrefetchScalarGridSpec(
        num_scalar_prefetch=0,
        grid=(N, n_t),
        in_specs=[
            # x block is per-image and index-invariant over t -> fetched once, reused by
            # every h-tile (conv source + residual read).
            pl.BlockSpec((1, H, W, Cp), lambda n, t: (n, 0, 0, 0)),
            pl.BlockSpec((3, 3 * Cp, Cp), lambda n, t: (0, 0, 0)),
            pl.BlockSpec((1, Cp), lambda n, t: (0, 0)),
            pl.BlockSpec((3, 3 * Cp, Cp), lambda n, t: (0, 0, 0)),
            pl.BlockSpec((1, Cp), lambda n, t: (0, 0)),
        ],
        out_specs=pl.BlockSpec((1, tile_h, W, Cp), lambda n, t: (n, t, 0, 0)),
        scratch_shapes=[pltpu.VMEM((tile_h + 4, W, 3 * Cp), compute_dtype)],
    )

    # VMEM budget: double-buffered blocks + slab + headroom for the f32 matmul values.
    bpe_c = jnp.dtype(compute_dtype).itemsize
    x_blk = H * W * Cp * bpe_c
    out_blk = tile_h * W * Cp * 4
    w_blk = 2 * 3 * 3 * Cp * Cp * bpe_c
    slab_bytes = (tile_h + 4) * W * 3 * Cp * bpe_c
    val_bytes = 3 * (tile_h + 2) * W * Cp * 4
    per_step = 2 * (x_blk + out_blk + w_blk) + slab_bytes + val_bytes
    vmem_limit = _derive_vmem_limit(per_step)

    flops = int(4 * N * H * W * 9 * Cp * Cp)                  # 2 convs x 2 flops/MAC
    bytes_accessed = int(x_in.size * bpe_c + N * H * W * Cp * 4
                         + (w1p.size + w2p.size) * bpe_c + (b1p.size + b2p.size) * 4)

    out = pl.pallas_call(
        resblock_kernel,
        out_shape=jax.ShapeDtypeStruct((N, H, W, Cp), jnp.float32),
        grid_spec=grid_spec,
        compiler_params=pltpu.CompilerParams(
            dimension_semantics=("parallel", "parallel"),
            vmem_limit_bytes=vmem_limit,
        ),
        cost_estimate=pl.CostEstimate(flops=flops, transcendentals=0,
                                      bytes_accessed=bytes_accessed),
    )(x_in, w1p, b1p, w2p, b2p)

    # Drop channel padding, back to NCHW.
    return jnp.transpose(out[..., :C], (0, 3, 1, 2))


def resblock_reference(x_nchw, w1_oihw, b1, w2_oihw, b2):
    """Pure-JAX reference matching the PyTorch forward (NCHW, f32)."""
    def conv(x, w, b):
        y = jax.lax.conv_general_dilated(
            x, w, window_strides=(1, 1), padding=((1, 1), (1, 1)),
            dimension_numbers=("NCHW", "OIHW", "NCHW"))
        return y + b[None, :, None, None]

    r = conv(jnp.maximum(x_nchw, 0.0), w1_oihw, b1)
    r = conv(jnp.maximum(r, 0.0), w2_oihw, b2)
    return x_nchw + r


if __name__ == "__main__":
    # Small shapes consistent with the module: ResBlock(indim=4) on x: (2, 4, 16, 16).
    N, C, H, Wd = 2, 4, 16, 16
    key = jax.random.PRNGKey(0)
    kx, kw1, kb1, kw2, kb2 = jax.random.split(key, 5)

    x_nchw = jax.random.normal(kx, (N, C, H, Wd), dtype=jnp.float32)
    # PyTorch Conv2d weight shape: (out, in, 3, 3).
    w1_oihw = jax.random.normal(kw1, (C, C, 3, 3), dtype=jnp.float32) * 0.1
    b1 = jax.random.normal(kb1, (C,), dtype=jnp.float32) * 0.1
    w2_oihw = jax.random.normal(kw2, (C, C, 3, 3), dtype=jnp.float32) * 0.1
    b2 = jax.random.normal(kb2, (C,), dtype=jnp.float32) * 0.1

    # tile_h=8 -> 2 h-tiles per image: exercises the halo / image-border branches.
    out = resblock_pallas(x_nchw, w1_oihw, b1, w2_oihw, b2, tile_h=8)
    out = jax.block_until_ready(out)

    ref = resblock_reference(x_nchw, w1_oihw, b1, w2_oihw, b2)
    max_err = float(jnp.max(jnp.abs(out - ref)))
    # bf16 MXU operands + bf16 residual read (f32 accumulation) => loose tolerance.
    assert jnp.allclose(out, ref, atol=5e-2, rtol=5e-2), max_err

    print("KERNEL_OK")
</pallas_src>

<mosaic_0001>
module attributes {stable_mosaic.version = 11 : i64} {
  func.func @resblock_kernel(%arg0: i32, %arg1: i32, %arg2: memref<1x16x16x128xbf16, #tpu.memory_space<vmem>>, %arg3: memref<3x384x128xbf16, #tpu.memory_space<vmem>>, %arg4: memref<1x128xf32, #tpu.memory_space<vmem>>, %arg5: memref<3x384x128xbf16, #tpu.memory_space<vmem>>, %arg6: memref<1x128xf32, #tpu.memory_space<vmem>>, %arg7: memref<1x8x16x128xf32, #tpu.memory_space<vmem>>, %arg8: memref<12x16x384xbf16, #tpu.memory_space<vmem>>) attributes {dimension_semantics = [#tpu.dimension_semantics<parallel>, #tpu.dimension_semantics<parallel>], iteration_bounds = array<i64: 2, 2>, scalar_prefetch = 0 : i64, scratch_operands = 1 : i64, tpu.core_type = #tpu.core_type<tc>, window_params = [{transform_indices = @transform_0, window_bounds = array<i64: 1, 16, 16, 128>}, {pipeline_mode = #tpu.pipeline_mode<synchronous>, transform_indices = @transform_1, window_bounds = array<i64: 3, 384, 128>}, {pipeline_mode = #tpu.pipeline_mode<synchronous>, transform_indices = @transform_2, window_bounds = array<i64: 1, 128>}, {pipeline_mode = #tpu.pipeline_mode<synchronous>, transform_indices = @transform_3, window_bounds = array<i64: 3, 384, 128>}, {pipeline_mode = #tpu.pipeline_mode<synchronous>, transform_indices = @transform_4, window_bounds = array<i64: 1, 128>}, {transform_indices = @transform_5, window_bounds = array<i64: 1, 8, 16, 128>}]} {
    %c8_i32 = arith.constant 8 : i32
    %0 = arith.muli %arg1, %c8_i32 : i32
    %c0_i32 = arith.constant 0 : i32
    %1 = arith.cmpi eq, %arg1, %c0_i32 : i32
    %c1_i32 = arith.constant 1 : i32
    %2 = arith.cmpi eq, %arg1, %c1_i32 : i32
    %3 = arith.extui %1 : i1 to i32
    %c0_i32_0 = arith.constant 0 : i32
    %4 = arith.cmpi ne, %3, %c0_i32_0 : i32
    scf.if %4 {
      %cst_91 = arith.constant 0.000000e+00 : bf16
      %91 = vector.broadcast %cst_91 : bf16 to vector<2x16x384xbf16>
      %c0_92 = arith.constant 0 : index
      %c0_93 = arith.constant 0 : index
      %c0_94 = arith.constant 0 : index
      %92 = vector.load %arg8[%c0_92, %c0_93, %c0_94] : memref<12x16x384xbf16, #tpu.memory_space<vmem>>, vector<2x16x384xbf16>
      tpu.vector_store %arg8[%c0_92, %c0_93, %c0_94], %91 {strides = array<i32>} : memref<12x16x384xbf16, #tpu.memory_space<vmem>>, vector<2x16x384xbf16>,
    } else {
    }
    %c0_i32_1 = arith.constant 0 : i32
    %5 = arith.cmpi sgt, %arg1, %c0_i32_1 : i32
    %6 = arith.extui %5 : i1 to i32
    %c0_i32_2 = arith.constant 0 : i32
    %7 = arith.cmpi ne, %6, %c0_i32_2 : i32
    scf.if %7 {
      %c2_i32 = arith.constant 2 : i32
      %91 = arith.subi %0, %c2_i32 : i32
      %c0_91 = arith.constant 0 : index
      %92 = arith.index_cast %91 : i32 to index
      %c0_92 = arith.constant 0 : index
      %c0_93 = arith.constant 0 : index
      %93 = vector.load %arg2[%c0_91, %92, %c0_92, %c0_93] : memref<1x16x16x128xbf16, #tpu.memory_space<vmem>>, vector<1x2x16x128xbf16>
      %94 = vector.shape_cast %93 : vector<1x2x16x128xbf16> to vector<2x16x128xbf16>
      %cst_94 = arith.constant 0.000000e+00 : bf16
      %95 = vector.broadcast %cst_94 : bf16 to vector<2x16x128xbf16>
      %96 = arith.maximumf %94, %95 : vector<2x16x128xbf16>
      %cst_95 = arith.constant 0.000000e+00 : bf16
      %97 = vector.broadcast %cst_95 : bf16 to vector<2x1x128xbf16>
      %c0_96 = arith.constant 0 : index
      %c0_97 = arith.constant 0 : index
      %c128_98 = arith.constant 128 : index
      %98 = vector.load %arg8[%c0_96, %c0_97, %c128_98] : memref<12x16x384xbf16, #tpu.memory_space<vmem>>, vector<2x16x128xbf16>
      tpu.vector_store %arg8[%c0_96, %c0_97, %c128_98], %96 {strides = array<i32>} : memref<12x16x384xbf16, #tpu.memory_space<vmem>>, vector<2x16x128xbf16>,
      %99 = vector.extract_strided_slice %96 {offsets = [0, 0, 0], sizes = [2, 15, 128], strides = [1, 1, 1]} : vector<2x16x128xbf16> to vector<2x15x128xbf16>
      %c0_99 = arith.constant 0 : index
      %c1_100 = arith.constant 1 : index
      %c0_101 = arith.constant 0 : index
      %100 = vector.load %arg8[%c0_99, %c1_100, %c0_101] : memref<12x16x384xbf16, #tpu.memory_space<vmem>>, vector<2x15x128xbf16>
      tpu.vector_store %arg8[%c0_99, %c1_100, %c0_101], %99 {strides = array<i32>} : memref<12x16x384xbf16, #tpu.memory_space<vmem>>, vector<2x15x128xbf16>,
      %c0_102 = arith.constant 0 : index
      %c0_103 = arith.constant 0 : index
      %c0_104 = arith.constant 0 : index
      %101 = vector.load %arg8[%c0_102, %c0_103, %c0_104] : memref<12x16x384xbf16, #tpu.memory_space<vmem>>, vector<2x1x128xbf16>
      tpu.vector_store %arg8[%c0_102, %c0_103, %c0_104], %97 {strides = array<i32>} : memref<12x16x384xbf16, #tpu.memory_space<vmem>>, vector<2x1x128xbf16>,
      %102 = vector.extract_strided_slice %96 {offsets = [0, 1, 0], sizes = [2, 15, 128], strides = [1, 1, 1]} : vector<2x16x128xbf16> to vector<2x15x128xbf16>
      %c0_105 = arith.constant 0 : index
      %c0_106 = arith.constant 0 : index
      %c256_107 = arith.constant 256 : index
      %103 = vector.load %arg8[%c0_105, %c0_106, %c256_107] : memref<12x16x384xbf16, #tpu.memory_space<vmem>>, vector<2x15x128xbf16>
      tpu.vector_store %arg8[%c0_105, %c0_106, %c256_107], %102 {strides = array<i32>} : memref<12x16x384xbf16, #tpu.memory_space<vmem>>, vector<2x15x128xbf16>,
      %c0_108 = arith.constant 0 : index
      %c15_109 = arith.constant 15 : index
      %c256_110 = arith.constant 256 : index
      %104 = vector.load %arg8[%c0_108, %c15_109, %c256_110] : memref<12x16x384xbf16, #tpu.memory_space<vmem>>, vector<2x1x128xbf16>
      tpu.vector_store %arg8[%c0_108, %c15_109, %c256_110], %97 {strides = array<i32>} : memref<12x16x384xbf16, #tpu.memory_space<vmem>>, vector<2x1x128xbf16>,
    } else {
    }
    %c0 = arith.constant 0 : index
    %8 = arith.index_cast %0 : i32 to index
    %c0_3 = arith.constant 0 : index
    %c0_4 = arith.constant 0 : index
    %9 = vector.load %arg2[%c0, %8, %c0_3, %c0_4] : memref<1x16x16x128xbf16, #tpu.memory_space<vmem>>, vector<1x8x16x128xbf16>
    %10 = vector.shape_cast %9 : vector<1x8x16x128xbf16> to vector<8x16x128xbf16>
    %cst = arith.constant 0.000000e+00 : bf16
    %11 = vector.broadcast %cst : bf16 to vector<8x16x128xbf16>
    %12 = arith.maximumf %10, %11 : vector<8x16x128xbf16>
    %cst_5 = arith.constant 0.000000e+00 : bf16
    %13 = vector.broadcast %cst_5 : bf16 to vector<8x1x128xbf16>
    %c2 = arith.constant 2 : index
    %c0_6 = arith.constant 0 : index
    %c128 = arith.constant 128 : index
    %14 = vector.load %arg8[%c2, %c0_6, %c128] : memref<12x16x384xbf16, #tpu.memory_space<vmem>>, vector<8x16x128xbf16>
    tpu.vector_store %arg8[%c2, %c0_6, %c128], %12 {strides = array<i32>} : memref<12x16x384xbf16, #tpu.memory_space<vmem>>, vector<8x16x128xbf16>,
    %15 = vector.extract_strided_slice %12 {offsets = [0, 0, 0], sizes = [8, 15, 128], strides = [1, 1, 1]} : vector<8x16x128xbf16> to vector<8x15x128xbf16>
    %c2_7 = arith.constant 2 : index
    %c1 = arith.constant 1 : index
    %c0_8 = arith.constant 0 : index
    %16 = vector.load %arg8[%c2_7, %c1, %c0_8] : memref<12x16x384xbf16, #tpu.memory_space<vmem>>, vector<8x15x128xbf16>
    tpu.vector_store %arg8[%c2_7, %c1, %c0_8], %15 {strides = array<i32>} : memref<12x16x384xbf16, #tpu.memory_space<vmem>>, vector<8x15x128xbf16>,
    %c2_9 = arith.constant 2 : index
    %c0_10 = arith.constant 0 : index
    %c0_11 = arith.constant 0 : index
    %17 = vector.load %arg8[%c2_9, %c0_10, %c0_11] : memref<12x16x384xbf16, #tpu.memory_space<vmem>>, vector<8x1x128xbf16>
    tpu.vector_store %arg8[%c2_9, %c0_10, %c0_11], %13 {strides = array<i32>} : memref<12x16x384xbf16, #tpu.memory_space<vmem>>, vector<8x1x128xbf16>,
    %18 = vector.extract_strided_slice %12 {offsets = [0, 1, 0], sizes = [8, 15, 128], strides = [1, 1, 1]} : vector<8x16x128xbf16> to vector<8x15x128xbf16>
    %c2_12 = arith.constant 2 : index
    %c0_13 = arith.constant 0 : index
    %c256 = arith.constant 256 : index
    %19 = vector.load %arg8[%c2_12, %c0_13, %c256] : memref<12x16x384xbf16, #tpu.memory_space<vmem>>, vector<8x15x128xbf16>
    tpu.vector_store %arg8[%c2_12, %c0_13, %c256], %18 {strides = array<i32>} : memref<12x16x384xbf16, #tpu.memory_space<vmem>>, vector<8x15x128xbf16>,
    %c2_14 = arith.constant 2 : index
    %c15 = arith.constant 15 : index
    %c256_15 = arith.constant 256 : index
    %20 = vector.load %arg8[%c2_14, %c15, %c256_15] : memref<12x16x384xbf16, #tpu.memory_space<vmem>>, vector<8x1x128xbf16>
    tpu.vector_store %arg8[%c2_14, %c15, %c256_15], %13 {strides = array<i32>} : memref<12x16x384xbf16, #tpu.memory_space<vmem>>, vector<8x1x128xbf16>,
    %21 = arith.extui %2 : i1 to i32
    %c0_i32_16 = arith.constant 0 : i32
    %22 = arith.cmpi ne, %21, %c0_i32_16 : i32
    scf.if %22 {
      %cst_91 = arith.constant 0.000000e+00 : bf16
      %91 = vector.broadcast %cst_91 : bf16 to vector<2x16x384xbf16>
      %c10 = arith.constant 10 : index
      %c0_92 = arith.constant 0 : index
      %c0_93 = arith.constant 0 : index
      %92 = vector.load %arg8[%c10, %c0_92, %c0_93] : memref<12x16x384xbf16, #tpu.memory_space<vmem>>, vector<2x16x384xbf16>
      tpu.vector_store %arg8[%c10, %c0_92, %c0_93], %91 {strides = array<i32>} : memref<12x16x384xbf16, #tpu.memory_space<vmem>>, vector<2x16x384xbf16>,
    } else {
    }
    %c1_i32_17 = arith.constant 1 : i32
    %23 = arith.cmpi slt, %arg1, %c1_i32_17 : i32
    %24 = arith.extui %23 : i1 to i32
    %c0_i32_18 = arith.constant 0 : i32
    %25 = arith.cmpi ne, %24, %c0_i32_18 : i32
    scf.if %25 {
      %c8_i32_91 = arith.constant 8 : i32
      %91 = arith.addi %0, %c8_i32_91 : i32
      %c0_92 = arith.constant 0 : index
      %92 = arith.index_cast %91 : i32 to index
      %c0_93 = arith.constant 0 : index
      %c0_94 = arith.constant 0 : index
      %93 = vector.load %arg2[%c0_92, %92, %c0_93, %c0_94] : memref<1x16x16x128xbf16, #tpu.memory_space<vmem>>, vector<1x2x16x128xbf16>
      %94 = vector.shape_cast %93 : vector<1x2x16x128xbf16> to vector<2x16x128xbf16>
      %cst_95 = arith.constant 0.000000e+00 : bf16
      %95 = vector.broadcast %cst_95 : bf16 to vector<2x16x128xbf16>
      %96 = arith.maximumf %94, %95 : vector<2x16x128xbf16>
      %cst_96 = arith.constant 0.000000e+00 : bf16
      %97 = vector.broadcast %cst_96 : bf16 to vector<2x1x128xbf16>
      %c10 = arith.constant 10 : index
      %c0_97 = arith.constant 0 : index
      %c128_98 = arith.constant 128 : index
      %98 = vector.load %arg8[%c10, %c0_97, %c128_98] : memref<12x16x384xbf16, #tpu.memory_space<vmem>>, vector<2x16x128xbf16>
      tpu.vector_store %arg8[%c10, %c0_97, %c128_98], %96 {strides = array<i32>} : memref<12x16x384xbf16, #tpu.memory_space<vmem>>, vector<2x16x128xbf16>,
      %99 = vector.extract_strided_slice %96 {offsets = [0, 0, 0], sizes = [2, 15, 128], strides = [1, 1, 1]} : vector<2x16x128xbf16> to vector<2x15x128xbf16>
      %c10_99 = arith.constant 10 : index
      %c1_100 = arith.constant 1 : index
      %c0_101 = arith.constant 0 : index
      %100 = vector.load %arg8[%c10_99, %c1_100, %c0_101] : memref<12x16x384xbf16, #tpu.memory_space<vmem>>, vector<2x15x128xbf16>
      tpu.vector_store %arg8[%c10_99, %c1_100, %c0_101], %99 {strides = array<i32>} : memref<12x16x384xbf16, #tpu.memory_space<vmem>>, vector<2x15x128xbf16>,
      %c10_102 = arith.constant 10 : index
      %c0_103 = arith.constant 0 : index
      %c0_104 = arith.constant 0 : index
      %101 = vector.load %arg8[%c10_102, %c0_103, %c0_104] : memref<12x16x384xbf16, #tpu.memory_space<vmem>>, vector<2x1x128xbf16>
      tpu.vector_store %arg8[%c10_102, %c0_103, %c0_104], %97 {strides = array<i32>} : memref<12x16x384xbf16, #tpu.memory_space<vmem>>, vector<2x1x128xbf16>,
      %102 = vector.extract_strided_slice %96 {offsets = [0, 1, 0], sizes = [2, 15, 128], strides = [1, 1, 1]} : vector<2x16x128xbf16> to vector<2x15x128xbf16>
      %c10_105 = arith.constant 10 : index
      %c0_106 = arith.constant 0 : index
      %c256_107 = arith.constant 256 : index
      %103 = vector.load %arg8[%c10_105, %c0_106, %c256_107] : memref<12x16x384xbf16, #tpu.memory_space<vmem>>, vector<2x15x128xbf16>
      tpu.vector_store %arg8[%c10_105, %c0_106, %c256_107], %102 {strides = array<i32>} : memref<12x16x384xbf16, #tpu.memory_space<vmem>>, vector<2x15x128xbf16>,
      %c10_108 = arith.constant 10 : index
      %c15_109 = arith.constant 15 : index
      %c256_110 = arith.constant 256 : index
      %104 = vector.load %arg8[%c10_108, %c15_109, %c256_110] : memref<12x16x384xbf16, #tpu.memory_space<vmem>>, vector<2x1x128xbf16>
      tpu.vector_store %arg8[%c10_108, %c15_109, %c256_110], %97 {strides = array<i32>} : memref<12x16x384xbf16, #tpu.memory_space<vmem>>, vector<2x1x128xbf16>,
    } else {
    }
    %c0_19 = arith.constant 0 : index
    %c0_20 = arith.constant 0 : index
    %c0_21 = arith.constant 0 : index
    %26 = vector.load %arg8[%c0_19, %c0_20, %c0_21] : memref<12x16x384xbf16, #tpu.memory_space<vmem>>, vector<10x16x384xbf16>
    %27 = vector.shape_cast %26 : vector<10x16x384xbf16> to vector<160x384xbf16>
    %c0_22 = arith.constant 0 : index
    %c0_23 = arith.constant 0 : index
    %c0_24 = arith.constant 0 : index
    %28 = vector.load %arg3[%c0_22, %c0_23, %c0_24] : memref<3x384x128xbf16, #tpu.memory_space<vmem>>, vector<1x384x128xbf16>
    %29 = vector.shape_cast %28 : vector<1x384x128xbf16> to vector<384x128xbf16>
    %cst_25 = arith.constant dense<0.000000e+00> : vector<160x128xf32>
    %30 = tpu.matmul %27, %29, %cst_25 {dimension_numbers = #tpu.dot_dimension_numbers<[1], [0], [0], [1], [0, 0, 1, 1], [], []>} : vector<160x384xbf16>, vector<384x128xbf16>, vector<160x128xf32> -> vector<160x128xf32>
    %c1_26 = arith.constant 1 : index
    %c0_27 = arith.constant 0 : index
    %c0_28 = arith.constant 0 : index
    %31 = vector.load %arg8[%c1_26, %c0_27, %c0_28] : memref<12x16x384xbf16, #tpu.memory_space<vmem>>, vector<10x16x384xbf16>
    %32 = vector.shape_cast %31 : vector<10x16x384xbf16> to vector<160x384xbf16>
    %c1_29 = arith.constant 1 : index
    %c0_30 = arith.constant 0 : index
    %c0_31 = arith.constant 0 : index
    %33 = vector.load %arg3[%c1_29, %c0_30, %c0_31] : memref<3x384x128xbf16, #tpu.memory_space<vmem>>, vector<1x384x128xbf16>
    %34 = vector.shape_cast %33 : vector<1x384x128xbf16> to vector<384x128xbf16>
    %cst_32 = arith.constant dense<0.000000e+00> : vector<160x128xf32>
    %35 = tpu.matmul %32, %34, %cst_32 {dimension_numbers = #tpu.dot_dimension_numbers<[1], [0], [0], [1], [0, 0, 1, 1], [], []>} : vector<160x384xbf16>, vector<384x128xbf16>, vector<160x128xf32> -> vector<160x128xf32>
    %c2_33 = arith.constant 2 : index
    %c0_34 = arith.constant 0 : index
    %c0_35 = arith.constant 0 : index
    %36 = vector.load %arg8[%c2_33, %c0_34, %c0_35] : memref<12x16x384xbf16, #tpu.memory_space<vmem>>, vector<10x16x384xbf16>
    %37 = vector.shape_cast %36 : vector<10x16x384xbf16> to vector<160x384xbf16>
    %c2_36 = arith.constant 2 : index
    %c0_37 = arith.constant 0 : index
    %c0_38 = arith.constant 0 : index
    %38 = vector.load %arg3[%c2_36, %c0_37, %c0_38] : memref<3x384x128xbf16, #tpu.memory_space<vmem>>, vector<1x384x128xbf16>
    %39 = vector.shape_cast %38 : vector<1x384x128xbf16> to vector<384x128xbf16>
    %cst_39 = arith.constant dense<0.000000e+00> : vector<160x128xf32>
    %40 = tpu.matmul %37, %39, %cst_39 {dimension_numbers = #tpu.dot_dimension_numbers<[1], [0], [0], [1], [0, 0, 1, 1], [], []>} : vector<160x384xbf16>, vector<384x128xbf16>, vector<160x128xf32> -> vector<160x128xf32>
    %41 = arith.addf %30, %35 : vector<160x128xf32>
    %42 = arith.addf %41, %40 : vector<160x128xf32>
    %c0_40 = arith.constant 0 : index
    %c0_41 = arith.constant 0 : index
    %43 = vector.load %arg4[%c0_40, %c0_41] : memref<1x128xf32, #tpu.memory_space<vmem>>, vector<1x128xf32>
    %44 = vector.broadcast %43 : vector<1x128xf32> to vector<160x128xf32>
    %45 = arith.addf %42, %44 : vector<160x128xf32>
    %cst_42 = arith.constant 0.000000e+00 : f32
    %46 = vector.broadcast %cst_42 : f32 to vector<160x128xf32>
    %47 = arith.maximumf %45, %46 : vector<160x128xf32>
    %48 = arith.truncf %47 : vector<160x128xf32> to vector<160x128xbf16>
    %49 = vector.shape_cast %48 : vector<160x128xbf16> to vector<10x16x128xbf16>
    %cst_43 = arith.constant 0.000000e+00 : bf16
    %50 = vector.broadcast %cst_43 : bf16 to vector<10x1x128xbf16>
    %c0_44 = arith.constant 0 : index
    %c0_45 = arith.constant 0 : index
    %c128_46 = arith.constant 128 : index
    %51 = vector.load %arg8[%c0_44, %c0_45, %c128_46] : memref<12x16x384xbf16, #tpu.memory_space<vmem>>, vector<10x16x128xbf16>
    tpu.vector_store %arg8[%c0_44, %c0_45, %c128_46], %49 {strides = array<i32>} : memref<12x16x384xbf16, #tpu.memory_space<vmem>>, vector<10x16x128xbf16>,
    %52 = vector.extract_strided_slice %49 {offsets = [0, 0, 0], sizes = [10, 15, 128], strides = [1, 1, 1]} : vector<10x16x128xbf16> to vector<10x15x128xbf16>
    %c0_47 = arith.constant 0 : index
    %c1_48 = arith.constant 1 : index
    %c0_49 = arith.constant 0 : index
    %53 = vector.load %arg8[%c0_47, %c1_48, %c0_49] : memref<12x16x384xbf16, #tpu.memory_space<vmem>>, vector<10x15x128xbf16>
    tpu.vector_store %arg8[%c0_47, %c1_48, %c0_49], %52 {strides = array<i32>} : memref<12x16x384xbf16, #tpu.memory_space<vmem>>, vector<10x15x128xbf16>,
    %c0_50 = arith.constant 0 : index
    %c0_51 = arith.constant 0 : index
    %c0_52 = arith.constant 0 : index
    %54 = vector.load %arg8[%c0_50, %c0_51, %c0_52] : memref<12x16x384xbf16, #tpu.memory_space<vmem>>, vector<10x1x128xbf16>
    tpu.vector_store %arg8[%c0_50, %c0_51, %c0_52], %50 {strides = array<i32>} : memref<12x16x384xbf16, #tpu.memory_space<vmem>>, vector<10x1x128xbf16>,
    %55 = vector.extract_strided_slice %49 {offsets = [0, 1, 0], sizes = [10, 15, 128], strides = [1, 1, 1]} : vector<10x16x128xbf16> to vector<10x15x128xbf16>
    %c0_53 = arith.constant 0 : index
    %c0_54 = arith.constant 0 : index
    %c256_55 = arith.constant 256 : index
    %56 = vector.load %arg8[%c0_53, %c0_54, %c256_55] : memref<12x16x384xbf16, #tpu.memory_space<vmem>>, vector<10x15x128xbf16>
    tpu.vector_store %arg8[%c0_53, %c0_54, %c256_55], %55 {strides = array<i32>} : memref<12x16x384xbf16, #tpu.memory_space<vmem>>, vector<10x15x128xbf16>,
    %c0_56 = arith.constant 0 : index
    %c15_57 = arith.constant 15 : index
    %c256_58 = arith.constant 256 : index
    %57 = vector.load %arg8[%c0_56, %c15_57, %c256_58] : memref<12x16x384xbf16, #tpu.memory_space<vmem>>, vector<10x1x128xbf16>
    tpu.vector_store %arg8[%c0_56, %c15_57, %c256_58], %50 {strides = array<i32>} : memref<12x16x384xbf16, #tpu.memory_space<vmem>>, vector<10x1x128xbf16>,
    %58 = arith.extui %1 : i1 to i32
    %c0_i32_59 = arith.constant 0 : i32
    %59 = arith.cmpi ne, %58, %c0_i32_59 : i32
    scf.if %59 {
      %cst_91 = arith.constant 0.000000e+00 : bf16
      %91 = vector.broadcast %cst_91 : bf16 to vector<1x16x384xbf16>
      %c0_92 = arith.constant 0 : index
      %c0_93 = arith.constant 0 : index
      %c0_94 = arith.constant 0 : index
      %92 = vector.load %arg8[%c0_92, %c0_93, %c0_94] : memref<12x16x384xbf16, #tpu.memory_space<vmem>>, vector<1x16x384xbf16>
      tpu.vector_store %arg8[%c0_92, %c0_93, %c0_94], %91 {strides = array<i32>} : memref<12x16x384xbf16, #tpu.memory_space<vmem>>, vector<1x16x384xbf16>,
    } else {
    }
    %60 = arith.extui %2 : i1 to i32
    %c0_i32_60 = arith.constant 0 : i32
    %61 = arith.cmpi ne, %60, %c0_i32_60 : i32
    scf.if %61 {
      %cst_91 = arith.constant 0.000000e+00 : bf16
      %91 = vector.broadcast %cst_91 : bf16 to vector<1x16x384xbf16>
      %c9 = arith.constant 9 : index
      %c0_92 = arith.constant 0 : index
      %c0_93 = arith.constant 0 : index
      %92 = vector.load %arg8[%c9, %c0_92, %c0_93] : memref<12x16x384xbf16, #tpu.memory_space<vmem>>, vector<1x16x384xbf16>
      tpu.vector_store %arg8[%c9, %c0_92, %c0_93], %91 {strides = array<i32>} : memref<12x16x384xbf16, #tpu.memory_space<vmem>>, vector<1x16x384xbf16>,
    } else {
    }
    %c0_61 = arith.constant 0 : index
    %c0_62 = arith.constant 0 : index
    %c0_63 = arith.constant 0 : index
    %62 = vector.load %arg8[%c0_61, %c0_62, %c0_63] : memref<12x16x384xbf16, #tpu.memory_space<vmem>>, vector<8x16x384xbf16>
    %63 = vector.shape_cast %62 : vector<8x16x384xbf16> to vector<128x384xbf16>
    %c0_64 = arith.constant 0 : index
    %c0_65 = arith.constant 0 : index
    %c0_66 = arith.constant 0 : index
    %64 = vector.load %arg5[%c0_64, %c0_65, %c0_66] : memref<3x384x128xbf16, #tpu.memory_space<vmem>>, vector<1x384x128xbf16>
    %65 = vector.shape_cast %64 : vector<1x384x128xbf16> to vector<384x128xbf16>
    %cst_67 = arith.constant dense<0.000000e+00> : vector<128x128xf32>
    %66 = tpu.matmul %63, %65, %cst_67 {dimension_numbers = #tpu.dot_dimension_numbers<[1], [0], [0], [1], [0, 0, 1, 1], [], []>} : vector<128x384xbf16>, vector<384x128xbf16>, vector<128x128xf32> -> vector<128x128xf32>
    %c1_68 = arith.constant 1 : index
    %c0_69 = arith.constant 0 : index
    %c0_70 = arith.constant 0 : index
    %67 = vector.load %arg8[%c1_68, %c0_69, %c0_70] : memref<12x16x384xbf16, #tpu.memory_space<vmem>>, vector<8x16x384xbf16>
    %68 = vector.shape_cast %67 : vector<8x16x384xbf16> to vector<128x384xbf16>
    %c1_71 = arith.constant 1 : index
    %c0_72 = arith.constant 0 : index
    %c0_73 = arith.constant 0 : index
    %69 = vector.load %arg5[%c1_71, %c0_72, %c0_73] : memref<3x384x128xbf16, #tpu.memory_space<vmem>>, vector<1x384x128xbf16>
    %70 = vector.shape_cast %69 : vector<1x384x128xbf16> to vector<384x128xbf16>
    %cst_74 = arith.constant dense<0.000000e+00> : vector<128x128xf32>
    %71 = tpu.matmul %68, %70, %cst_74 {dimension_numbers = #tpu.dot_dimension_numbers<[1], [0], [0], [1], [0, 0, 1, 1], [], []>} : vector<128x384xbf16>, vector<384x128xbf16>, vector<128x128xf32> -> vector<128x128xf32>
    %c2_75 = arith.constant 2 : index
    %c0_76 = arith.constant 0 : index
    %c0_77 = arith.constant 0 : index
    %72 = vector.load %arg8[%c2_75, %c0_76, %c0_77] : memref<12x16x384xbf16, #tpu.memory_space<vmem>>, vector<8x16x384xbf16>
    %73 = vector.shape_cast %72 : vector<8x16x384xbf16> to vector<128x384xbf16>
    %c2_78 = arith.constant 2 : index
    %c0_79 = arith.constant 0 : index
    %c0_80 = arith.constant 0 : index
    %74 = vector.load %arg5[%c2_78, %c0_79, %c0_80] : memref<3x384x128xbf16, #tpu.memory_space<vmem>>, vector<1x384x128xbf16>
    %75 = vector.shape_cast %74 : vector<1x384x128xbf16> to vector<384x128xbf16>
    %cst_81 = arith.constant dense<0.000000e+00> : vector<128x128xf32>
    %76 = tpu.matmul %73, %75, %cst_81 {dimension_numbers = #tpu.dot_dimension_numbers<[1], [0], [0], [1], [0, 0, 1, 1], [], []>} : vector<128x384xbf16>, vector<384x128xbf16>, vector<128x128xf32> -> vector<128x128xf32>
    %77 = arith.addf %66, %71 : vector<128x128xf32>
    %78 = arith.addf %77, %76 : vector<128x128xf32>
    %c0_82 = arith.constant 0 : index
    %c0_83 = arith.constant 0 : index
    %79 = vector.load %arg6[%c0_82, %c0_83] : memref<1x128xf32, #tpu.memory_space<vmem>>, vector<1x128xf32>
    %80 = vector.broadcast %79 : vector<1x128xf32> to vector<128x128xf32>
    %81 = arith.addf %78, %80 : vector<128x128xf32>
    %c0_84 = arith.constant 0 : index
    %82 = arith.index_cast %0 : i32 to index
    %c0_85 = arith.constant 0 : index
    %c0_86 = arith.constant 0 : index
    %83 = vector.load %arg2[%c0_84, %82, %c0_85, %c0_86] : memref<1x16x16x128xbf16, #tpu.memory_space<vmem>>, vector<1x8x16x128xbf16>
    %84 = vector.shape_cast %83 : vector<1x8x16x128xbf16> to vector<8x16x128xbf16>
    %85 = arith.extf %84 : vector<8x16x128xbf16> to vector<8x16x128xf32>
    %86 = vector.shape_cast %81 : vector<128x128xf32> to vector<8x16x128xf32>
    %87 = arith.addf %85, %86 : vector<8x16x128xf32>
    %c0_87 = arith.constant 0 : index
    %c0_88 = arith.constant 0 : index
    %c0_89 = arith.constant 0 : index
    %c0_90 = arith.constant 0 : index
    %88 = vector.load %arg7[%c0_87, %c0_88, %c0_89, %c0_90] : memref<1x8x16x128xf32, #tpu.memory_space<vmem>>, vector<1x8x16x128xf32>
    %89 = vector.shape_cast %88 : vector<1x8x16x128xf32> to vector<8x16x128xf32>
    %90 = vector.shape_cast %87 : vector<8x16x128xf32> to vector<1x8x16x128xf32>
    tpu.vector_store %arg7[%c0_87, %c0_88, %c0_89, %c0_90], %90 {strides = array<i32>} : memref<1x8x16x128xf32, #tpu.memory_space<vmem>>, vector<1x8x16x128xf32>,
    return
  }
  func.func @transform_0(%arg0: i32, %arg1: i32) -> (i32, i32, i32, i32) {
    %c0_i32 = arith.constant 0 : i32
    %c0_i32_0 = arith.constant 0 : i32
    %c0_i32_1 = arith.constant 0 : i32
    %c0_i32_2 = arith.constant 0 : i32
    return %arg0, %c0_i32, %c0_i32_0, %c0_i32_1 : i32, i32, i32, i32
  }
  func.func @transform_1(%arg0: i32, %arg1: i32) -> (i32, i32, i32) {
    %c0_i32 = arith.constant 0 : i32
    %c0_i32_0 = arith.constant 0 : i32
    %c0_i32_1 = arith.constant 0 : i32
    %c0_i32_2 = arith.constant 0 : i32
    return %c0_i32, %c0_i32_0, %c0_i32_1 : i32, i32, i32
  }
  func.func @transform_2(%arg0: i32, %arg1: i32) -> (i32, i32) {
    %c0_i32 = arith.constant 0 : i32
    %c0_i32_0 = arith.constant 0 : i32
    %c0_i32_1 = arith.constant 0 : i32
    return %c0_i32, %c0_i32_0 : i32, i32
  }
  func.func @transform_3(%arg0: i32, %arg1: i32) -> (i32, i32, i32) {
    %c0_i32 = arith.constant 0 : i32
    %c0_i32_0 = arith.constant 0 : i32
    %c0_i32_1 = arith.constant 0 : i32
    %c0_i32_2 = arith.constant 0 : i32
    return %c0_i32, %c0_i32_0, %c0_i32_1 : i32, i32, i32
  }
  func.func @transform_4(%arg0: i32, %arg1: i32) -> (i32, i32) {
    %c0_i32 = arith.constant 0 : i32
    %c0_i32_0 = arith.constant 0 : i32
    %c0_i32_1 = arith.constant 0 : i32
    return %c0_i32, %c0_i32_0 : i32, i32
  }
  func.func @transform_5(%arg0: i32, %arg1: i32) -> (i32, i32, i32, i32) {
    %c0_i32 = arith.constant 0 : i32
    %c0_i32_0 = arith.constant 0 : i32
    %c0_i32_1 = arith.constant 0 : i32
    return %arg0, %arg1, %c0_i32, %c0_i32_0 : i32, i32, i32, i32
  }
}

</mosaic_0001>

<bundles_post_ra>
// kernel: tpu_custom_call.1
= control target key start
LH: loop header
LB: loop body
LE: loop exit
PB: predicated region body
PF: predicated region fallthrough
CT: control target
= control target key end

     0   :  { %s8717_s0 = inlined_call_operand.hbm [shape: bf16[2,16,16,128], index: 0, kind: input, shape index: {}]   ;;  %s8718_s1 = inlined_call_operand.hbm [shape: bf16[3,384,128], index: 1, kind: input, shape index: {}]   ;;  %s8719_s2 = inlined_call_operand.vmem [shape: f32[1,128], index: 2, kind: input, shape index: {}]   ;;  %s8720_s3 = inlined_call_operand.hbm [shape: bf16[3,384,128], index: 3, kind: input, shape index: {}]   ;;  %s8721_s4 = inlined_call_operand.vmem [shape: f32[1,128], index: 4, kind: input, shape index: {}]   ;;  %s8722_s5 = inlined_call_operand.hbm [shape: f32[2,16,16,128], index: 5, kind: output, shape index: {}]  }
   0x1   :  { %8747 = sst [smem:[#allocation55_spill]] %s8718_s1 }
   0x2   :  { %8748 = sst [smem:[#allocation56_spill]] %s8720_s3 }
   0x3   :  { %8749 = sst [smem:[#allocation57_spill]] %s8722_s5 }
   0x4   :  { %10 = vsyncpa [#allocation4], 0 }
   0x5   :  { %12 = vsyncpa [#allocation4 + $0x1], 0 }
   0x6   :  { %13 = vsyncpa [#allocation7], 0 }
   0x7   :  { %14 = vsyncpa [#allocation5], 0 }
   0x8   :  { %16 = vsyncpa [#allocation5 + $0x1], 0  ;;  %s7103_s18 = smov 0   ;;  %s7105_s19 = smov 0  }
   0x9   :  { %s7107_s20 = smov 0   ;;  %s7109_s21 = smov 0  }
   0xa   :  { %s7111_s22 = smov 0   ;;  %s7113_s23 = smov 0  }
   0xb   :  { %s7115_s24 = smov 0   ;;  %s7117_s25 = smov 0  }
   0xc   :  { %s7119_s26 = smov 0   ;;  %s7121_s27 = smov 0  }
   0xd   :  { %s7123_s28 = smov 0  }
   0xe LB: > { %8750 = sst [smem:[#allocation13_spill]] %s7016_s18  ;;  %s5296_s29 = sadd.s32 4294967295, %s7056_s28   ;;  %s7056_s28 = sphi %s7123_s28, %s22_s28   ;;  %s7052_s27 = sphi %s7121_s27, %s8911_s27   ;;  %s7048_s26 = sphi %s7119_s26, %s8910_s26   ;;  %s7044_s25 = sphi %s7117_s25, %s8909_s25   ;;  %s7040_s24 = sphi %s7115_s24, %s8901_s24   ;;  %s7036_s23 = sphi %s7113_s23, %s8908_s23   ;;  %s7032_s22 = sphi %s7111_s22, %s8907_s22   ;;  %s7028_s21 = sphi %s7109_s21, %s8906_s21   ;;  %s7024_s20 = sphi %s7107_s20, %s8905_s20   ;;  %s7020_s19 = sphi %s7105_s19, %s8904_s19   ;;  %s7016_s18 = sphi %s7103_s18, %s8903_s18  }
   0xf   : > { %8751 = sst [smem:[#allocation14_spill]] %s7044_s25  ;;  %s5297_s30 = sadd.s32 4294967294, %s7056_s28  }
  0x10   : > { %8752 = sst [smem:[#allocation15_spill]] %s7048_s26  ;;  %p54_p0 = scmp.ne.s32.totalorder %s7032_s22, %s7028_s21 }
  0x11   : > { %p7159_p1 = scmp.eq.s32.totalorder %s5296_s29, 0  ;;  %p163_p2 = scmp.ne.s32.totalorder %s7024_s20, %s7020_s19 }
  0x12   : > { %p164_p4 = scmp.eq.s32.totalorder %s5296_s29, 3  ;;  %p169_p5 = scmp.ne.s32.totalorder %s7020_s19, %s7016_s18 }
  0x13   : > { %p7168_p3 = por %p7159_p1, %p54_p0  ;;  %p170_p6 = scmp.eq.s32.totalorder %s5297_s30, 3 }
  0x14   : > { %p7174_p7 = por %p164_p4, %p163_p2  ;;  %p5298_p8 = scmp.ge.s32.totalorder %s7056_s28, 1 }
  0x15   : > { %p7179_p9 = por %p170_p6, %p169_p5  ;;  %p177_p10 = scmp.lt.s32.totalorder %s7056_s28, 5 }
  0x16   : > { %s8755_s9 = scalar_select %p7174_p7, 1, 0 }
  0x17   : > { %s8757_s10 = scalar_select %p7179_p9, 1, 0 }
  0x18   : > { %8756 = sst [smem:[#allocation16_spill]] %s8755_s9  ;;  %p7184_p11 = pnand %p5298_p8, %p177_p10 }
  0x19   : > { %8758 = sst [smem:[#allocation17_spill]] %s8757_s10  ;;  %s7058_s12 = smov [#allocation6]  }
  0x1a   : > { %s189_s13 = sshll.u32 %s7058_s12, 4  ;;  %p6466_p12 = pneg %p7184_p11  ;;  %s190_s13 = int_to_ptr.vmem [resolvable:$true] %s189_s13 }
  0x1b   : > { %s7059_s15 = smov [#allocation8]   ;;  %s6863_s17 = scalar_lea.vmem %s190_s13, 9216 }
  0x1c   : > { %p7192_p13 = pnand %p6466_p12, %p7159_p1  ;;  %s205_s16 = sshll.u32 %s7059_s15, 4  ;;  %s206_s16 = int_to_ptr.vmem [resolvable:$true] %s205_s16 }
  0x1d   : > { %p6864_p2 = scmp.ne.s32.totalorder %s190_s13, %s6863_s17  ;;  %p6871_p6 = scmp.lt.s32.totalorder %s190_s13, %s190_s13 }
  0x1e   : > { %p6854_p0 = pneg %p7192_p13  ;;  %p6872_p8 = scmp.lt.s32.totalorder %s6863_s17, %s6863_s17 }
  0x20   : > { %p6866_p4 = pnand %p6864_p2, %p6854_p0  ;;  %p6873_p10 = por %p6872_p8, %p6871_p6 }
  0x22   : > { %p6867_p5 = pneg %p6866_p4 }
  0x24   : > { %p6874_p12 = pnand %p6873_p10, %p6867_p5 }
  0x26   : > { %6877 = shalt.err (!%p6874_p12)
}
  0x27   : > { %s8723_s21 = smov 64   ;;  %s8724_s29 = smov 4  }
  0x28   : > { %s8761_s1 = sld [smem:[#allocation55_spill]]  ;;  %s6889_s15 = scalar_lea.vmem %s206_s16, 9216 }
  0x29   : > { %p6890_p2 = scmp.ne.s32.totalorder %s206_s16, %s6889_s15  ;;  %p6897_p5 = scmp.lt.s32.totalorder %s206_s16, %s206_s16 }
  0x2a   : > { %p6898_p8 = scmp.lt.s32.totalorder %s6889_s15, %s6889_s15 }
  0x2b   : > { %p6892_p4 = pnand %p6890_p2, %p6854_p0 }
  0x2c   : > { %p6899_p10 = por %p6898_p8, %p6897_p5 }
  0x2d   : > { %p6893_p6 = pneg %p6892_p4 }
  0x2e   : > { %6469 = dma.hbm_to_vmem [thread:$0]  (!%p7192_p13), %s8761_s1, 9216, %s190_s13, [#allocation7], %s8723_s21, %s8723_s21, %s8724_s29  }
  0x2f   : > { %p6900_p12 = pnand %p6899_p10, %p6893_p6 }
  0x31   : > { %6903 = shalt.err (!%p6900_p12)
}
  0x32   : > { %s8762_s3 = sld [smem:[#allocation56_spill]]  ;;  %s31_s13 = sadd.s32 1, %s7048_s26 }
  0x33   : > { %s34_s14 = sadd.s32 1, %s7052_s27  ;;  %p32_p0 = scmp.ge.s32.totalorder %s31_s13, 2 }
  0x34   : > { %s41_s30 = sadd.s32 1, %s7036_s23  ;;  %p48_p2 = scmp.ne.s32.totalorder %s7036_s23, %s7032_s22 }
  0x35   : > { %p49_p4 = scmp.eq.s32.totalorder %s7056_s28, 0  ;;  %s8913_s13 = smov (%p32_p0, %s31_s13), 0 }
  0x36   : > { %8763 = sst [smem:[#allocation18_spill]] %s8913_s13  ;;  %s8915_s14 = smov (!%p32_p0, %s34_s14), %s7052_s27 }
  0x37   : > { %p7229_p6 = por %p49_p4, %p48_p2  ;;  %s149_s12 = ssub.s32 %s7048_s26, %s8913_s13 }
  0x38   : > { %6472 = dma.hbm_to_vmem [thread:$0]  (!%p7192_p13), %s8762_s3, 9216, %s206_s16, [#allocation7], %s8723_s21, %s8723_s21, %s8724_s29  }
  0x39   : > { %p36_p13 = scmp.ge.s32.totalorder %s8915_s14, 2  ;;  %p6483_p5 = scmp.lt.s32.totalorder %s7056_s28, 4 }
  0x3a   : > { %s222_s16 = sand.u32 1, %s7036_s23   ;;  %s5663_s15 = sshll.u32 %s7052_s27, 11 }
  0x3b   : > { %s8917_s14 = smov (%p36_p13, %s8915_s14), 0  ;;  %s5302_s17 = sshll.u32 %s222_s16, 7 }
  0x3c   : > { %s38_s21 = ssub.s32 %s7052_s27, %s8917_s14  ;;  %s232_s10 = scalar_lea.hbm %s8717_s0, %s5663_s15 }
  0x3d   : > { %p39_p8 = scmp.eq.s32.totalorder %s38_s21, 0  ;;  %s150_s29 = sor.u32 %s149_s12, %s38_s21 }
  0x3e   : > { %p151_p10 = scmp.eq.s32.totalorder %s150_s29, 0  ;;  %s8765_s13 = sadd.s32 1, %s7024_s20 }
  0x3f   : > { %s7246_s18 = scalar_select %p39_p8, %s7036_s23, %s41_s30  }
  0x40   : > { %s7251_s26 = scalar_select %p151_p10, %s7024_s20, %s8765_s13  }
  0x41   : > { %s226_s5 = scalar_lea.vmem [#allocation3], %s5302_s17  ;;  %p7257_p12 = pnand %p6483_p5, %p7229_p6 }
  0x42   : > { %s233_s9 = sshll.u32 %s226_s5, 4  ;;  %s223_s21 = scalar_lea.sflag [#allocation4], %s222_s16  ;;  %s234_s9 = int_to_ptr.vmem [resolvable:$true] %s233_s9 }
  0x43   : > { %p6906_p0 = pneg %p7257_p12  ;;  %s6917_s1 = scalar_lea.vmem %s234_s9, 2048 }
  0x44   : > { %p6918_p2 = scmp.ne.s32.totalorder %s234_s9, %s6917_s1  ;;  %s7062_s3 = smov [#allocation3]  }
  0x45   : > { %s6922_s29 = sshll.u32 %s7062_s3, 4  ;;  %s6923_s29 = int_to_ptr.vmem [resolvable:$false] %s6922_s29 }
  0x46   : > { %p6920_p4 = pnand %p6918_p2, %p6906_p0  ;;  %s6924_s13 = scalar_lea.vmem %s6923_s29, 4096 }
  0x47   : > { %p6925_p8 = scmp.lt.s32.totalorder %s234_s9, %s6923_s29  ;;  %p6926_p10 = scmp.lt.s32.totalorder %s6924_s13, %s6917_s1 }
  0x48   : > { %p6921_p13 = pneg %p6920_p4 }
  0x49   : > { %p6927_p9 = por %p6926_p10, %p6925_p8 }
  0x4b   : > { %p6928_p6 = pnand %p6927_p9, %p6921_p13 }
  0x4d   : > { %6931 = shalt.err (!%p6928_p6)
}
  0x4e   : > { %s8767_s5 = smov 4   ;;  %s8768_s30 = smov 64  }
  0x4f   : > { %6476 = dma.hbm_to_vmem [thread:$0]  (!%p7257_p12), %s232_s10, 2048, %s234_s9, %s223_s21, %s8768_s30, %s8768_s30, %s8767_s5  }
  0x50   : > { %245 = sbr.rel (%p7184_p11) target bundleno = 1130 (0x46a), region = 40 }
  0x55   : > { %s247_s7 = sand.u32 1, %s7032_s22  }
  0x56   : > { %s7271_s12 = sshll.u32 %s247_s7, 7  ;;  %s248_s16 = scalar_lea.sflag [#allocation4], %s247_s7 }
  0x57   : > { %s251_s15 = scalar_lea.vmem [#allocation3], %s7271_s12 }
  0x58   : > { %7003 = dma.done.wait (%p7168_p3), %s248_s16, 2048  }
  0x59   : > { %7005 = vsyncadd (%p7168_p3), %s248_s16, 4294965248 }
  0x5a   : > { %7007 = dma.done.wait (%p7159_p1), [#allocation7], 18432  }
  0x5b   : > { %7009 = vsyncadd (%p7159_p1), [#allocation7], 4294948864  ;;  %s283_s25 = sand.u32 1, %s7020_s19   ;;  %s5310_s9 = sshll.u32 %s7040_s24, 3 }
  0x5c   : > { %s5309_s10 = sshll.u32 %s283_s25, 7  ;;  %p5311_p9 = scmp.ne.s32.totalorder %s7040_s24, 0 }
  0x5d   : > { %s7286_s11 = scalar_lea.vmem [#allocation9], %s5309_s10 }
  0x5e   : > { %293 = sbr.rel (%p5311_p9) target bundleno = 104 (0x68), region = 56 }
  0x63   : > { %v7063_v0 = vmov 0  }
  0x64   : > { %294 = vst [vmem:[#allocation2] sm:$0xff] %v7063_v0  ;;  %295 = vst [vmem:[#allocation2 + $0x8] sm:$0xf] %v7063_v0 }
  0x65   : > { %296 = vst [vmem:[#allocation2 + $0xc] sm:$0xff] %v7063_v0  ;;  %297 = vst [vmem:[#allocation2 + $0x14] sm:$0xf] %v7063_v0 }
  0x66   : > { %298 = vst [vmem:[#allocation2 + $0x18] sm:$0xff] %v7063_v0  ;;  %299 = vst [vmem:[#allocation2 + $0x20] sm:$0xf] %v7063_v0 }
  0x67   : > { %300 = vst [vmem:[#allocation2 + $0x24] sm:$0xff] %v7063_v0  ;;  %301 = vst [vmem:[#allocation2 + $0x2c] sm:$0xf] %v7063_v0 }
  0x68 PF: > { %p5312_p1 = scmp.le.s32.totalorder %s7040_s24, 0 }
  0x69   : > { %s5313_s6 = sadd.s32 (!%p5312_p1), 4294967294, %s5310_s9 }
  0x6a   : > { %305 = sbr.rel (%p5312_p1) target bundleno = 135 (0x87), region = 60  ;;  %s5664_s8 = sshll.u32 (!%p5312_p1), %s5313_s6, 3 }
  0x6b   : > { %s309_s17 = scalar_lea.vmem (!%p5312_p1), %s251_s15, %s5664_s8 [#allocation3] }
  0x6f   : > { %vm361_vm0 = vcmask 1043456   ;;  %vm362_vm1 = vsmask.f32 7938  ;;  %v310_v1 = vld [vmem:[%s309_s17] sm:$0xf]  ;;  %v7064_v4 = vmov 0  }
  0x70   : > { %v312_v2 = vld [vmem:[%s309_s17 + $0x8] sm:$0xf]  ;;  %v311_v3 = vld [vmem:[%s309_s17 + $0x4] sm:$0xf]  ;;  %v314_v5 = vmax.bf16 %v7064_v4, %v310_v1  ;;  %vm380_vm2 = vsmask.f32 3328  ;;  %vm7296_vm6 = vmand %vm361_vm0, %vm362_vm1 }
  0x71   : > { %v316_v6 = vmax.bf16 %v7064_v4, %v312_v2  ;;  %v315_v7 = vmax.bf16 %v7064_v4, %v311_v3  ;;  %v313_v8 = vld [vmem:[%s309_s17 + $0xc] sm:$0xf]  ;;  %vm322_vm3 = vsmask.f32 256  ;;  %vm323_vm4 = vsmask.f32 4368  ;;  %vm7312_vm8 = vmand %vm361_vm0, %vm380_vm2 }
  0x72   : > { %v317_v9 = vmax.bf16 %v7064_v4, %v313_v8  ;;  %vm381_vm5 = vsmask.f32 7440  ;;  %v326_v10 = vshrl.u32 %v314_v5, 16  ;;  %v329_v11 = vshll.u32 %v314_v5, 16  ;;  %318 = vst [vmem:[#allocation2 + $0x4] sm:$0xf] %v314_v5  ;;  %vm7302_vm7 = vmor %vm322_vm3, %vm323_vm4 }
  0x73   : > { %v342_v12 = vshrl.u32 %v316_v6, 16  ;;  %v345_v13 = vshll.u32 %v316_v6, 16  ;;  %320 = vst [vmem:[#allocation2 + $0x1c] sm:$0xf] %v316_v6  ;;  %319 = vst [vmem:[#allocation2 + $0x10] sm:$0xf] %v315_v7 }
  0x74   : > { %v334_v14 = vshrl.u32 %v315_v7, 16  ;;  %v337_v15 = vshll.u32 %v315_v7, 16  ;;  %v350_v16 = vshrl.u32 %v317_v9, 16  ;;  %v353_v17 = vshll.u32 %v317_v9, 16  ;;  %321 = vst [vmem:[#allocation2 + $0x28] sm:$0xf] %v317_v9  ;;  %vm7318_vm9 = vmor %vm380_vm2, %vm381_vm5 }
  0x75   : > { %v328_v18 = vrot.slane %v326_v10, 7  ;;  %v364_v19 = vld [vmem:[#allocation2] sm:$0xf]  ;;  %v344_v20 = vrot.slane %v342_v12, 7  ;;  %v383_v21 = vrot.slane %v326_v10, 4  ;;  %v384_v22 = vrot.slane %v329_v11, 5 }
  0x76   : > { %v368_v24 = vld [vmem:[#allocation2 + $0x18] sm:$0xf]  ;;  %v387_v25 = vrot.slane %v337_v15, 5  ;;  %v389_v26 = vrot.slane %v334_v14, 4  ;;  %v396_v27 = vrot.slane %v353_v17, 5  ;;  %v398_v28 = vrot.slane %v350_v16, 4 }
  0x77   : > { %v331_v29 = vor.u32 %v329_v11, %v328_v18  ;;  %v347_v30 = vor.u32 %v345_v13, %v344_v20  ;;  %v332_v31 = vrot.slane %v328_v18, 4  ;;  %v336_v32 = vrot.slane %v334_v14, 7  ;;  %v407_v41 = vld [vmem:[#allocation2 + $0x14] sm:$0xf]  ;;  %v411_v42 = vld [vmem:[#allocation2 + $0x2c] sm:$0xf] }
  0x78   : > { %v390_v33 = vor.u32 %v389_v26, %v387_v25  ;;  %v399_v34 = vor.u32 %v398_v28, %v396_v27  ;;  %v348_v36 = vrot.slane %v344_v20, 4  ;;  %v352_v37 = vrot.slane %v350_v16, 7 }
  0x79   : > { %v365_v38 = vsel %vm7296_vm6, %v331_v29, %v364_v19  ;;  %v369_v39 = vsel %vm7296_vm6, %v347_v30, %v368_v24  ;;  %v339_v43 = vor.u32 %v337_v15, %v336_v32  ;;  %v385_v44 = vor.u32 %v384_v22, %v383_v21 }
  0x7a   : > { %366 = vst [vmem:[#allocation2] sm:$0xf] %v365_v38  ;;  %370 = vst [vmem:[#allocation2 + $0x18] sm:$0xf] %v369_v39  ;;  %v391_v45 = vrot.slane %v390_v33, 4  ;;  %v400_v46 = vrot.slane %v399_v34, 4  ;;  %v355_v47 = vor.u32 %v353_v17, %v352_v37 }
  0x7b   : > { %v392_v49 = vrot.slane %v342_v12, 4  ;;  %v340_v50 = vsel %vm7302_vm7, %v332_v31, %v339_v43  ;;  %v386_v51 = vrot.slane %v385_v44, 4  ;;  %v393_v52 = vrot.slane %v345_v13, 5 }
  0x7c   : > { %v408_v53 = vsel %vm7312_vm8, %v391_v45, %v407_v41  ;;  %v412_v54 = vsel %vm7312_vm8, %v400_v46, %v411_v42  ;;  %367 = vst [vmem:[#allocation2 + $0xc] sm:$0xf] %v340_v50  ;;  %vm372_vm10 = vcmask 1040384   ;;  %v356_v55 = vsel %vm7302_vm7, %v348_v36, %v355_v47 }
  0x7d   : > { %409 = vst [vmem:[#allocation2 + $0x14] sm:$0xf] %v408_v53  ;;  %413 = vst [vmem:[#allocation2 + $0x2c] sm:$0xf] %v412_v54  ;;  %v388_v56 = vsel %vm7318_vm9, %v386_v51, %v387_v25  ;;  %v394_v57 = vor.u32 %v393_v52, %v392_v49  ;;  %vm414_vm12 = vcmask 1043459  }
  0x7e   : > { %371 = vst [vmem:[#allocation2 + $0x24] sm:$0xf] %v356_v55  ;;  %405 = vst [vmem:[#allocation2 + $0x8] sm:$0xf] %v388_v56  ;;  %vm415_vm13 = vsmask.f32 7950 }
  0x7f   : > { %vm373_vm11 = vmand %vm372_vm10, %vm322_vm3  ;;  %v395_v58 = vrot.slane %v394_v57, 4 }
  0x80   : > { %vm416_vm14 = vmand %vm414_vm12, %vm415_vm13 }
  0x81   : > { %v374_v59 = vld [vmem:[#allocation2] sm:$0x1]  ;;  %v377_v60 = vld [vmem:[#allocation2 + $0x18] sm:$0x1]  ;;  %v397_v61 = vsel %vm7318_vm9, %v395_v58, %v396_v27 }
  0x82   : > { %v375_v62 = vsel %vm373_vm11, 0, %v374_v59  ;;  %v378_v63 = vsel %vm373_vm11, 0, %v377_v60  ;;  %410 = vst [vmem:[#allocation2 + $0x20] sm:$0xf] %v397_v61 }
  0x83   : > { %376 = vst [vmem:[#allocation2] sm:$0x1] %v375_v62  ;;  %379 = vst [vmem:[#allocation2 + $0x18] sm:$0x1] %v378_v63 }
  0x84   : > { %v417_v0 = vld [vmem:[#allocation2 + $0x14] sm:$0x8]  ;;  %v420_v1 = vld [vmem:[#allocation2 + $0x2c] sm:$0x8] }
  0x85   : > { %v418_v2 = vsel %vm416_vm14, 0, %v417_v0  ;;  %v421_v3 = vsel %vm416_vm14, 0, %v420_v1 }
  0x86   : > { %419 = vst [vmem:[#allocation2 + $0x14] sm:$0x8] %v418_v2  ;;  %422 = vst [vmem:[#allocation2 + $0x2c] sm:$0x8] %v421_v3 }
  0x87 PF: > { %s5666_s21 = sshll.u32 %s7040_s24, 6  ;;  %v7065_v7 = vmov 0   ;;  %vm622_vm15 = vcmask 1043456   ;;  %vm623_vm0 = vsmask.f32 7938  ;;  %vm657_vm4 = vcmask 1040384  }
  0x88   : > { %s7338_s1 = scalar_lea.vmem %s251_s15, %s5666_s21 [#allocation3]  ;;  %vm7388_vm1 = vmand %vm622_vm15, %vm623_vm0  ;;  %v625_v30 = vld [vmem:[#allocation2 + $0x30] sm:$0xf]  ;;  %v629_v31 = vld [vmem:[#allocation2 + $0x48] sm:$0xf]  ;;  %vm683_vm2 = vsmask.f32 3328 }
  0x89   : > { %v426_v4 = vld [vmem:[%s7338_s1] sm:$0xf]  ;;  %v428_v5 = vld [vmem:[%s7338_s1 + $0x8] sm:$0xf]  ;;  %v430_v6 = vld [vmem:[%s7338_s1 + $0x10] sm:$0xf] }
  0x8a   : > { %v7344_v8 = vmax.bf16 %v7065_v7, %v426_v4  ;;  %v7347_v9 = vmax.bf16 %v7065_v7, %v428_v5  ;;  %v7350_v10 = vmax.bf16 %v7065_v7, %v430_v6  ;;  %v432_v11 = vld [vmem:[%s7338_s1 + $0x18] sm:$0xf]  ;;  %v434_v13 = vld [vmem:[%s7338_s1 + $0x20] sm:$0xf]  ;;  %v436_v14 = vld [vmem:[%s7338_s1 + $0x28] sm:$0xf] }
  0x8b   : > { %v7354_v12 = vmax.bf16 %v7065_v7, %v432_v11  ;;  %v438_v23 = vld [vmem:[%s7338_s1 + $0x30] sm:$0xf]  ;;  %v7380_v26 = vmax.bf16 %v7065_v7, %v434_v13  ;;  %v7383_v27 = vmax.bf16 %v7065_v7, %v436_v14  ;;  %v440_v28 = vld [vmem:[%s7338_s1 + $0x38] sm:$0xf]  ;;  %v633_v38 = vld [vmem:[#allocation2 + $0x60] sm:$0xf] }
  0x8c   : > { %v479_v15 = vshrl.u32 %v7344_v8, 16  ;;  %v8746_v16 = vshll.u32 %v7344_v8, 16  ;;  %459 = vst [vmem:[#allocation2 + $0x34] sm:$0xf] %v7344_v8  ;;  %v8745_v17 = vshrl.u32 %v7347_v9, 16  ;;  %v8744_v18 = vshll.u32 %v7347_v9, 16  ;;  %vm7529_vm3 = vmand %vm622_vm15, %vm683_vm2 }
  0x8d   : > { %461 = vst [vmem:[#allocation2 + $0x4c] sm:$0xf] %v7347_v9  ;;  %463 = vst [vmem:[#allocation2 + $0x64] sm:$0xf] %v7350_v10  ;;  %v8743_v19 = vshrl.u32 %v7350_v10, 16  ;;  %v8742_v20 = vshll.u32 %v7350_v10, 16  ;;  %v7401_v34 = vmax.bf16 %v7065_v7, %v438_v23  ;;  %v7404_v35 = vmax.bf16 %v7065_v7, %v440_v28 }
  0x8e   : > { %v8741_v21 = vshrl.u32 %v7354_v12, 16  ;;  %v8740_v22 = vshll.u32 %v7354_v12, 16  ;;  %465 = vst [vmem:[#allocation2 + $0x7c] sm:$0xf] %v7354_v12  ;;  %v7373_v24 = vrot.slane %v479_v15, 7  ;;  %v7377_v25 = vrot.slane %v8745_v17, 7 }
  0x8f   : > { %v7394_v32 = vrot.slane %v8743_v19, 7  ;;  %v637_v39 = vld [vmem:[#allocation2 + $0x78] sm:$0xf]  ;;  %v8739_v40 = vshrl.u32 %v7380_v26, 16  ;;  %v8738_v41 = vshll.u32 %v7380_v26, 16  ;;  %v8737_v44 = vshrl.u32 %v7383_v27, 16 }
  0x90   : > { %v7398_v33 = vrot.slane %v8741_v21, 7  ;;  %v484_v36 = vor.u32 %v8746_v16, %v7373_v24  ;;  %v500_v37 = vor.u32 %v8744_v18, %v7377_v25  ;;  %467 = vst [vmem:[#allocation2 + $0x94] sm:$0xf] %v7380_v26  ;;  %469 = vst [vmem:[#allocation2 + $0xac] sm:$0xf] %v7383_v27  ;;  %v8736_v45 = vshll.u32 %v7383_v27, 16 }
  0x91   : > { %v516_v42 = vor.u32 %v8742_v20, %v7394_v32  ;;  %471 = vst [vmem:[#allocation2 + $0xc4] sm:$0xf] %v7401_v34  ;;  %473 = vst [vmem:[#allocation2 + $0xdc] sm:$0xf] %v7404_v35  ;;  %v427_v46 = vld [vmem:[%s7338_s1 + $0x4] sm:$0xf] }
  0x92   : > { %v532_v43 = vor.u32 %v8740_v22, %v7398_v33  ;;  %v626_v47 = vsel %vm7388_vm1, %v484_v36, %v625_v30  ;;  %v630_v48 = vsel %vm7388_vm1, %v500_v37, %v629_v31  ;;  %v7433_v49 = vrot.slane %v8739_v40, 7  ;;  %v429_v51 = vld [vmem:[%s7338_s1 + $0xc] sm:$0xf]  ;;  %v431_v52 = vld [vmem:[%s7338_s1 + $0x14] sm:$0xf]  ;;  %p5318_p3 = scmp.ne.s32.totalorder %s7040_s24, 1 }
  0x93   : > { %v8735_v50 = vshrl.u32 %v7401_v34, 16  ;;  %627 = vst [vmem:[#allocation2 + $0x30] sm:$0xf] %v626_v47  ;;  %631 = vst [vmem:[#allocation2 + $0x48] sm:$0xf] %v630_v48  ;;  %v634_v53 = vsel %vm7388_vm1, %v516_v42, %v633_v38  ;;  %v7444_v56 = vrot.slane %v8737_v44, 7  ;;  %v7461_v2 = vmax.bf16 %v7065_v7, %v427_v46 }
  0x94   : > { %v638_v54 = vsel %vm7388_vm1, %v532_v43, %v637_v39  ;;  %v641_v55 = vld [vmem:[#allocation2 + $0x90] sm:$0xf]  ;;  %v8734_v57 = vshll.u32 %v7401_v34, 16  ;;  %v433_v58 = vld [vmem:[%s7338_s1 + $0x1c] sm:$0xf]  ;;  %v548_v59 = vor.u32 %v8738_v41, %v7433_v49  ;;  %v8733_v62 = vshrl.u32 %v7404_v35, 16 }
  0x95   : > { %635 = vst [vmem:[#allocation2 + $0x60] sm:$0xf] %v634_v53  ;;  %639 = vst [vmem:[#allocation2 + $0x78] sm:$0xf] %v638_v54  ;;  %v645_v60 = vld [vmem:[#allocation2 + $0xa8] sm:$0xf]  ;;  %v564_v0 = vor.u32 %v8736_v45, %v7444_v56  ;;  %v7464_v3 = vmax.bf16 %v7065_v7, %v429_v51  ;;  %v7467_v4 = vmax.bf16 %v7065_v7, %v431_v52 }
  0x96   : > { %v7453_v61 = vrot.slane %v8735_v50, 7  ;;  %v8732_v63 = vshll.u32 %v7404_v35, 16  ;;  %v649_v1 = vld [vmem:[#allocation2 + $0xc0] sm:$0xf]  ;;  %v642_v5 = vsel %vm7388_vm1, %v548_v59, %v641_v55  ;;  %v7476_v11 = vrot.slane %v8733_v62, 7 }
  0x97   : > { %v7479_v13 = vmax.bf16 %v7065_v7, %v433_v58  ;;  %643 = vst [vmem:[#allocation2 + $0x90] sm:$0xf] %v642_v5  ;;  %v646_v14 = vsel %vm7388_vm1, %v564_v0, %v645_v60  ;;  %v653_v23 = vld [vmem:[#allocation2 + $0xd8] sm:$0xf]  ;;  %v487_v28 = vshrl.u32 %v7461_v2, 16  ;;  %v490_v30 = vshll.u32 %v7461_v2, 16 }
  0x98   : > { %v580_v6 = vor.u32 %v8734_v57, %v7453_v61  ;;  %460 = vst [vmem:[#allocation2 + $0x40] sm:$0xf] %v7461_v2  ;;  %v503_v31 = vshrl.u32 %v7464_v3, 16  ;;  %462 = vst [vmem:[#allocation2 + $0x58] sm:$0xf] %v7464_v3  ;;  %v596_v37 = vor.u32 %v8732_v63, %v7476_v11  ;;  %v506_v38 = vshll.u32 %v7464_v3, 16 }
  0x99   : > { %464 = vst [vmem:[#allocation2 + $0x70] sm:$0xf] %v7467_v4  ;;  %647 = vst [vmem:[#allocation2 + $0xa8] sm:$0xf] %v646_v14  ;;  %v519_v39 = vshrl.u32 %v7467_v4, 16  ;;  %v7501_v46 = vrot.slane %v490_v30, 5 }
  0x9a   : > { %v650_v36 = vsel %vm7388_vm1, %v580_v6, %v649_v1  ;;  %466 = vst [vmem:[#allocation2 + $0x88] sm:$0xf] %v7479_v13  ;;  %v435_v42 = vld [vmem:[%s7338_s1 + $0x24] sm:$0xf]  ;;  %v437_v43 = vld [vmem:[%s7338_s1 + $0x2c] sm:$0xf]  ;;  %v654_v53 = vsel %vm7388_vm1, %v596_v37, %v653_v23 }
  0x9b   : > { %651 = vst [vmem:[#allocation2 + $0xc0] sm:$0xf] %v650_v36  ;;  %v692_v47 = vrot.slane %v487_v28, 4  ;;  %v701_v48 = vrot.slane %v503_v31, 4  ;;  %v522_v51 = vshll.u32 %v7467_v4, 16  ;;  %v7513_v54 = vrot.slane %v506_v38, 5 }
  0x9c   : > { %v439_v52 = vld [vmem:[%s7338_s1 + $0x34] sm:$0xf]  ;;  %v710_v55 = vrot.slane %v519_v39, 4  ;;  %v535_v58 = vshrl.u32 %v7479_v13, 16  ;;  %655 = vst [vmem:[#allocation2 + $0xd8] sm:$0xf] %v654_v53  ;;  %v7525_v1 = vmax.bf16 %v7065_v7, %v435_v42  ;;  %v7537_v36 = vmax.bf16 %v7065_v7, %v437_v43 }
  0x9d   : > { %v693_v59 = vor.u32 %v692_v47, %v7501_v46  ;;  %v7521_v60 = vrot.slane %v522_v51, 5  ;;  %v538_v0 = vshll.u32 %v7479_v13, 16  ;;  %v776_v6 = vld [vmem:[#allocation2 + $0x44] sm:$0xf]  ;;  %v702_v14 = vor.u32 %v701_v48, %v7513_v54  ;;  %v780_v47 = vld [vmem:[#allocation2 + $0x5c] sm:$0xf] }
  0x9e   : > { %v719_v23 = vrot.slane %v535_v58, 4  ;;  %v7540_v37 = vmax.bf16 %v7065_v7, %v439_v52  ;;  %v551_v48 = vshrl.u32 %v7525_v1, 16  ;;  %468 = vst [vmem:[#allocation2 + $0xa0] sm:$0xf] %v7525_v1  ;;  %v784_v57 = vld [vmem:[#allocation2 + $0x74] sm:$0xf] }
  0x9f   : > { %v694_v42 = vrot.slane %v693_v59, 4  ;;  %v711_v53 = vor.u32 %v710_v55, %v7521_v60  ;;  %v7545_v63 = vrot.slane %v538_v0, 5  ;;  %v703_v62 = vrot.slane %v702_v14, 4  ;;  %470 = vst [vmem:[#allocation2 + $0xb8] sm:$0xf] %v7537_v36 }
  0xa0   : > { %v554_v43 = vshll.u32 %v7525_v1, 16  ;;  %v567_v52 = vshrl.u32 %v7537_v36, 16  ;;  %v570_v59 = vshll.u32 %v7537_v36, 16  ;;  %472 = vst [vmem:[#allocation2 + $0xd0] sm:$0xf] %v7540_v37  ;;  %v728_v14 = vrot.slane %v551_v48, 4 }
  0xa1   : > { %v777_v55 = vsel %vm7529_vm3, %v694_v42, %v776_v6  ;;  %v712_v50 = vrot.slane %v711_v53, 4  ;;  %v720_v45 = vor.u32 %v719_v23, %v7545_v63  ;;  %v441_v44 = vld [vmem:[%s7338_s1 + $0x3c] sm:$0xf]  ;;  %v781_v41 = vsel %vm7529_vm3, %v703_v62, %v780_v47  ;;  %v788_v40 = vld [vmem:[#allocation2 + $0x8c] sm:$0xf] }
  0xa2   : > { %778 = vst [vmem:[#allocation2 + $0x44] sm:$0xf] %v777_v55  ;;  %v7564_v22 = vrot.slane %v554_v43, 5  ;;  %v7568_v21 = vrot.slane %v570_v59, 5  ;;  %v737_v6 = vrot.slane %v567_v52, 4  ;;  %v583_v62 = vshrl.u32 %v7540_v37, 16 }
  0xa3   : > { %782 = vst [vmem:[#allocation2 + $0x5c] sm:$0xf] %v781_v41  ;;  %v785_v23 = vsel %vm7529_vm3, %v712_v50, %v784_v57  ;;  %v721_v42 = vrot.slane %v720_v45, 4  ;;  %v586_v47 = vshll.u32 %v7540_v37, 16  ;;  %v792_v55 = vld [vmem:[#allocation2 + $0xa4] sm:$0xf]  ;;  %v7579_v19 = vmax.bf16 %v7065_v7, %v441_v44 }
  0xa4   : > { %786 = vst [vmem:[#allocation2 + $0x74] sm:$0xf] %v785_v23  ;;  %v729_v53 = vor.u32 %v728_v14, %v7564_v22  ;;  %v738_v20 = vor.u32 %v737_v6, %v7568_v21  ;;  %vm475_vm5 = vsmask.f32 256  ;;  %v796_v18 = vld [vmem:[#allocation2 + $0xbc] sm:$0xf] }
  0xa5   : > { %v789_v41 = vsel %vm7529_vm3, %v721_v42, %v788_v40  ;;  %v7585_v45 = vrot.slane %v586_v47, 5  ;;  %v746_v50 = vrot.slane %v583_v62, 4  ;;  %vm476_vm6 = vsmask.f32 4368  ;;  %474 = vst [vmem:[#allocation2 + $0xe8] sm:$0xf] %v7579_v19  ;;  %vm7637_vm8 = vmand %vm657_vm4, %vm475_vm5 }
  0xa6   : > { %790 = vst [vmem:[#allocation2 + $0x8c] sm:$0xf] %v789_v41  ;;  %v730_v57 = vrot.slane %v729_v53, 4  ;;  %v739_v14 = vrot.slane %v738_v20, 4  ;;  %v599_v6 = vshrl.u32 %v7579_v19, 16  ;;  %v602_v7 = vshll.u32 %v7579_v19, 16  ;;  %vm7607_vm7 = vmor %vm475_vm5, %vm476_vm6 }
  0xa7   : > { %v747_v40 = vor.u32 %v746_v50, %v7585_v45  ;;  %v485_v44 = vrot.slane %v7373_v24, 4  ;;  %v489_v23 = vrot.slane %v487_v28, 7  ;;  %v501_v42 = vrot.slane %v7377_v25, 4  ;;  %v800_v53 = vld [vmem:[#allocation2 + $0xd4] sm:$0xf] }
  0xa8   : > { %v793_v41 = vsel %vm7529_vm3, %v730_v57, %v792_v55  ;;  %v797_v20 = vsel %vm7529_vm3, %v739_v14, %v796_v18  ;;  %v7603_v17 = vrot.slane %v602_v7, 5  ;;  %v755_v16 = vrot.slane %v599_v6, 4  ;;  %v804_v2 = vld [vmem:[#allocation2 + $0xec] sm:$0xf] }
  0xa9   : > { %794 = vst [vmem:[#allocation2 + $0xa4] sm:$0xf] %v793_v41  ;;  %798 = vst [vmem:[#allocation2 + $0xbc] sm:$0xf] %v797_v20  ;;  %v748_v25 = vrot.slane %v747_v40, 4  ;;  %v492_v28 = vor.u32 %v490_v30, %v489_v23  ;;  %v505_v18 = vrot.slane %v503_v31, 7 }
  0xaa   : > { %v517_v55 = vrot.slane %v7394_v32, 4  ;;  %v756_v50 = vor.u32 %v755_v16, %v7603_v17  ;;  %v521_v57 = vrot.slane %v519_v39, 7  ;;  %v533_v14 = vrot.slane %v7398_v33, 4  ;;  %v659_v31 = vld [vmem:[#allocation2 + $0x30] sm:$0x1] }
  0xab   : > { %v537_v41 = vrot.slane %v535_v58, 7  ;;  %v801_v40 = vsel %vm7529_vm3, %v748_v25, %v800_v53  ;;  %v493_v30 = vsel %vm7607_vm7, %v485_v44, %v492_v28  ;;  %v508_v32 = vor.u32 %v506_v38, %v505_v18  ;;  %v662_v20 = vld [vmem:[#allocation2 + $0x48] sm:$0x1]  ;;  %v665_v44 = vld [vmem:[#allocation2 + $0x60] sm:$0x1] }
  0xac   : > { %v549_v16 = vrot.slane %v7433_v49, 4  ;;  %802 = vst [vmem:[#allocation2 + $0xd4] sm:$0xf] %v801_v40  ;;  %v757_v39 = vrot.slane %v756_v50, 4  ;;  %628 = vst [vmem:[#allocation2 + $0x3c] sm:$0xf] %v493_v30  ;;  %v524_v33 = vor.u32 %v522_v51, %v521_v57 }
  0xad   : > { %v540_v58 = vor.u32 %v538_v0, %v537_v41  ;;  %v553_v23 = vrot.slane %v551_v48, 7  ;;  %v509_v49 = vsel %vm7607_vm7, %v501_v42, %v508_v32  ;;  %v565_v4 = vrot.slane %v7444_v56, 4  ;;  %v668_v51 = vld [vmem:[#allocation2 + $0x78] sm:$0x1]  ;;  %v671_v56 = vld [vmem:[#allocation2 + $0x90] sm:$0x1] }
  0xae   : > { %v569_v13 = vrot.slane %v567_v52, 7  ;;  %v581_v38 = vrot.slane %v7453_v61, 4  ;;  %v805_v0 = vsel %vm7529_vm3, %v757_v39, %v804_v2  ;;  %632 = vst [vmem:[#allocation2 + $0x54] sm:$0xf] %v509_v49  ;;  %v525_v48 = vsel %vm7607_vm7, %v517_v55, %v524_v33  ;;  %v674_v25 = vld [vmem:[#allocation2 + $0xa8] sm:$0x1] }
  0xaf   : > { %v541_v53 = vsel %vm7607_vm7, %v533_v14, %v540_v58  ;;  %v556_v42 = vor.u32 %v554_v43, %v553_v23  ;;  %v677_v28 = vld [vmem:[#allocation2 + $0xc0] sm:$0x1]  ;;  %806 = vst [vmem:[#allocation2 + $0xec] sm:$0xf] %v805_v0  ;;  %636 = vst [vmem:[#allocation2 + $0x6c] sm:$0xf] %v525_v48 }
  0xb0   : > { %640 = vst [vmem:[#allocation2 + $0x84] sm:$0xf] %v541_v53  ;;  %v572_v61 = vor.u32 %v570_v59, %v569_v13  ;;  %v585_v52 = vrot.slane %v583_v62, 7  ;;  %v597_v18 = vrot.slane %v7476_v11, 4  ;;  %v601_v55 = vrot.slane %v599_v6, 7 }
  0xb1   : > { %v680_v50 = vld [vmem:[#allocation2 + $0xd8] sm:$0x1]  ;;  %v557_v1 = vsel %vm7607_vm7, %v549_v16, %v556_v42  ;;  %v660_v43 = vsel %vm7637_vm8, 0, %v659_v31  ;;  %v663_v57 = vsel %vm7637_vm8, 0, %v662_v20  ;;  %v666_v36 = vsel %vm7637_vm8, 0, %v665_v44 }
  0xb2   : > { %644 = vst [vmem:[#allocation2 + $0x9c] sm:$0xf] %v557_v1  ;;  %v573_v59 = vsel %vm7607_vm7, %v565_v4, %v572_v61  ;;  %v588_v11 = vor.u32 %v586_v47, %v585_v52  ;;  %v604_v62 = vor.u32 %v602_v7, %v601_v55  ;;  %661 = vst [vmem:[#allocation2 + $0x30] sm:$0x1] %v660_v43  ;;  %v669_v6 = vsel %vm7637_vm8, 0, %v668_v51 }
  0xb3   : > { %664 = vst [vmem:[#allocation2 + $0x48] sm:$0x1] %v663_v57  ;;  %667 = vst [vmem:[#allocation2 + $0x60] sm:$0x1] %v666_v36  ;;  %v672_v14 = vsel %vm7637_vm8, 0, %v671_v56  ;;  %v675_v41 = vsel %vm7637_vm8, 0, %v674_v25 }
  0xb4   : > { %648 = vst [vmem:[#allocation2 + $0xb4] sm:$0xf] %v573_v59  ;;  %670 = vst [vmem:[#allocation2 + $0x78] sm:$0x1] %v669_v6  ;;  %v678_v37 = vsel %vm7637_vm8, 0, %v677_v28  ;;  %v681_v19 = vsel %vm7637_vm8, 0, %v680_v50  ;;  %v589_v47 = vsel %vm7607_vm7, %v581_v38, %v588_v11  ;;  %v605_v7 = vsel %vm7607_vm7, %v597_v18, %v604_v62 }
  0xb5   : > { %673 = vst [vmem:[#allocation2 + $0x90] sm:$0x1] %v672_v14  ;;  %676 = vst [vmem:[#allocation2 + $0xa8] sm:$0x1] %v675_v41  ;;  %vm684_vm9 = vsmask.f32 7440 }
  0xb6   : > { %679 = vst [vmem:[#allocation2 + $0xc0] sm:$0x1] %v678_v37  ;;  %682 = vst [vmem:[#allocation2 + $0xd8] sm:$0x1] %v681_v19  ;;  %v686_v40 = vrot.slane %v479_v15, 4  ;;  %v8785_v2 = vshll.u32 %v7344_v8, 16 }
  0xb7   : > { %652 = vst [vmem:[#allocation2 + $0xcc] sm:$0xf] %v589_v47  ;;  %656 = vst [vmem:[#allocation2 + $0xe4] sm:$0xf] %v605_v7  ;;  %v8786_v32 = vshrl.u32 %v7347_v9, 16  ;;  %v8787_v31 = vshll.u32 %v7347_v9, 16 }
  0xb8   : > { %v687_v30 = vrot.slane %v8785_v2, 5  ;;  %v8788_v33 = vshrl.u32 %v7350_v10, 16  ;;  %v8789_v23 = vshll.u32 %v7350_v10, 16  ;;  %v8790_v44 = vshrl.u32 %v7354_v12, 16  ;;  %vm7712_vm10 = vmor %vm683_vm2, %vm684_vm9  ;;  %v810_v11 = vld [vmem:[#allocation2 + $0x44] sm:$0x8] }
  0xb9   : > { %v695_v16 = vrot.slane %v8786_v32, 4  ;;  %v696_v39 = vrot.slane %v8787_v31, 5  ;;  %v8791_v49 = vshll.u32 %v7354_v12, 16  ;;  %v8792_v8 = vshrl.u32 %v7380_v26, 16  ;;  %v813_v41 = vld [vmem:[#allocation2 + $0x5c] sm:$0x8] }
  0xba   : > { %v704_v58 = vrot.slane %v8788_v33, 4  ;;  %v705_v20 = vrot.slane %v8789_v23, 5  ;;  %v713_v15 = vrot.slane %v8790_v44, 4  ;;  %v688_v38 = vor.u32 %v687_v30, %v686_v40  ;;  %v819_v40 = vld [vmem:[#allocation2 + $0x8c] sm:$0x8] }
  0xbb   : > { %v714_v4 = vrot.slane %v8791_v49, 5  ;;  %v722_v13 = vrot.slane %v8792_v8, 4  ;;  %v697_v51 = vor.u32 %v696_v39, %v695_v16  ;;  %v8793_v9 = vshll.u32 %v7380_v26, 16  ;;  %v828_v16 = vld [vmem:[#allocation2 + $0xd4] sm:$0x8] }
  0xbc   : > { %v8794_v48 = vshrl.u32 %v7383_v27, 16  ;;  %v706_v42 = vor.u32 %v705_v20, %v704_v58  ;;  %v8797_v56 = vshll.u32 %v7383_v27, 16  ;;  %v8798_v28 = vshrl.u32 %v7401_v34, 16  ;;  %v831_v31 = vld [vmem:[#allocation2 + $0xec] sm:$0x8] }
  0xbd   : > { %v723_v0 = vrot.slane %v8793_v9, 5  ;;  %v715_v12 = vor.u32 %v714_v4, %v713_v15  ;;  %v689_v52 = vrot.slane %v688_v38, 4  ;;  %v698_v26 = vrot.slane %v697_v51, 4 }
  0xbe   : > { %v731_v53 = vrot.slane %v8794_v48, 4  ;;  %v732_v25 = vrot.slane %v8797_v56, 5  ;;  %v740_v61 = vrot.slane %v8798_v28, 4  ;;  %v8799_v55 = vshll.u32 %v7401_v34, 16  ;;  %v816_v34 = vld [vmem:[#allocation2 + $0x74] sm:$0x8] }
  0xbf   : > { %v724_v18 = vor.u32 %v723_v0, %v722_v13  ;;  %v707_v1 = vrot.slane %v706_v42, 4  ;;  %v716_v43 = vrot.slane %v715_v12, 4  ;;  %v8800_v36 = vshrl.u32 %v7404_v35, 16 }
  0xc0   : > { %v741_v50 = vrot.slane %v8799_v55, 5  ;;  %v733_v57 = vor.u32 %v732_v25, %v731_v53  ;;  %v691_v27 = vsel %vm7712_vm10, %v689_v52, %v7501_v46  ;;  %v700_v62 = vsel %vm7712_vm10, %v698_v26, %v7513_v54  ;;  %v822_v54 = vld [vmem:[#allocation2 + $0xa4] sm:$0x8] }
  0xc1   : > { %v749_v59 = vrot.slane %v8800_v36, 4  ;;  %v725_v6 = vrot.slane %v724_v18, 4  ;;  %774 = vst [vmem:[#allocation2 + $0x38] sm:$0xf] %v691_v27  ;;  %779 = vst [vmem:[#allocation2 + $0x50] sm:$0xf] %v700_v62  ;;  %v709_v37 = vsel %vm7712_vm10, %v707_v1, %v7521_v60  ;;  %v718_v19 = vsel %vm7712_vm10, %v716_v43, %v7545_v63 }
  0xc2   : > { %v742_v14 = vor.u32 %v741_v50, %v740_v61  ;;  %v734_v47 = vrot.slane %v733_v57, 4  ;;  %v8801_v46 = vshll.u32 %v7404_v35, 16  ;;  %783 = vst [vmem:[#allocation2 + $0x68] sm:$0xf] %v709_v37  ;;  %787 = vst [vmem:[#allocation2 + $0x80] sm:$0xf] %v718_v19 }
  0xc3   : > { %v727_v2 = vsel %vm7712_vm10, %v725_v6, %v7564_v22  ;;  %vm807_vm11 = vcmask 1043459   ;;  %vm808_vm12 = vsmask.f32 7950  ;;  %v825_v60 = vld [vmem:[#allocation2 + $0xbc] sm:$0x8] }
  0xc4   : > { %v750_v7 = vrot.slane %v8801_v46, 5  ;;  %v743_v30 = vrot.slane %v742_v14, 4  ;;  %791 = vst [vmem:[#allocation2 + $0x98] sm:$0xf] %v727_v2  ;;  %v736_v63 = vsel %vm7712_vm10, %v734_v47, %v7568_v21  ;;  %vm7744_vm13 = vmand %vm807_vm11, %vm808_vm12 }
  0xc5   : > { %795 = vst [vmem:[#allocation2 + $0xb0] sm:$0xf] %v736_v63  ;;  %v811_v39 = vsel %vm7744_vm13, 0, %v810_v11  ;;  %v814_v33 = vsel %vm7744_vm13, 0, %v813_v41  ;;  %v817_v21 = vsel %vm7744_vm13, 0, %v816_v34  ;;  %v820_v23 = vsel %vm7744_vm13, 0, %v819_v40 }
  0xc6   : > { %v751_v32 = vor.u32 %v750_v7, %v749_v59  ;;  %v745_v22 = vsel %vm7712_vm10, %v743_v30, %v7585_v45  ;;  %812 = vst [vmem:[#allocation2 + $0x44] sm:$0x8] %v811_v39  ;;  %815 = vst [vmem:[#allocation2 + $0x5c] sm:$0x8] %v814_v33  ;;  %v823_v45 = vsel %vm7744_vm13, 0, %v822_v54  ;;  %v826_v20 = vsel %vm7744_vm13, 0, %v825_v60 }
  0xc7   : > { %799 = vst [vmem:[#allocation2 + $0xc8] sm:$0xf] %v745_v22  ;;  %818 = vst [vmem:[#allocation2 + $0x74] sm:$0x8] %v817_v21  ;;  %v829_v44 = vsel %vm7744_vm13, 0, %v828_v16  ;;  %v832_v15 = vsel %vm7744_vm13, 0, %v831_v31 }
  0xc8   : > { %v752_v58 = vrot.slane %v751_v32, 4  ;;  %821 = vst [vmem:[#allocation2 + $0x8c] sm:$0x8] %v820_v23  ;;  %824 = vst [vmem:[#allocation2 + $0xa4] sm:$0x8] %v823_v45  ;;  %836 = sbr.rel (%p5318_p3) target bundleno = 210 (0xd2), region = 64 }
  0xc9   : > { %827 = vst [vmem:[#allocation2 + $0xbc] sm:$0x8] %v826_v20  ;;  %830 = vst [vmem:[#allocation2 + $0xd4] sm:$0x8] %v829_v44 }
  0xca   : > { %v754_v49 = vsel %vm7712_vm10, %v752_v58, %v7603_v17  ;;  %833 = vst [vmem:[#allocation2 + $0xec] sm:$0x8] %v832_v15 }
  0xcb   : > { %803 = vst [vmem:[#allocation2 + $0xe0] sm:$0xf] %v754_v49 }
  0xcd   : > { %v7066_v4 = vmov 0  }
  0xce   : > { %838 = vst [vmem:[#allocation2 + $0xf0] sm:$0xff] %v7066_v4  ;;  %839 = vst [vmem:[#allocation2 + $0xf8] sm:$0xf] %v7066_v4 }
  0xcf   : > { %840 = vst [vmem:[#allocation2 + $0xfc] sm:$0xff] %v7066_v4  ;;  %841 = vst [vmem:[#allocation2 + $0x104] sm:$0xf] %v7066_v4 }
  0xd0   : > { %842 = vst [vmem:[#allocation2 + $0x108] sm:$0xff] %v7066_v4  ;;  %843 = vst [vmem:[#allocation2 + $0x110] sm:$0xf] %v7066_v4 }
  0xd1   : > { %844 = vst [vmem:[#allocation2 + $0x114] sm:$0xff] %v7066_v4  ;;  %845 = vst [vmem:[#allocation2 + $0x11c] sm:$0xf] %v7066_v4 }
  0xd2 PF: > { %p5319_p11 = scmp.ge.s32.totalorder %s7040_s24, 1 }
  0xd4   : > { %849 = sbr.rel (%p5319_p11) target bundleno = 241 (0xf1), region = 68 }
  0xd9   : > { %v5322_v17 = vld [vmem:[%s7338_s1 + $0x40] sm:$0xf]  ;;  %v7067_v8 = vmov 0   ;;  %v5324_v38 = vld [vmem:[%s7338_s1 + $0x48] sm:$0xf] }
  0xda   : > { %v858_v13 = vmax.bf16 %v7067_v8, %v5322_v17  ;;  %v5323_v51 = vld [vmem:[%s7338_s1 + $0x44] sm:$0xf]  ;;  %v860_v9 = vmax.bf16 %v7067_v8, %v5324_v38  ;;  %v5325_v48 = vld [vmem:[%s7338_s1 + $0x4c] sm:$0xf]  ;;  %v903_v50 = vld [vmem:[#allocation2 + $0xf0] sm:$0xf] }
  0xdb   : > { %v859_v0 = vmax.bf16 %v7067_v8, %v5323_v51  ;;  %v861_v12 = vmax.bf16 %v7067_v8, %v5325_v48  ;;  %v907_v11 = vld [vmem:[#allocation2 + $0x108] sm:$0xf]  ;;  %v940_v47 = vld [vmem:[#allocation2 + $0x104] sm:$0xf]  ;;  %v944_v30 = vld [vmem:[#allocation2 + $0x11c] sm:$0xf] }
  0xdc   : > { %v868_v53 = vshrl.u32 %v858_v13, 16  ;;  %v871_v42 = vshll.u32 %v858_v13, 16  ;;  %863 = vst [vmem:[#allocation2 + $0xf4] sm:$0xf] %v858_v13  ;;  %v884_v56 = vshrl.u32 %v860_v9, 16  ;;  %v887_v25 = vshll.u32 %v860_v9, 16 }
  0xdd   : > { %865 = vst [vmem:[#allocation2 + $0x10c] sm:$0xf] %v860_v9  ;;  %v876_v28 = vshrl.u32 %v859_v0, 16  ;;  %v879_v61 = vshll.u32 %v859_v0, 16  ;;  %864 = vst [vmem:[#allocation2 + $0x100] sm:$0xf] %v859_v0 }
  0xde   : > { %v870_v52 = vrot.slane %v868_v53, 7  ;;  %v892_v26 = vshrl.u32 %v861_v12, 16  ;;  %v895_v18 = vshll.u32 %v861_v12, 16  ;;  %866 = vst [vmem:[#allocation2 + $0x118] sm:$0xf] %v861_v12  ;;  %v917_v55 = vrot.slane %v868_v53, 4 }
  0xdf   : > { %v886_v1 = vrot.slane %v884_v56, 7  ;;  %v921_v43 = vrot.slane %v879_v61, 5  ;;  %v923_v57 = vrot.slane %v876_v28, 4  ;;  %v878_v36 = vrot.slane %v876_v28, 7 }
  0xe0   : > { %v873_v59 = vor.u32 %v871_v42, %v870_v52  ;;  %v930_v27 = vrot.slane %v895_v18, 5  ;;  %v932_v62 = vrot.slane %v892_v26, 4  ;;  %v874_v6 = vrot.slane %v870_v52, 4 }
  0xe1   : > { %v889_v14 = vor.u32 %v887_v25, %v886_v1  ;;  %v924_v41 = vor.u32 %v923_v57, %v921_v43  ;;  %v881_v34 = vor.u32 %v879_v61, %v878_v36  ;;  %v890_v37 = vrot.slane %v886_v1, 4 }
  0xe2   : > { %v904_v19 = vsel %vm7388_vm1, %v873_v59, %v903_v50  ;;  %v933_v46 = vor.u32 %v932_v62, %v930_v27  ;;  %v894_v7 = vrot.slane %v892_v26, 7  ;;  %v918_v40 = vrot.slane %v871_v42, 5 }
  0xe3   : > { %905 = vst [vmem:[#allocation2 + $0xf0] sm:$0xf] %v904_v19  ;;  %v908_v54 = vsel %vm7388_vm1, %v889_v14, %v907_v11  ;;  %v925_v2 = vrot.slane %v924_v41, 4  ;;  %v882_v60 = vsel %vm7607_vm7, %v874_v6, %v881_v34  ;;  %v926_v63 = vrot.slane %v884_v56, 4 }
  0xe4   : > { %909 = vst [vmem:[#allocation2 + $0x108] sm:$0xf] %v908_v54  ;;  %v934_v32 = vrot.slane %v933_v46, 4  ;;  %906 = vst [vmem:[#allocation2 + $0xfc] sm:$0xf] %v882_v60  ;;  %v897_v16 = vor.u32 %v895_v18, %v894_v7  ;;  %v919_v31 = vor.u32 %v918_v40, %v917_v55  ;;  %v927_v22 = vrot.slane %v887_v25, 5 }
  0xe5   : > { %v941_v39 = vsel %vm7529_vm3, %v925_v2, %v940_v47 }
  0xe6   : > { %942 = vst [vmem:[#allocation2 + $0x104] sm:$0xf] %v941_v39  ;;  %v945_v33 = vsel %vm7529_vm3, %v934_v32, %v944_v30  ;;  %v898_v21 = vsel %vm7607_vm7, %v890_v37, %v897_v16  ;;  %v920_v58 = vrot.slane %v919_v31, 4  ;;  %v928_v23 = vor.u32 %v927_v22, %v926_v63 }
  0xe7   : > { %946 = vst [vmem:[#allocation2 + $0x11c] sm:$0xf] %v945_v33  ;;  %910 = vst [vmem:[#allocation2 + $0x114] sm:$0xf] %v898_v21 }
  0xe8   : > { %v922_v45 = vsel %vm7712_vm10, %v920_v58, %v921_v43  ;;  %v929_v20 = vrot.slane %v928_v23, 4 }
  0xe9   : > { %939 = vst [vmem:[#allocation2 + $0xf8] sm:$0xf] %v922_v45 }
  0xea   : > { %v911_v44 = vld [vmem:[#allocation2 + $0xf0] sm:$0x1]  ;;  %v931_v15 = vsel %vm7712_vm10, %v929_v20, %v930_v27 }
  0xeb   : > { %v912_v49 = vsel %vm7637_vm8, 0, %v911_v44  ;;  %v914_v4 = vld [vmem:[#allocation2 + $0x108] sm:$0x1]  ;;  %943 = vst [vmem:[#allocation2 + $0x110] sm:$0xf] %v931_v15 }
  0xec   : > { %913 = vst [vmem:[#allocation2 + $0xf0] sm:$0x1] %v912_v49  ;;  %v915_v17 = vsel %vm7637_vm8, 0, %v914_v4 }
  0xed   : > { %916 = vst [vmem:[#allocation2 + $0x108] sm:$0x1] %v915_v17  ;;  %v947_v8 = vld [vmem:[#allocation2 + $0x104] sm:$0x8] }
  0xee   : > { %v948_v13 = vsel %vm7744_vm13, 0, %v947_v8  ;;  %v950_v38 = vld [vmem:[#allocation2 + $0x11c] sm:$0x8] }
  0xef   : > { %949 = vst [vmem:[#allocation2 + $0x104] sm:$0x8] %v948_v13  ;;  %v951_v51 = vsel %vm7744_vm13, 0, %v950_v38 }
  0xf0   : > { %952 = vst [vmem:[#allocation2 + $0x11c] sm:$0x8] %v951_v51 }
  0xf1 PF: > { %v6588_v9 = vld [vmem:[#allocation6 + $0x138] sm:$0xff]   ;;  %v6591_v53 = vld [vmem:[#allocation6 + $0x130] sm:$0xff]   ;;  %v6594_v56 = vld [vmem:[#allocation6 + $0x128] sm:$0xff]  }
  0xf2   : > { %v6589_v0 = vld [vmem:[#allocation6 + $0x178] sm:$0xff]   ;;  %5728 = vmatprep.subr.bf16.mxu0 %v6588_v9  ;;  %v6592_v42 = vld [vmem:[#allocation6 + $0x170] sm:$0xff]   ;;  %v6595_v25 = vld [vmem:[#allocation6 + $0x168] sm:$0xff]  }
  0xf3   : > { %v6590_v48 = vld [vmem:[#allocation6 + $0xf8] sm:$0xff]   ;;  %6250 = vmatprep.subr.bf16.mxu1 %v6589_v0  ;;  %v6593_v12 = vld [vmem:[#allocation6 + $0xf0] sm:$0xff]   ;;  %v6596_v28 = vld [vmem:[#allocation6 + $0xe8] sm:$0xff]  }
  0xf4   : > { %5729 = vmatpush3.bf16.msra.mxu0 %v6590_v48  ;;  %6251 = vmatpush3.bf16.msra.mxu1 %v6589_v0  ;;  %v6597_v61 = vld [vmem:[#allocation6 + $0x120] sm:$0xff]   ;;  %v6600_v18 = vld [vmem:[#allocation6 + $0x118] sm:$0xff]   ;;  %v6603_v1 = vld [vmem:[#allocation6 + $0x110] sm:$0xff]  }
  0xf5   : > { %5730 = vmatprep.subr.bf16.mxu0 %v6591_v53  ;;  %6252 = vmatprep.subr.bf16.mxu1 %v6592_v42  ;;  %v6598_v52 = vld [vmem:[#allocation6 + $0x160] sm:$0xff]   ;;  %v6601_v55 = vld [vmem:[#allocation6 + $0x158] sm:$0xff]   ;;  %v6604_v43 = vld [vmem:[#allocation6 + $0x150] sm:$0xff]  }
  0xf6   : > { %v6599_v26 = vld [vmem:[#allocation6 + $0xe0] sm:$0xff]   ;;  %v6602_v50 = vld [vmem:[#allocation6 + $0xd8] sm:$0xff]   ;;  %v6605_v57 = vld [vmem:[#allocation6 + $0xd0] sm:$0xff]  }
  0xf7   : > { %v6606_v36 = vld [vmem:[#allocation6 + $0x108] sm:$0xff]   ;;  %v6609_v27 = vld [vmem:[#allocation6 + $0x100] sm:$0xff]   ;;  %v6617_v37 = vld [vmem:[#allocation6 + $0x238] sm:$0xff]  }
  0xf8   : > { %5731 = vmatpush3.bf16.msra.mxu0 %v6593_v12  ;;  %6253 = vmatpush3.bf16.msra.mxu1 %v6592_v42  ;;  %v6607_v59 = vld [vmem:[#allocation6 + $0x148] sm:$0xff]   ;;  %v6610_v62 = vld [vmem:[#allocation6 + $0x140] sm:$0xff]   ;;  %v6620_v46 = vld [vmem:[#allocation2 + $0x50] ss:$12 sps:$4 sm:$0xff]  }
  0xf9   : > { %5732 = vmatprep.subr.bf16.mxu0 %v6594_v56  ;;  %6254 = vmatprep.subr.bf16.mxu1 %v6595_v25  ;;  %v6608_v11 = vld [vmem:[#allocation6 + $0xc8] sm:$0xff]   ;;  %v6611_v41 = vld [vmem:[#allocation6 + $0xc0] sm:$0xff]   ;;  %v6623_v7 = vld [vmem:[#allocation6 + $0x1f8] sm:$0xff]  }
  0xfa   : > { %v7802_v6 = vld [vmem:[#allocation2 + $0x1c] ss:$12 sps:$4 sm:$0xff]   ;;  %v6614_v14 = vld [vmem:[#allocation2 + $0x20] ss:$12 sps:$4 sm:$0xff]   ;;  %v7805_v34 = vld [vmem:[#allocation2 + $0x18] ss:$12 sps:$4 sm:$0xff]  }
  0xfb   : > { %1467 = vmatprep.mubr.bf16.mxu0 %v7802_v6  ;;  %6266 = vmatprep.mubr.bf16.mxu1 %v6614_v14  ;;  %v6616_v19 = vld [vmem:[#allocation2 + $0x38] ss:$12 sps:$4 sm:$0xff]   ;;  %v7807_v47 = vld [vmem:[#allocation2 + $0x34] ss:$12 sps:$4 sm:$0xff]   ;;  %v7811_v30 = vld [vmem:[#allocation2 + $0x30] ss:$12 sps:$4 sm:$0xff]  }
  0xfc   : > { %5733 = vmatpush3.bf16.msra.mxu0 %v6596_v28  ;;  %6255 = vmatpush3.bf16.msra.mxu1 %v6595_v25  ;;  %v6624_v40 = vld [vmem:[#allocation6 + $0x1b8] sm:$0xff]   ;;  %v6625_v54 = vld [vmem:[#allocation6 + $0x230] sm:$0xff]   ;;  %v6630_v16 = vld [vmem:[#allocation2 + $0x80] ss:$12 sps:$4 sm:$0xff]  }
  0xfd   : > { %5734 = vmatprep.subr.bf16.mxu0 %v6597_v61  ;;  %6256 = vmatprep.subr.bf16.mxu1 %v6598_v52  ;;  %v6626_v2 = vld [vmem:[#allocation6 + $0x1f0] sm:$0xff]   ;;  %v7813_v32 = vld [vmem:[#allocation2 + $0x4c] ss:$12 sps:$4 sm:$0xff]   ;;  %v6635_v39 = vld [vmem:[#allocation6 + $0x1e0] sm:$0xff]  }
  0xfe   : > { %v6627_v60 = vld [vmem:[#allocation6 + $0x1b0] sm:$0xff]   ;;  %v6633_v31 = vld [vmem:[#allocation6 + $0x1e8] sm:$0xff]   ;;  %v6637_v58 = vld [vmem:[#allocation6 + $0x1a0] sm:$0xff]  }
  0xff   : > { %v6622_v63 = vld [vmem:[#allocation2 + $0x68] ss:$12 sps:$4 sm:$0xff]   ;;  %v6632_v23 = vld [vmem:[#allocation2 + $0x98] ss:$12 sps:$4 sm:$0xff]   ;;  %v6640_v20 = vld [vmem:[#allocation2 + $0xb0] ss:$12 sps:$4 sm:$0xff]  }
 0x100   : > { %5735 = vmatpush3.bf16.msra.mxu0 %v6599_v26  ;;  %6257 = vmatpush3.bf16.msra.mxu1 %v6598_v52  ;;  %v6634_v22 = vld [vmem:[#allocation6 + $0x1a8] sm:$0xff]   ;;  %v7819_v45 = vld [vmem:[#allocation2 + $0x64] ss:$12 sps:$4 sm:$0xff]   ;;  %v6643_v44 = vld [vmem:[#allocation6 + $0x1d8] sm:$0xff]  }
 0x101   : > { %5736 = vmatprep.subr.bf16.mxu0 %v6600_v18  ;;  %6258 = vmatprep.subr.bf16.mxu1 %v6601_v55  ;;  %v6636_v33 = vld [vmem:[#allocation6 + $0x228] sm:$0xff]   ;;  %v6644_v15 = vld [vmem:[#allocation6 + $0x198] sm:$0xff]   ;;  %v6645_v49 = vld [vmem:[#allocation6 + $0x1d0] sm:$0xff]  }
 0x102   : > { %v7817_v21 = vld [vmem:[#allocation2 + $0x48] ss:$12 sps:$4 sm:$0xff]   ;;  %v7823_v4 = vld [vmem:[#allocation2 + $0x60] ss:$12 sps:$4 sm:$0xff]   ;;  %v7829_v53 = vld [vmem:[#allocation2 + $0x78] ss:$12 sps:$4 sm:$0xff]  }
 0x103   : > { %v6647_v17 = vld [vmem:[#allocation6 + $0x220] sm:$0xff]   ;;  %v6646_v8 = vld [vmem:[#allocation6 + $0x190] sm:$0xff]   ;;  %v7825_v38 = vld [vmem:[#allocation2 + $0x7c] ss:$12 sps:$4 sm:$0xff]  }
 0x104   : > { %5737 = vmatpush3.bf16.msra.mxu0 %v6602_v50  ;;  %6259 = vmatpush3.bf16.msra.mxu1 %v6601_v55  ;;  %v6642_v13 = vld [vmem:[#allocation2 + $0xc8] ss:$12 sps:$4 sm:$0xff]   ;;  %v6650_v51 = vld [vmem:[#allocation2 + $0xe0] ss:$12 sps:$4 sm:$0xff]   ;;  %v6660_v12 = vld [vmem:[#allocation6 + $0x218] sm:$0xff]  }
 0x105   : > { %5738 = vmatprep.subr.bf16.mxu0 %v6603_v1  ;;  %6260 = vmatprep.subr.bf16.mxu1 %v6604_v43  ;;  %v6653_v9 = vld [vmem:[#allocation6 + $0x1c8] sm:$0xff]   ;;  %v6655_v48 = vld [vmem:[#allocation6 + $0x1c0] sm:$0xff]   ;;  %v6664_v28 = vld [vmem:[#allocation6 + $0x210] sm:$0xff]  }
 0x106   : > { %v6654_v0 = vld [vmem:[#allocation6 + $0x188] sm:$0xff]   ;;  %v6656_v42 = vld [vmem:[#allocation6 + $0x180] sm:$0xff]   ;;  %v7836_v52 = vld [vmem:[#allocation2 + $0x90] ss:$12 sps:$4 sm:$0xff]  }
 0x107   : > { %v6652_v56 = vld [vmem:[#allocation2 + $0xf8] ss:$12 sps:$4 sm:$0xff]   ;;  %v7831_v25 = vld [vmem:[#allocation2 + $0x94] ss:$12 sps:$4 sm:$0xff]   ;;  %v6668_v61 = vld [vmem:[#allocation6 + $0x208] sm:$0xff]  }
 0x108   : > { %5739 = vmatpush3.bf16.msra.mxu0 %v6605_v57  ;;  %6261 = vmatpush3.bf16.msra.mxu1 %v6604_v43  ;;  %v7838_v26 = vld [vmem:[#allocation2 + $0xac] ss:$12 sps:$4 sm:$0xff]   ;;  %v6672_v18 = vld [vmem:[#allocation6 + $0x200] sm:$0xff]   ;;  %v7844_v1 = vld [vmem:[#allocation2 + $0xa8] ss:$12 sps:$4 sm:$0xff]  }
 0x109   : > { %5740 = vmatprep.subr.bf16.mxu0 %v6606_v36  ;;  %6262 = vmatprep.subr.bf16.mxu1 %v6607_v59  ;;  %v6678_v55 = vld [vmem:[#allocation6 + $0x78] sm:$0xff]   ;;  %v7846_v43 = vld [vmem:[#allocation2 + $0xc4] ss:$12 sps:$4 sm:$0xff]   ;;  %v7852_v36 = vld [vmem:[#allocation2 + $0xc0] ss:$12 sps:$4 sm:$0xff]  }
 0x10a   : > { %v6680_v50 = vld [vmem:[#allocation6 + $0xb8] sm:$0xff]   ;;  %v6687_v57 = vld [vmem:[#allocation6 + $0xb0] sm:$0xff]  }
 0x10b   : > { %v6673_v14 = vld [vmem:[#allocation2 + $0xf4] ss:$12 sps:$4 sm:$0xff]  }
 0x10c   : > { %5741 = vmatpush3.bf16.msra.mxu0 %v6608_v11  ;;  %6263 = vmatpush3.bf16.msra.mxu1 %v6607_v59  ;;  %v7854_v59 = vld [vmem:[#allocation2 + $0xdc] ss:$12 sps:$4 sm:$0xff]  }
 0x10d   : > { %5742 = vmatprep.subr.bf16.mxu0 %v6609_v27  ;;  %6264 = vmatprep.subr.bf16.mxu1 %v6610_v62  ;;  %v6693_v11 = vld [vmem:[#allocation6 + $0xa8] sm:$0xff]   ;;  %v6697_v27 = vld [vmem:[#allocation6 + $0xa0] sm:$0xff]  }
 0x110   : > { %5743 = vmatpush3.bf16.msra.mxu0 %v6611_v41  ;;  %6265 = vmatpush3.bf16.msra.mxu1 %v6610_v62  ;;  %v7860_v62 = vld [vmem:[#allocation2 + $0xd8] ss:$12 sps:$4 sm:$0xff]  }
 0x111   : > { %6286 = vmatprep.subr.bf16.mxu0 %v6617_v37  ;;  %5822 = vmatprep.subr.bf16.mxu1 %v6623_v7  ;;  %v6700_v41 = vld [vmem:[#allocation6 + $0x98] sm:$0xff]   ;;  %v6711_v7 = vld [vmem:[#allocation6 + $0x88] sm:$0xff]  }
 0x113   : > { %1468 = vmatmul.mubr.bf16.vlgmr.msra.gmra.mxu0 %v7805_v34  ;;  %6267 = vmatmul.mubr.bf16.vlgmr.msra.gmra.mxu1 %v6616_v19  ;;  %v6675_v19 = vld [vmem:[#allocation2 + $0xf0] ss:$12 sps:$4 sm:$0xff]  }
 0x114   : > { %6287 = vmatpush3.bf16.msra.mxu0 %v6617_v37  ;;  %1475 = vmatprep.mubr.bf16.mxu0 %v7807_v47  ;;  %v6708_v37 = vld [vmem:[#allocation6 + $0x90] sm:$0xff]  }
 0x115   : > { %6270 = vmatprep.mubr.bf16.mxu1 %v6620_v46  ;;  %5823 = vmatpush3.bf16.msra.mxu1 %v6624_v40  ;;  %v6676_v46 = vld [vmem:[#allocation2 + $0x38] ss:$12 sps:$4 sm:$0xff]  }
 0x116   : > { %6288 = vmatprep.subr.bf16.mxu0 %v6625_v54  ;;  %5824 = vmatprep.subr.bf16.mxu1 %v6626_v2  ;;  %v6715_v40 = vld [vmem:[#allocation6 + $0x80] sm:$0xff]   ;;  %v6679_v2 = vld [vmem:[#allocation6 + $0x38] sm:$0xff]  }
 0x118   : > { %6289 = vmatpush3.bf16.msra.mxu0 %v6625_v54  ;;  %v6677_v54 = vld [vmem:[#allocation2 + $0x50] ss:$12 sps:$4 sm:$0xff]  }
 0x119   : > { %5825 = vmatpush3.bf16.msra.mxu1 %v6627_v60  ;;  %6290 = vmatprep.subr.bf16.mxu0 %v6636_v33  ;;  %v6681_v60 = vld [vmem:[#allocation6 + $0x70] sm:$0xff]  }
 0x11a   : > { %5826 = vmatprep.subr.bf16.mxu1 %v6633_v31  ;;  %v6685_v31 = vld [vmem:[#allocation6 + $0x68] sm:$0xff]  }
 0x11b   : > { %1476 = vmatmul.mubr.bf16.gmra.mxu0 %v7811_v30  ;;  %6271 = vmatmul.mubr.bf16.gmra.mxu1 %v6622_v63  ;;  %v6683_v63 = vld [vmem:[#allocation2 + $0x68] ss:$12 sps:$4 sm:$0xff]  }
 0x11c   : > { %1483 = vmatprep.mubr.bf16.mxu0 %v7813_v32  ;;  %6274 = vmatprep.mubr.bf16.mxu1 %v6630_v16  ;;  %v6682_v16 = vld [vmem:[#allocation6 + $0x30] sm:$0xff]  }
 0x11d   : > { %5827 = vmatpush3.bf16.msra.mxu1 %v6634_v22  ;;  %6291 = vmatpush3.bf16.msra.mxu0 %v6636_v33  ;;  %v6684_v22 = vld [vmem:[#allocation2 + $0x80] ss:$12 sps:$4 sm:$0xff]   ;;  %v6688_v33 = vld [vmem:[#allocation2 + $0x98] ss:$12 sps:$4 sm:$0xff]  }
 0x11e   : > { %5828 = vmatprep.subr.bf16.mxu1 %v6635_v39  ;;  %6292 = vmatprep.subr.bf16.mxu0 %v6647_v17  ;;  %v6686_v39 = vld [vmem:[#allocation6 + $0x28] sm:$0xff]  }
 0x121   : > { %5829 = vmatpush3.bf16.msra.mxu1 %v6637_v58  ;;  %6293 = vmatpush3.bf16.msra.mxu0 %v6647_v17  ;;  %v6689_v58 = vld [vmem:[#allocation6 + $0x60] sm:$0xff]   ;;  %v6698_v17 = vld [vmem:[#allocation6 + $0x50] sm:$0xff]  }
 0x122   : > { %5830 = vmatprep.subr.bf16.mxu1 %v6643_v44  ;;  %6294 = vmatprep.subr.bf16.mxu0 %v6660_v12  ;;  %v6690_v44 = vld [vmem:[#allocation2 + $0xb0] ss:$12 sps:$4 sm:$0xff]  }
 0x123   : > { %1484 = vmatmul.mubr.bf16.gmra.mxu0 %v7817_v21  ;;  %6275 = vmatmul.mubr.bf16.gmra.mxu1 %v6632_v23  ;;  %v6691_v23 = vld [vmem:[#allocation6 + $0x20] sm:$0xff]  }
 0x124   : > { %1491 = vmatprep.mubr.bf16.mxu0 %v7819_v45  ;;  %6278 = vmatprep.mubr.bf16.mxu1 %v6640_v20  ;;  %v6692_v20 = vld [vmem:[#allocation6 + $0x58] sm:$0xff]  }
 0x125   : > { %5831 = vmatpush3.bf16.msra.mxu1 %v6644_v15  ;;  %6295 = vmatpush3.bf16.msra.mxu0 %v6660_v12  ;;  %v6694_v15 = vld [vmem:[#allocation6 + $0x18] sm:$0xff]   ;;  %v6710_v12 = vld [vmem:[#allocation6] sm:$0xff]  }
 0x126   : > { %5832 = vmatprep.subr.bf16.mxu1 %v6645_v49  ;;  %6296 = vmatprep.subr.bf16.mxu0 %v6664_v28  ;;  %v6695_v49 = vld [vmem:[#allocation2 + $0xc8] ss:$12 sps:$4 sm:$0xff]  }
 0x129   : > { %5833 = vmatpush3.bf16.msra.mxu1 %v6646_v8  ;;  %6297 = vmatpush3.bf16.msra.mxu0 %v6664_v28  ;;  %v6699_v8 = vld [vmem:[#allocation6 + $0x10] sm:$0xff]  }
 0x12a   : > { %5834 = vmatprep.subr.bf16.mxu1 %v6653_v9  ;;  %6298 = vmatprep.subr.bf16.mxu0 %v6668_v61  ;;  %v6702_v9 = vld [vmem:[#allocation2 + $0x10c] ss:$12 sps:$4 sm:$0xff]   ;;  %v6707_v28 = vld [vmem:[#allocation2 + $0x110] ss:$12 sps:$4 sm:$0xff]  }
 0x12b   : > { %1492 = vmatmul.mubr.bf16.gmra.mxu0 %v7823_v4  ;;  %6279 = vmatmul.mubr.bf16.gmra.mxu1 %v6642_v13  ;;  %v6701_v13 = vld [vmem:[#allocation6 + $0x48] sm:$0xff]  }
 0x12c   : > { %1499 = vmatprep.mubr.bf16.mxu0 %v7825_v38  ;;  %6282 = vmatprep.mubr.bf16.mxu1 %v6650_v51  ;;  %v6696_v51 = vld [vmem:[#allocation2 + $0xe0] ss:$12 sps:$4 sm:$0xff]  }
 0x12d   : > { %5835 = vmatpush3.bf16.msra.mxu1 %v6654_v0  ;;  %6299 = vmatpush3.bf16.msra.mxu0 %v6668_v61  ;;  %v6704_v0 = vld [vmem:[#allocation2 + $0xf8] ss:$12 sps:$4 sm:$0xff]  }
 0x12e   : > { %5836 = vmatprep.subr.bf16.mxu1 %v6655_v48  ;;  %6300 = vmatprep.subr.bf16.mxu0 %v6672_v18  ;;  %v6705_v48 = vld [vmem:[#allocation6 + $0x8] sm:$0xff]   ;;  %v6712_v61 = vld [vmem:[#allocation2 + $0x4] ss:$12 sps:$4 sm:$0xff]  }
 0x131   : > { %5837 = vmatpush3.bf16.msra.mxu1 %v6656_v42  ;;  %6301 = vmatpush3.bf16.msra.mxu0 %v6672_v18  ;;  %v6709_v42 = vld [vmem:[#allocation6 + $0x40] sm:$0xff]   ;;  %v6716_v18 = vld [vmem:[#allocation2 + $0x8] ss:$12 sps:$4 sm:$0xff]  }
 0x132   : > { %6322 = vmatprep.subr.bf16.mxu1 %v6680_v50  ;;  %5916 = vmatprep.subr.bf16.mxu0 %v6678_v55  ;;  %v6714_v55 = vld [vmem:[#allocation2] ss:$12 sps:$4 sm:$0xff]  }
 0x133   : > { %1500 = vmatmul.mubr.bf16.gmra.mxu0 %v7829_v53  ;;  %6283 = vmatmul.mubr.bf16.gmra.mxu1 %v6652_v56  ;;  %v6706_v56 = vld [vmem:[#allocation2 + $0x108] ss:$12 sps:$4 sm:$0xff]  }
 0x134   : > { %1507 = vmatprep.mubr.bf16.mxu0 %v7831_v25  ;;  %2086 = vmatprep.mubr.bf16.mxu1 %v7807_v47 }
 0x13b   : > { %1508 = vmatmul.mubr.bf16.gmra.mxu0 %v7836_v52  ;;  %2087 = vmatmul.mubr.bf16.vlgmr.msra.gmra.mxu1 %v7811_v30 }
 0x13c   : > { %1515 = vmatprep.mubr.bf16.mxu0 %v7838_v26  ;;  %2094 = vmatprep.mubr.bf16.mxu1 %v7813_v32 }
 0x13d   : > { %6323 = vmatpush3.bf16.msra.mxu1 %v6680_v50  ;;  %v6717_v50 = vld [vmem:[#allocation2 + $0x20] ss:$12 sps:$4 sm:$0xff]  }
 0x13e   : > { %6324 = vmatprep.subr.bf16.mxu1 %v6687_v57 }
 0x141   : > { %6325 = vmatpush3.bf16.msra.mxu1 %v6687_v57  ;;  %v6718_v57 = vld [vmem:[#allocation2 + $0x38] ss:$12 sps:$4 sm:$0xff]  }
 0x142   : > { %6326 = vmatprep.subr.bf16.mxu1 %v6693_v11 }
 0x143   : > { %1516 = vmatmul.mubr.bf16.gmra.mxu0 %v7844_v1  ;;  %2095 = vmatmul.mubr.bf16.gmra.mxu1 %v7817_v21 }
 0x144   : > { %1523 = vmatprep.mubr.bf16.mxu0 %v7846_v43  ;;  %2102 = vmatprep.mubr.bf16.mxu1 %v7819_v45 }
 0x145   : > { %6327 = vmatpush3.bf16.msra.mxu1 %v6693_v11  ;;  %v6719_v11 = vld [vmem:[#allocation2 + $0x50] ss:$12 sps:$4 sm:$0xff]  }
 0x146   : > { %6328 = vmatprep.subr.bf16.mxu1 %v6697_v27 }
 0x149   : > { %6329 = vmatpush3.bf16.msra.mxu1 %v6697_v27  ;;  %v6720_v27 = vld [vmem:[#allocation2 + $0x68] ss:$12 sps:$4 sm:$0xff]  }
 0x14a   : > { %6330 = vmatprep.subr.bf16.mxu1 %v6700_v41 }
 0x14b   : > { %1524 = vmatmul.mubr.bf16.gmra.mxu0 %v7852_v36  ;;  %2103 = vmatmul.mubr.bf16.gmra.mxu1 %v7823_v4 }
 0x14c   : > { %1531 = vmatprep.mubr.bf16.mxu0 %v7854_v59  ;;  %2110 = vmatprep.mubr.bf16.mxu1 %v7825_v38 }
 0x14d   : > { %6331 = vmatpush3.bf16.msra.mxu1 %v6700_v41  ;;  %v6722_v41 = vld [vmem:[#allocation2 + $0x98] ss:$12 sps:$4 sm:$0xff]  }
 0x14e   : > { %6332 = vmatprep.subr.bf16.mxu1 %v6708_v37 }
 0x151   : > { %6333 = vmatpush3.bf16.msra.mxu1 %v6708_v37  ;;  %v6723_v37 = vld [vmem:[#allocation2 + $0xb0] ss:$12 sps:$4 sm:$0xff]  }
 0x152   : > { %6334 = vmatprep.subr.bf16.mxu1 %v6711_v7 }
 0x153   : > { %1532 = vmatmul.mubr.bf16.gmra.mxu0 %v7860_v62  ;;  %2111 = vmatmul.mubr.bf16.gmra.mxu1 %v7829_v53 }
 0x154   : > { %1539 = vmatprep.mubr.bf16.mxu0 %v6673_v14  ;;  %2118 = vmatprep.mubr.bf16.mxu1 %v7831_v25 }
 0x155   : > { %6335 = vmatpush3.bf16.msra.mxu1 %v6711_v7 }
 0x156   : > { %6336 = vmatprep.subr.bf16.mxu1 %v6715_v40 }
 0x159   : > { %6337 = vmatpush3.bf16.msra.mxu1 %v6715_v40 }
 0x15b   : > { %1540 = vmatmul.mubr.bf16.gmra.mxu0 %v6675_v19  ;;  %2119 = vmatmul.mubr.bf16.gmra.mxu1 %v7836_v52 }
 0x15c   : > { %2126 = vmatprep.mubr.bf16.mxu1 %v7838_v26  ;;  %6302 = vmatprep.mubr.bf16.mxu0 %v6676_v46 }
 0x163   : > { %2127 = vmatmul.mubr.bf16.gmra.mxu1 %v7844_v1  ;;  %6303 = vmatmul.mubr.bf16.vlgmr.msra.gmra.mxu0 %v6677_v54 }
 0x164   : > { %5917 = vmatpush3.bf16.msra.mxu0 %v6679_v2  ;;  %2134 = vmatprep.mubr.bf16.mxu1 %v7846_v43 }
 0x165   : > { %5918 = vmatprep.subr.bf16.mxu0 %v6681_v60  ;;  %6306 = vmatprep.mubr.bf16.mxu0 %v6683_v63 }
 0x168   : > { %5919 = vmatpush3.bf16.msra.mxu0 %v6682_v16 }
 0x169   : > { %5920 = vmatprep.subr.bf16.mxu0 %v6685_v31 }
 0x16b   : > { %2135 = vmatmul.mubr.bf16.gmra.mxu1 %v7852_v36  ;;  %6307 = vmatmul.mubr.bf16.gmra.mxu0 %v6684_v22 }
 0x16c   : > { %5921 = vmatpush3.bf16.msra.mxu0 %v6686_v39  ;;  %2142 = vmatprep.mubr.bf16.mxu1 %v7854_v59 }
 0x16d   : > { %6310 = vmatprep.mubr.bf16.mxu0 %v6688_v33  ;;  %5922 = vmatprep.subr.bf16.mxu0 %v6689_v58 }
 0x170   : > { %5923 = vmatpush3.bf16.msra.mxu0 %v6691_v23 }
 0x171   : > { %5924 = vmatprep.subr.bf16.mxu0 %v6692_v20 }
 0x173   : > { %2143 = vmatmul.mubr.bf16.gmra.mxu1 %v7860_v62  ;;  %6311 = vmatmul.mubr.bf16.gmra.mxu0 %v6690_v44 }
 0x174   : > { %5925 = vmatpush3.bf16.msra.mxu0 %v6694_v15  ;;  %2150 = vmatprep.mubr.bf16.mxu1 %v6673_v14  ;;  %v6721_v14 = vld [vmem:[#allocation2 + $0x80] ss:$12 sps:$4 sm:$0xff]  }
 0x175   : > { %6314 = vmatprep.mubr.bf16.mxu0 %v6695_v49  ;;  %5926 = vmatprep.subr.bf16.mxu0 %v6698_v17 }
 0x178   : > { %5927 = vmatpush3.bf16.msra.mxu0 %v6699_v8 }
 0x179   : > { %5928 = vmatprep.subr.bf16.mxu0 %v6701_v13 }
 0x17b   : > { %2151 = vmatmul.mubr.bf16.gmra.mxu1 %v6675_v19  ;;  %6315 = vmatmul.mubr.bf16.gmra.mxu0 %v6696_v51  ;;  %v6724_v19 = vld [vmem:[#allocation2 + $0xc8] ss:$12 sps:$4 sm:$0xff]  }
 0x17c   : > { %2158 = vmatprep.mubr.bf16.mxu1 %v6702_v9  ;;  %6318 = vmatprep.mubr.bf16.mxu0 %v6704_v0 }
 0x17d   : > { %5929 = vmatpush3.bf16.msra.mxu0 %v6705_v48 }
 0x17e   : > { %5930 = vmatprep.subr.bf16.mxu0 %v6709_v42 }
 0x181   : > { %5931 = vmatpush3.bf16.msra.mxu0 %v6710_v12 }
 0x183   : > { %2159 = vmatmul.mubr.bf16.gmra.mxu1 %v6706_v56  ;;  %6319 = vmatmul.mubr.bf16.gmra.mxu0 %v6707_v28 }
 0x184   : > { %2616 = vmatprep.mubr.bf16.mxu0 %v6712_v61  ;;  %6338 = vmatprep.mubr.bf16.mxu1 %v6716_v18 }
 0x18b   : > { %2617 = vmatmul.mubr.bf16.vlgmr.msra.gmra.mxu0 %v6714_v55  ;;  %6339 = vmatmul.mubr.bf16.vlgmr.msra.gmra.mxu1 %v6717_v50 }
 0x18c   : > { %2624 = vmatprep.mubr.bf16.mxu0 %v7802_v6  ;;  %6342 = vmatprep.mubr.bf16.mxu1 %v6718_v57  ;;  %v6725_v6 = vld [vmem:[#allocation2 + $0xe0] ss:$12 sps:$4 sm:$0xff]  }
 0x193   : > { %2625 = vmatmul.mubr.bf16.gmra.mxu0 %v7805_v34  ;;  %6343 = vmatmul.mubr.bf16.gmra.mxu1 %v6719_v11 }
 0x194   : > { %2632 = vmatprep.mubr.bf16.mxu0 %v7807_v47  ;;  %6346 = vmatprep.mubr.bf16.mxu1 %v6720_v27 }
 0x19b   : > { %2633 = vmatmul.mubr.bf16.gmra.mxu0 %v7811_v30  ;;  %6347 = vmatmul.mubr.bf16.gmra.mxu1 %v6721_v14 }
 0x19c   : > { %2640 = vmatprep.mubr.bf16.mxu0 %v7813_v32  ;;  %6350 = vmatprep.mubr.bf16.mxu1 %v6722_v41 }
 0x1a3   : > { %2641 = vmatmul.mubr.bf16.gmra.mxu0 %v7817_v21  ;;  %6351 = vmatmul.mubr.bf16.gmra.mxu1 %v6723_v37 }
 0x1a4   : > { %2648 = vmatprep.mubr.bf16.mxu0 %v7819_v45  ;;  %6354 = vmatprep.mubr.bf16.mxu1 %v6724_v19 }
 0x1ab   : > { %2649 = vmatmul.mubr.bf16.gmra.mxu0 %v7823_v4  ;;  %6355 = vmatmul.mubr.bf16.gmra.mxu1 %v6725_v6 }
 0x1ac   : > { %2656 = vmatprep.mubr.bf16.mxu0 %v7825_v38 }
 0x1b3   : > { %2657 = vmatmul.mubr.bf16.gmra.mxu0 %v7829_v53 }
 0x1b4   : > { %2664 = vmatprep.mubr.bf16.mxu0 %v7831_v25 }
 0x1bb   : > { %2665 = vmatmul.mubr.bf16.gmra.mxu0 %v7836_v52 }
 0x1bc   : > { %2672 = vmatprep.mubr.bf16.mxu0 %v7838_v26 }
 0x1c3   : > { %2673 = vmatmul.mubr.bf16.gmra.mxu0 %v7844_v1 }
 0x1c4   : > { %2680 = vmatprep.mubr.bf16.mxu0 %v7846_v43 }
 0x1cb   : > { %2681 = vmatmul.mubr.bf16.gmra.mxu0 %v7852_v36 }
 0x1cc   : > { %2688 = vmatprep.mubr.bf16.mxu0 %v7854_v59 }
 0x1d3   : > { %v5744_v34 = vpop.f32.mrf.mxu0  ;;  %v6268_v47 = vpop.f32.mrf.mxu1  ;;  %2689 = vmatmul.mubr.bf16.gmra.mxu0 %v7860_v62 }
 0x1d5   : > { %v5745_v30 = vpop.f32.mrf.mxu0  ;;  %v1582_v32 = vpop.f32.mrf.mxu1 }
 0x1d6   : > { %v5746_v21 = vadd.f32 %v5745_v30, %v5744_v34 }
 0x1d7   : > { %v5747_v45 = vpop.f32.mrf.mxu0  ;;  %v6269_v4 = vpop.f32.mrf.mxu1 }
 0x1d8   : > { %v7890_v38 = vadd.f32 %v5746_v21, %v1582_v32 }
 0x1d9   : > { %v5748_v53 = vpop.f32.mrf.mxu0  ;;  %v1585_v25 = vpop.f32.mrf.mxu1 }
 0x1da   : > { %v5749_v52 = vadd.f32 %v5748_v53, %v5747_v45 }
 0x1db   : > { %v5750_v26 = vpop.f32.mrf.mxu0  ;;  %v6272_v1 = vpop.f32.mrf.mxu1 }
 0x1dc   : > { %v7892_v43 = vadd.f32 %v5749_v52, %v1585_v25 }
 0x1dd   : > { %v5751_v36 = vpop.f32.mrf.mxu0  ;;  %v1598_v59 = vpop.f32.mrf.mxu1 }
 0x1de   : > { %v5752_v46 = vadd.f32 %v5751_v36, %v5750_v26 }
 0x1df   : > { %v5753_v7 = vpop.f32.mrf.mxu0  ;;  %v6273_v40 = vpop.f32.mrf.mxu1 }
 0x1e0   : > { %v7894_v62 = vadd.f32 %v6268_v47, %v5752_v46 }
 0x1e1   : > { %v5754_v54 = vpop.f32.mrf.mxu0  ;;  %v1601_v2 = vpop.f32.mrf.mxu1 }
 0x1e2   : > { %v5755_v60 = vadd.f32 %v5754_v54, %v5753_v7 }
 0x1e3   : > { %v5756_v63 = vpop.f32.mrf.mxu0  ;;  %v6276_v16 = vpop.f32.mrf.mxu1 }
 0x1e4   : > { %v7896_v31 = vadd.f32 %v6269_v4, %v5755_v60 }
 0x1e5   : > { %v5757_v22 = vpop.f32.mrf.mxu0  ;;  %v1614_v39 = vpop.f32.mrf.mxu1 }
 0x1e6   : > { %v5758_v33 = vadd.f32 %v5757_v22, %v5756_v63 }
 0x1e7   : > { %v5759_v58 = vpop.f32.mrf.mxu0  ;;  %v6277_v23 = vpop.f32.mrf.mxu1 }
 0x1e8   : > { %v7898_v20 = vadd.f32 %v5758_v33, %v1598_v59 }
 0x1e9   : > { %v5760_v44 = vpop.f32.mrf.mxu0  ;;  %v1617_v15 = vpop.f32.mrf.mxu1 }
 0x1ea   : > { %v5761_v49 = vadd.f32 %v5760_v44, %v5759_v58 }
 0x1eb   : > { %v5762_v17 = vpop.f32.mrf.mxu0  ;;  %v6280_v8 = vpop.f32.mrf.mxu1 }
 0x1ec   : > { %v7900_v13 = vadd.f32 %v5761_v49, %v1601_v2 }
 0x1ed   : > { %v5763_v51 = vpop.f32.mrf.mxu0  ;;  %v1630_v9 = vpop.f32.mrf.mxu1 }
 0x1ee   : > { %v5764_v0 = vadd.f32 %v5763_v51, %v5762_v17 }
 0x1ef   : > { %v5765_v48 = vpop.f32.mrf.mxu0  ;;  %v6281_v42 = vpop.f32.mrf.mxu1 }
 0x1f0   : > { %v7902_v12 = vadd.f32 %v6272_v1, %v5764_v0 }
 0x1f1   : > { %v5766_v56 = vpop.f32.mrf.mxu0  ;;  %v1633_v28 = vpop.f32.mrf.mxu1 }
 0x1f2   : > { %v5767_v61 = vadd.f32 %v5766_v56, %v5765_v48 }
 0x1f3   : > { %v5768_v18 = vpop.f32.mrf.mxu0  ;;  %v7904_v55 = vpop.f32.mrf.mxu1 }
 0x1f4   : > { %v7906_v50 = vadd.f32 %v6273_v40, %v5767_v61 }
 0x1f5   : > { %v5769_v57 = vpop.f32.mrf.mxu0  ;;  %v1646_v11 = vpop.f32.mrf.mxu1 }
 0x1f6   : > { %v5770_v27 = vadd.f32 %v5769_v57, %v5768_v18 }
 0x1f7   : > { %v5771_v14 = vpop.f32.mrf.mxu0  ;;  %v7908_v41 = vpop.f32.mrf.mxu1 }
 0x1f8   : > { %v7910_v37 = vadd.f32 %v5770_v27, %v1614_v39 }
 0x1f9   : > { %v5772_v19 = vpop.f32.mrf.mxu0  ;;  %v1649_v6 = vpop.f32.mrf.mxu1 }
 0x1fa   : > { %v5773_v34 = vadd.f32 %v5772_v19, %v5771_v14 }
 0x1fb   : > { %v5774_v47 = vpop.f32.mrf.mxu0  ;;  %v5838_v30 = vpop.f32.mrf.mxu1 }
 0x1fc   : > { %v7912_v32 = vadd.f32 %v5773_v34, %v1617_v15 }
 0x1fd   : > { %v5775_v21 = vpop.f32.mrf.mxu0  ;;  %v5839_v45 = vpop.f32.mrf.mxu1 }
 0x1fe   : > { %v5776_v4 = vadd.f32 %v5775_v21, %v5774_v47  ;;  %v7914_v53 = vadd.f32 %v5839_v45, %v5838_v30 }
 0x1ff   : > { %v5777_v25 = vpop.f32.mrf.mxu0  ;;  %v5841_v52 = vpop.f32.mrf.mxu1 }
 0x200   : > { %v7916_v26 = vadd.f32 %v6276_v16, %v5776_v4 }
 0x201   : > { %v5778_v1 = vpop.f32.mrf.mxu0  ;;  %v5842_v36 = vpop.f32.mrf.mxu1 }
 0x202   : > { %v5779_v59 = vadd.f32 %v5778_v1, %v5777_v25  ;;  %v7918_v46 = vadd.f32 %v5842_v36, %v5841_v52 }
 0x203   : > { %v5780_v7 = vpop.f32.mrf.mxu0  ;;  %v5844_v40 = vpop.f32.mrf.mxu1 }
 0x204   : > { %v7920_v54 = vadd.f32 %v6277_v23, %v5779_v59 }
 0x205   : > { %v5781_v2 = vpop.f32.mrf.mxu0  ;;  %v5845_v60 = vpop.f32.mrf.mxu1 }
 0x206   : > { %v5782_v63 = vadd.f32 %v5781_v2, %v5780_v7  ;;  %v7922_v22 = vadd.f32 %v5845_v60, %v5844_v40 }
 0x207   : > { %v5783_v39 = vpop.f32.mrf.mxu0  ;;  %v5847_v33 = vpop.f32.mrf.mxu1 }
 0x208   : > { %v7924_v58 = vadd.f32 %v5782_v63, %v1630_v9 }
 0x209   : > { %v5784_v16 = vpop.f32.mrf.mxu0  ;;  %v5848_v44 = vpop.f32.mrf.mxu1 }
 0x20a   : > { %v5785_v15 = vadd.f32 %v5784_v16, %v5783_v39  ;;  %v7926_v49 = vadd.f32 %v5848_v44, %v5847_v33 }
 0x20b   : > { %v5786_v17 = vpop.f32.mrf.mxu0  ;;  %v5850_v51 = vpop.f32.mrf.mxu1 }
 0x20c   : > { %v7928_v0 = vadd.f32 %v5785_v15, %v1633_v28 }
 0x20d   : > { %v5787_v23 = vpop.f32.mrf.mxu0  ;;  %v5851_v48 = vpop.f32.mrf.mxu1 }
 0x20e   : > { %v5788_v56 = vadd.f32 %v5787_v23, %v5786_v17  ;;  %v7930_v61 = vadd.f32 %v5851_v48, %v5850_v51 }
 0x20f   : > { %v5789_v18 = vpop.f32.mrf.mxu0  ;;  %v5853_v57 = vpop.f32.mrf.mxu1 }
 0x210   : > { %v7932_v27 = vadd.f32 %v6280_v8, %v5788_v56 }
 0x211   : > { %v5790_v9 = vpop.f32.mrf.mxu0  ;;  %v5854_v14 = vpop.f32.mrf.mxu1 }
 0x212   : > { %v5791_v19 = vadd.f32 %v5790_v9, %v5789_v18  ;;  %v7934_v34 = vadd.f32 %v5854_v14, %v5853_v57 }
 0x213   : > { %v5792_v47 = vpop.f32.mrf.mxu0  ;;  %v5856_v30 = vpop.f32.mrf.mxu1 }
 0x214   : > { %v7936_v21 = vadd.f32 %v6281_v42, %v5791_v19 }
 0x215   : > { %v5793_v28 = vpop.f32.mrf.mxu0  ;;  %v5857_v45 = vpop.f32.mrf.mxu1 }
 0x216   : > { %8804 = vst [vmem:[#allocation19_spill] sm:$0xff] %v7936_v21  ;;  %v5794_v4 = vadd.f32 %v5793_v28, %v5792_v47  ;;  %v5858_v25 = vadd.f32 %v5857_v45, %v5856_v30 }
 0x217   : > { %v5795_v52 = vpop.f32.mrf.mxu0  ;;  %v5859_v1 = vpop.f32.mrf.mxu1 }
 0x218   : > { %v7938_v36 = vadd.f32 %v5794_v4, %v1646_v11 }
 0x219   : > { %v5796_v59 = vpop.f32.mrf.mxu0  ;;  %v5860_v8 = vpop.f32.mrf.mxu1 }
 0x21a   : > { %8805 = vst [vmem:[#allocation20_spill] sm:$0xff] %v7938_v36  ;;  %v5797_v7 = vadd.f32 %v5796_v59, %v5795_v52  ;;  %v5861_v40 = vadd.f32 %v5860_v8, %v5859_v1 }
 0x21b   : > { %v5798_v2 = vpop.f32.mrf.mxu0  ;;  %v5862_v60 = vpop.f32.mrf.mxu1 }
 0x21c   : > { %v7940_v63 = vadd.f32 %v5797_v7, %v1649_v6 }
 0x21d   : > { %v5799_v39 = vpop.f32.mrf.mxu0  ;;  %v5863_v33 = vpop.f32.mrf.mxu1 }
 0x21e   : > { %8806 = vst [vmem:[#allocation21_spill] sm:$0xff] %v7940_v63  ;;  %v5800_v42 = vadd.f32 %v5799_v39, %v5798_v2  ;;  %v5864_v16 = vadd.f32 %v5863_v33, %v5862_v60 }
 0x21f   : > { %v5801_v44 = vpop.f32.mrf.mxu0  ;;  %v5865_v15 = vpop.f32.mrf.mxu1 }
 0x220   : > { %v7943_v17 = vadd.f32 %v7904_v55, %v5800_v42 }
 0x221   : > { %v5802_v51 = vpop.f32.mrf.mxu0  ;;  %v5866_v11 = vpop.f32.mrf.mxu1 }
 0x222   : > { %8807 = vst [vmem:[#allocation22_spill] sm:$0xff] %v7943_v17  ;;  %v5803_v23 = vadd.f32 %v5802_v51, %v5801_v44  ;;  %v5867_v48 = vadd.f32 %v5866_v11, %v5865_v15 }
 0x223   : > { %v5868_v56 = vpop.f32.mrf.mxu1  ;;  %v7945_v18 = vpop.f32.mrf.mxu0 }
 0x224   : > { %v7948_v57 = vadd.f32 %v7908_v41, %v5803_v23 }
 0x225   : > { %v5869_v6 = vpop.f32.mrf.mxu1  ;;  %v7950_v9 = vpop.f32.mrf.mxu0 }
 0x226   : > { %8808 = vst [vmem:[#allocation23_spill] sm:$0xff] %v7948_v57  ;;  %v5870_v14 = vadd.f32 %v5869_v6, %v5868_v56 }
 0x227   : > { %v5871_v19 = vpop.f32.mrf.mxu1  ;;  %v7952_v47 = vpop.f32.mrf.mxu0 }
 0x229   : > { %v5872_v30 = vpop.f32.mrf.mxu1  ;;  %v7954_v55 = vpop.f32.mrf.mxu0 }
 0x22a   : > { %v5873_v28 = vadd.f32 %v5872_v30, %v5871_v19 }
 0x22b   : > { %v5874_v45 = vpop.f32.mrf.mxu1  ;;  %v6308_v4 = vpop.f32.mrf.mxu0 }
 0x22c   : > { %v7956_v52 = vadd.f32 %v6308_v4, %v5858_v25 }
 0x22d   : > { %v5875_v1 = vpop.f32.mrf.mxu1  ;;  %v7958_v59 = vpop.f32.mrf.mxu0 }
 0x22e   : > { %v5876_v41 = vadd.f32 %v5875_v1, %v5874_v45 }
 0x22f   : > { %v5877_v8 = vpop.f32.mrf.mxu1  ;;  %v6309_v7 = vpop.f32.mrf.mxu0 }
 0x230   : > { %v7960_v2 = vadd.f32 %v6309_v7, %v5861_v40 }
 0x231   : > { %v5878_v60 = vpop.f32.mrf.mxu1  ;;  %v7962_v39 = vpop.f32.mrf.mxu0 }
 0x232   : > { %v5879_v33 = vadd.f32 %v5878_v60, %v5877_v8 }
 0x233   : > { %v5880_v42 = vpop.f32.mrf.mxu1  ;;  %v6312_v44 = vpop.f32.mrf.mxu0 }
 0x234   : > { %v7964_v15 = vadd.f32 %v6312_v44, %v5870_v14 }
 0x235   : > { %v5881_v51 = vpop.f32.mrf.mxu1  ;;  %v2233_v11 = vpop.f32.mrf.mxu0 }
 0x236   : > { %v5882_v25 = vadd.f32 %v5881_v51, %v5880_v42  ;;  %v7966_v23 = vadd.f32 %v5864_v16, %v2233_v11 }
 0x237   : > { %v5883_v56 = vpop.f32.mrf.mxu1  ;;  %v6313_v6 = vpop.f32.mrf.mxu0 }
 0x238   : > { %v7968_v19 = vadd.f32 %v6313_v6, %v5873_v28 }
 0x239   : > { %v5884_v30 = vpop.f32.mrf.mxu1  ;;  %v2236_v40 = vpop.f32.mrf.mxu0 }
 0x23a   : > { %v5885_v45 = vadd.f32 %v5884_v30, %v5883_v56  ;;  %v7970_v4 = vadd.f32 %v5867_v48, %v2236_v40 }
 0x23b   : > { %v5886_v1 = vpop.f32.mrf.mxu1  ;;  %v6316_v8 = vpop.f32.mrf.mxu0 }
 0x23c   : > { %v7972_v7 = vadd.f32 %v6316_v8, %v5882_v25 }
 0x23d   : > { %v5887_v14 = vpop.f32.mrf.mxu1  ;;  %v2249_v60 = vpop.f32.mrf.mxu0 }
 0x23e   : > { %v5888_v44 = vadd.f32 %v5887_v14, %v5886_v1  ;;  %v7974_v57 = vadd.f32 %v5876_v41, %v2249_v60 }
 0x23f   : > { %v5889_v16 = vpop.f32.mrf.mxu1  ;;  %v6317_v42 = vpop.f32.mrf.mxu0 }
 0x240   : > { %v7976_v51 = vadd.f32 %v6317_v42, %v5885_v45 }
 0x241   : > { %v5890_v28 = vpop.f32.mrf.mxu1  ;;  %v2252_v11 = vpop.f32.mrf.mxu0 }
 0x242   : > { %8809 = vst [vmem:[#allocation24_spill] sm:$0xff] %v7976_v51  ;;  %v5891_v6 = vadd.f32 %v5890_v28, %v5889_v16  ;;  %v7978_v63 = vadd.f32 %v5879_v33, %v2252_v11 }
 0x243   : > { %v5892_v48 = vpop.f32.mrf.mxu1  ;;  %v6320_v56 = vpop.f32.mrf.mxu0 }
 0x245   : > { %v5893_v30 = vpop.f32.mrf.mxu1  ;;  %v2265_v40 = vpop.f32.mrf.mxu0 }
 0x246   : > { %v5894_v25 = vadd.f32 %v5893_v30, %v5892_v48  ;;  %v7980_v8 = vadd.f32 %v5888_v44, %v2265_v40 }
 0x247   : > { %v5895_v17 = vpop.f32.mrf.mxu1  ;;  %v6321_v1 = vpop.f32.mrf.mxu0 }
 0x248   : > { %v7982_v41 = vadd.f32 %v6320_v56, %v5894_v25  ;;  %v2202_v56 = vadd.f32 %v7914_v53, %v7950_v9 }
 0x249   : > { %v5896_v14 = vpop.f32.mrf.mxu1  ;;  %v2268_v60 = vpop.f32.mrf.mxu0 }
 0x24a   : > { %v5897_v45 = vadd.f32 %v5896_v14, %v5895_v17  ;;  %v7984_v42 = vadd.f32 %v5891_v6, %v2268_v60  ;;  %v7994_v17 = vld [vmem:[%s8719_s2] ss:$0 sm:$0xff] }
 0x24b   : > { %v5932_v51 = vpop.f32.mrf.mxu0  ;;  %v6340_v16 = vpop.f32.mrf.mxu1 }
 0x24c   : > { %v7986_v33 = vadd.f32 %v6321_v1, %v5897_v45 }
 0x24d   : > { %v5933_v28 = vpop.f32.mrf.mxu0  ;;  %v2731_v11 = vpop.f32.mrf.mxu1 }
 0x24e   : > { %8810 = vst [vmem:[#allocation25_spill] sm:$0xff] %v7986_v33  ;;  %v5934_v36 = vadd.f32 %v5933_v28, %v5932_v51 }
 0x24f   : > { %v5935_v21 = vpop.f32.mrf.mxu0  ;;  %v6341_v48 = vpop.f32.mrf.mxu1 }
 0x250   : > { %v2619_v44 = vadd.f32 %v5934_v36, %v7890_v38  ;;  %v2205_v38 = vadd.f32 %v7918_v46, %v7954_v55 }
 0x251   : > { %v5936_v30 = vpop.f32.mrf.mxu0  ;;  %v2734_v1 = vpop.f32.mrf.mxu1 }
 0x252   : > { %v5937_v40 = vadd.f32 %v5936_v30, %v5935_v21  ;;  %v2732_v25 = vadd.f32 %v2731_v11, %v2619_v44  ;;  %v2210_v44 = vadd.f32 %v7945_v18, %v7922_v22 }
 0x253   : > { %v5938_v6 = vpop.f32.mrf.mxu0  ;;  %v8004_v46 = vpop.f32.mrf.mxu1 }
 0x254   : > { %v2810_v14 = vadd.f32 %v2732_v25, %v2202_v56  ;;  %v2622_v51 = vadd.f32 %v5937_v40, %v7892_v43 }
 0x255   : > { %v5939_v60 = vpop.f32.mrf.mxu0 }
 0x256   : > { %v2837_v36 = vadd.f32 %v7994_v17, %v2810_v14  ;;  %v5940_v45 = vadd.f32 %v5939_v60, %v5938_v6  ;;  %v2735_v53 = vadd.f32 %v2734_v1, %v2622_v51 }
 0x257   : > { %v5941_v21 = vpop.f32.mrf.mxu0 }
 0x258   : > { %v2857_v9 = vmax.f32 %v2837_v36, 0.0  ;;  %v2627_v28 = vadd.f32 %v5940_v45, %v7894_v62  ;;  %v2811_v11 = vadd.f32 %v2735_v53, %v2205_v38  ;;  %v2213_v62 = vadd.f32 %v7952_v47, %v7926_v49  ;;  %v3157_v45 = vld [vmem:[#allocation2] sm:$0xf] }
 0x259   : > { %v5942_v30 = vpop.f32.mrf.mxu0  ;;  %v2218_v36 = vadd.f32 %v7930_v61, %v7958_v59 }
 0x25a   : > { %v5668_v56 = vpack.c.bf16 %v2857_v9, %v2857_v9  ;;  %v2740_v25 = vadd.f32 %v6340_v16, %v2627_v28  ;;  %v2838_v43 = vadd.f32 %v7994_v17, %v2811_v11  ;;  %v5943_v40 = vadd.f32 %v5942_v30, %v5941_v21  ;;  %v2747_v11 = vpop.f32.mrf.mxu1 }
 0x25b   : > { %v5944_v33 = vpop.f32.mrf.mxu0 }
 0x25c   : > { %2957 = vst [vmem:[#allocation2 + $0x4] sm:$0xf] %v5668_v56  ;;  %v2978_v55 = vshrl.u32 %v5668_v56, 16  ;;  %v2981_v6 = vshll.u32 %v5668_v56, 16  ;;  %v2812_v1 = vadd.f32 %v2740_v25, %v2210_v44  ;;  %v2858_v14 = vmax.f32 %v2838_v43, 0.0 }
 0x25d   : > { %v2630_v51 = vadd.f32 %v5943_v40, %v7896_v31  ;;  %v5945_v22 = vpop.f32.mrf.mxu0 }
 0x25e   : > { %v2980_v18 = vrot.slane %v2978_v55, 7  ;;  %v3227_v60 = vrot.slane %v2978_v55, 4  ;;  %v3228_v16 = vrot.slane %v2981_v6, 5  ;;  %v2839_v38 = vadd.f32 %v7994_v17, %v2812_v1 }
 0x25f   : > { %v5669_v53 = vpack.c.bf16 %v2858_v14, %v2858_v14  ;;  %v2743_v21 = vadd.f32 %v6341_v48, %v2630_v51  ;;  %v5946_v9 = vadd.f32 %v5945_v22, %v5944_v33  ;;  %v5947_v28 = vpop.f32.mrf.mxu0  ;;  %v8016_v22 = vpop.f32.mrf.mxu1 }
 0x260   : > { %v2983_v44 = vor.u32 %v2981_v6, %v2980_v18  ;;  %v2984_v30 = vrot.slane %v2980_v18, 4  ;;  %v3229_v49 = vor.u32 %v3228_v16, %v3227_v60  ;;  %v2859_v47 = vmax.f32 %v2839_v38, 0.0 }
 0x261   : > { %2958 = vst [vmem:[#allocation2 + $0x10] sm:$0xf] %v5669_v53  ;;  %v2986_v31 = vshrl.u32 %v5669_v53, 16  ;;  %v2989_v56 = vshll.u32 %v5669_v53, 16  ;;  %v2813_v25 = vadd.f32 %v2743_v21, %v2213_v62  ;;  %v5948_v43 = vpop.f32.mrf.mxu0  ;;  %v2635_v40 = vadd.f32 %v5946_v9, %v7898_v20 }
 0x262   : > { %v3158_v61 = vsel %vm7388_vm1, %v2983_v44, %v3157_v45  ;;  %v3230_v59 = vrot.slane %v3229_v49, 4  ;;  %v5670_v55 = vpack.c.bf16 %v2859_v47, %v2859_v47  ;;  %v5949_v48 = vadd.f32 %v5948_v43, %v5947_v28  ;;  %v3338_v49 = vld [vmem:[#allocation2 + $0x14] sm:$0xf] }
 0x263   : > { %3159 = vst [vmem:[#allocation2] sm:$0xf] %v3158_v61  ;;  %v2988_v33 = vrot.slane %v2986_v31, 7  ;;  %v3231_v1 = vrot.slane %v2989_v56, 5  ;;  %v3233_v6 = vrot.slane %v2986_v31, 4  ;;  %v2840_v14 = vadd.f32 %v7994_v17, %v2813_v25  ;;  %v5950_v51 = vpop.f32.mrf.mxu0 }
 0x264   : > { %2959 = vst [vmem:[#allocation2 + $0x1c] sm:$0xf] %v5670_v55  ;;  %v2994_v62 = vshrl.u32 %v5670_v55, 16  ;;  %v2997_v18 = vshll.u32 %v5670_v55, 16  ;;  %v2748_v60 = vadd.f32 %v2747_v11, %v2635_v40  ;;  %v2638_v20 = vadd.f32 %v5949_v48, %v7900_v13  ;;  %v3161_v31 = vld [vmem:[#allocation2 + $0x18] sm:$0xf] }
 0x265   : > { %v2991_v16 = vor.u32 %v2989_v56, %v2988_v33  ;;  %v3232_v38 = vsel %vm7712_vm10, %v3230_v59, %v3231_v1  ;;  %v3234_v45 = vor.u32 %v3233_v6, %v3231_v1  ;;  %v2860_v53 = vmax.f32 %v2840_v14, 0.0  ;;  %v5951_v21 = vpop.f32.mrf.mxu0  ;;  %v2750_v56 = vpop.f32.mrf.mxu1 }
 0x266   : > { %v2996_v9 = vrot.slane %v2994_v62, 7  ;;  %v3236_v28 = vrot.slane %v2994_v62, 4  ;;  %v3237_v44 = vrot.slane %v2997_v18, 5  ;;  %3337 = vst [vmem:[#allocation2 + $0x8] sm:$0xf] %v3232_v38  ;;  %v2814_v47 = vadd.f32 %v2748_v60, %v2218_v36 }
 0x267   : > { %v2992_v25 = vsel %vm7607_vm7, %v2984_v30, %v2991_v16  ;;  %v3235_v11 = vrot.slane %v3234_v45, 4  ;;  %v5671_v43 = vpack.c.bf16 %v2860_v53, %v2860_v53  ;;  %v5952_v13 = vadd.f32 %v5951_v21, %v5950_v51  ;;  %v5953_v40 = vpop.f32.mrf.mxu0 }
 0x268   : > { %v2221_v61 = vadd.f32 %v7934_v34, %v7962_v39  ;;  %v2999_v59 = vor.u32 %v2997_v18, %v2996_v9  ;;  %v3238_v55 = vor.u32 %v3237_v44, %v3236_v28  ;;  %3160 = vst [vmem:[#allocation2 + $0xc] sm:$0xf] %v2992_v25  ;;  %v2841_v48 = vadd.f32 %v7994_v17, %v2814_v47  ;;  %v8036_v25 = vpop.f32.mrf.mxu1 }
 0x269   : > { %v3339_v36 = vsel %vm7529_vm3, %v3235_v11, %v3338_v49  ;;  %2960 = vst [vmem:[#allocation2 + $0x28] sm:$0xf] %v5671_v43  ;;  %v3002_v33 = vshrl.u32 %v5671_v43, 16  ;;  %v3005_v1 = vshll.u32 %v5671_v43, 16  ;;  %v2643_v30 = vadd.f32 %v5952_v13, %v7902_v12  ;;  %v5954_v6 = vpop.f32.mrf.mxu0  ;;  %v3342_v11 = vld [vmem:[#allocation2 + $0x2c] sm:$0xf] }
 0x26a   : > { %v3197_v14 = vld [vmem:[#allocation2] sm:$0x1]  ;;  %v3162_v51 = vsel %vm7388_vm1, %v2999_v59, %v3161_v31  ;;  %v3239_v62 = vrot.slane %v3238_v55, 4  ;;  %3340 = vst [vmem:[#allocation2 + $0x14] sm:$0xf] %v3339_v36  ;;  %v2861_v34 = vmax.f32 %v2841_v48, 0.0  ;;  %v2751_v39 = vadd.f32 %v2750_v56, %v2638_v20 }
 0x26b   : > { %v3198_v18 = vsel %vm7637_vm8, 0, %v3197_v14  ;;  %3163 = vst [vmem:[#allocation2 + $0x18] sm:$0xf] %v3162_v51  ;;  %v3004_v60 = vrot.slane %v3002_v33, 7  ;;  %v3240_v16 = vrot.slane %v3005_v1, 5  ;;  %v3242_v38 = vrot.slane %v3002_v33, 4  ;;  %v5956_v45 = vpop.f32.mrf.mxu0 }
 0x26c   : > { %3199 = vst [vmem:[#allocation2] sm:$0x1] %v3198_v18  ;;  %v5672_v53 = vpack.c.bf16 %v2861_v34, %v2861_v34  ;;  %v2756_v12 = vadd.f32 %v8004_v46, %v2643_v30  ;;  %v2815_v21 = vadd.f32 %v2751_v39, %v2221_v61  ;;  %v5955_v28 = vadd.f32 %v5954_v6, %v5953_v40  ;;  %v3165_v6 = vld [vmem:[#allocation2 + $0x30] sm:$0xf]  ;;  %v2763_v34 = vpop.f32.mrf.mxu1 }
 0x26d   : > { %v3000_v44 = vrot.slane %v2996_v9, 4  ;;  %v3007_v49 = vor.u32 %v3005_v1, %v3004_v60  ;;  %v3241_v47 = vsel %vm7712_vm10, %v3239_v62, %v3240_v16  ;;  %v3243_v20 = vor.u32 %v3242_v38, %v3240_v16  ;;  %v5957_v31 = vpop.f32.mrf.mxu0 }
 0x26e   : > { %3341 = vst [vmem:[#allocation2 + $0x20] sm:$0xf] %v3241_v47  ;;  %2961 = vst [vmem:[#allocation2 + $0x34] sm:$0xf] %v5672_v53  ;;  %v3010_v43 = vshrl.u32 %v5672_v53, 16  ;;  %v3013_v13 = vshll.u32 %v5672_v53, 16  ;;  %v2816_v56 = vadd.f32 %v2756_v12, %v7956_v52  ;;  %v2842_v46 = vadd.f32 %v7994_v17, %v2815_v21 }
 0x26f   : > { %v3008_v9 = vsel %vm7607_vm7, %v3000_v44, %v3007_v49  ;;  %v3244_v40 = vrot.slane %v3243_v20, 4  ;;  %v2646_v61 = vadd.f32 %v5955_v28, %v7906_v50  ;;  %v5958_v59 = vadd.f32 %v5957_v31, %v5956_v45  ;;  %v5959_v55 = vpop.f32.mrf.mxu0 }
 0x270   : > { %3164 = vst [vmem:[#allocation2 + $0x24] sm:$0xf] %v3008_v9  ;;  %v8043_v48 = vrot.slane %v3010_v43, 7  ;;  %v3245_v36 = vrot.slane %v3010_v43, 4  ;;  %v3246_v33 = vrot.slane %v3013_v13, 5  ;;  %v2843_v1 = vadd.f32 %v7994_v17, %v2816_v56 }
 0x271   : > { %v3377_v30 = vld [vmem:[#allocation2 + $0x14] sm:$0x8]  ;;  %v3343_v52 = vsel %vm7529_vm3, %v3244_v40, %v3342_v11  ;;  %v2862_v14 = vmax.f32 %v2842_v46, 0.0  ;;  %v2759_v51 = vadd.f32 %v8016_v22, %v2646_v61  ;;  %v5960_v62 = vpop.f32.mrf.mxu0  ;;  %v2651_v50 = vadd.f32 %v5958_v59, %v7910_v37 }
 0x272   : > { %v3200_v39 = vld [vmem:[#allocation2 + $0x18] sm:$0x1]  ;;  %v3378_v18 = vsel %vm7744_vm13, 0, %v3377_v30  ;;  %3344 = vst [vmem:[#allocation2 + $0x2c] sm:$0xf] %v3343_v52  ;;  %v3015_v60 = vor.u32 %v3013_v13, %v8043_v48  ;;  %v3247_v16 = vor.u32 %v3246_v33, %v3245_v36  ;;  %v2863_v45 = vmax.f32 %v2843_v1, 0.0  ;;  %v8063_v33 = vpop.f32.mrf.mxu1 }
 0x273   : > { %v3201_v38 = vsel %vm7637_vm8, 0, %v3200_v39  ;;  %3379 = vst [vmem:[#allocation2 + $0x14] sm:$0x8] %v3378_v18  ;;  %v5673_v53 = vpack.c.bf16 %v2862_v14, %v2862_v14  ;;  %v2817_v22 = vadd.f32 %v2759_v51, %v7960_v2  ;;  %v5962_v12 = vpop.f32.mrf.mxu0  ;;  %v3016_v37 = vrot.slane %v8043_v48, 4 }
 0x274   : > { %3202 = vst [vmem:[#allocation2 + $0x18] sm:$0x1] %v3201_v38  ;;  %v3166_v21 = vsel %vm7388_vm1, %v3015_v60, %v3165_v6  ;;  %v5961_v28 = vadd.f32 %v5960_v62, %v5959_v55  ;;  %v2764_v44 = vadd.f32 %v2763_v34, %v2651_v50  ;;  %v5674_v49 = vpack.c.bf16 %v2863_v45, %v2863_v45  ;;  %v3169_v62 = vld [vmem:[#allocation2 + $0x48] sm:$0xf]  ;;  %v3346_v38 = vld [vmem:[#allocation2 + $0x44] sm:$0xf] }
 0x275   : > { %3167 = vst [vmem:[#allocation2 + $0x30] sm:$0xf] %v3166_v21  ;;  %2962 = vst [vmem:[#allocation2 + $0x40] sm:$0xf] %v5673_v53  ;;  %v3018_v47 = vshrl.u32 %v5673_v53, 16  ;;  %v3021_v20 = vshll.u32 %v5673_v53, 16  ;;  %v2844_v31 = vadd.f32 %v7994_v17, %v2817_v22  ;;  %v5963_v11 = vpop.f32.mrf.mxu0 }
 0x276   : > { %v3248_v43 = vrot.slane %v3247_v16, 4  ;;  %v2818_v2 = vadd.f32 %v2764_v44, %v7966_v23  ;;  %v5964_v13 = vadd.f32 %v5963_v11, %v5962_v12  ;;  %v2654_v56 = vadd.f32 %v5961_v28, %v7912_v32  ;;  %2963 = vst [vmem:[#allocation2 + $0x4c] sm:$0xf] %v5674_v49  ;;  %v2766_v44 = vpop.f32.mrf.mxu1 }
 0x277   : > { %v3026_v46 = vshrl.u32 %v5674_v49, 16  ;;  %v3029_v9 = vshll.u32 %v5674_v49, 16  ;;  %v3020_v40 = vrot.slane %v3018_v47, 7  ;;  %v3249_v61 = vrot.slane %v3021_v20, 5  ;;  %v5965_v59 = vpop.f32.mrf.mxu0 }
 0x278   : > { %v3251_v55 = vrot.slane %v3018_v47, 4  ;;  %v2864_v48 = vmax.f32 %v2844_v31, 0.0  ;;  %v2845_v36 = vadd.f32 %v7994_v17, %v2818_v2  ;;  %v2659_v1 = vadd.f32 %v5964_v13, %v7916_v26 }
 0x279   : > { %v3380_v30 = vld [vmem:[#allocation2 + $0x2c] sm:$0x8]  ;;  %v3028_v52 = vrot.slane %v3026_v46, 7  ;;  %v3254_v23 = vrot.slane %v3026_v46, 4  ;;  %v3255_v6 = vrot.slane %v3029_v9, 5  ;;  %v3023_v14 = vor.u32 %v3021_v20, %v3020_v40  ;;  %v5966_v32 = vpop.f32.mrf.mxu0 }
 0x27a   : > { %v3381_v51 = vsel %vm7744_vm13, 0, %v3380_v30  ;;  %v3250_v50 = vsel %vm7712_vm10, %v3248_v43, %v3249_v61  ;;  %v3252_v34 = vor.u32 %v3251_v55, %v3249_v61  ;;  %v5675_v39 = vpack.c.bf16 %v2864_v48, %v2864_v48  ;;  %v8080_v48 = vpop.f32.mrf.mxu1 }
 0x27b   : > { %3382 = vst [vmem:[#allocation2 + $0x2c] sm:$0x8] %v3381_v51  ;;  %v3031_v18 = vor.u32 %v3029_v9, %v3028_v52  ;;  %v3032_v60 = vrot.slane %v3028_v52, 4  ;;  %v3256_v16 = vor.u32 %v3255_v6, %v3254_v23  ;;  %v3024_v26 = vsel %vm7607_vm7, %v3016_v37, %v3023_v14  ;;  %3345 = vst [vmem:[#allocation2 + $0x38] sm:$0xf] %v3250_v50  ;;  %v5968_v45 = vpop.f32.mrf.mxu0 }
 0x27c   : > { %v3203_v53 = vld [vmem:[#allocation2 + $0x30] sm:$0x1]  ;;  %3168 = vst [vmem:[#allocation2 + $0x3c] sm:$0xf] %v3024_v26  ;;  %v3253_v22 = vrot.slane %v3252_v34, 4  ;;  %v3034_v12 = vshrl.u32 %v5675_v39, 16  ;;  %v2772_v37 = vadd.f32 %v8036_v25, %v2659_v1  ;;  %v2767_v40 = vadd.f32 %v2766_v44, %v2654_v56 }
 0x27d   : > { %2964 = vst [vmem:[#allocation2 + $0x58] sm:$0xf] %v5675_v39  ;;  %v3037_v21 = vshll.u32 %v5675_v39, 16  ;;  %v2865_v28 = vmax.f32 %v2845_v36, 0.0  ;;  %v3204_v49 = vsel %vm7637_vm8, 0, %v3203_v53  ;;  %v3170_v47 = vsel %vm7388_vm1, %v3031_v18, %v3169_v62  ;;  %v5969_v31 = vpop.f32.mrf.mxu0 }
 0x27e   : > { %v3257_v20 = vrot.slane %v3256_v16, 4  ;;  %3205 = vst [vmem:[#allocation2 + $0x30] sm:$0x1] %v3204_v49  ;;  %3171 = vst [vmem:[#allocation2 + $0x48] sm:$0xf] %v3170_v47  ;;  %v3347_v11 = vsel %vm7529_vm3, %v3253_v22, %v3346_v38  ;;  %v3036_v43 = vrot.slane %v3034_v12, 7  ;;  %v2820_v9 = vadd.f32 %v2772_v37, %v7964_v15  ;;  %v2779_v16 = vpop.f32.mrf.mxu1 }
 0x27f   : > { %v3258_v2 = vrot.slane %v3037_v21, 5  ;;  %v3260_v13 = vrot.slane %v3034_v12, 4  ;;  %3348 = vst [vmem:[#allocation2 + $0x44] sm:$0xf] %v3347_v11  ;;  %v5676_v46 = vpack.c.bf16 %v2865_v28, %v2865_v28  ;;  %v5967_v61 = vadd.f32 %v5966_v32, %v5965_v59  ;;  %v5971_v55 = vpop.f32.mrf.mxu0  ;;  %v3350_v52 = vld [vmem:[#allocation2 + $0x5c] sm:$0xf] }
 0x280   : > { %v3039_v36 = vor.u32 %v3037_v21, %v3036_v43  ;;  %v5970_v30 = vadd.f32 %v5969_v31, %v5968_v45  ;;  %v2847_v14 = vadd.f32 %v7994_v17, %v2820_v9  ;;  %v2819_v15 = vadd.f32 %v2767_v40, %v7970_v4  ;;  %v3173_v4 = vld [vmem:[#allocation2 + $0x60] sm:$0xf] }
 0x281   : > { %v3259_v25 = vsel %vm7712_vm10, %v3257_v20, %v3258_v2  ;;  %v3261_v1 = vor.u32 %v3260_v13, %v3258_v2  ;;  %2965 = vst [vmem:[#allocation2 + $0x64] sm:$0xf] %v5676_v46  ;;  %v3042_v23 = vshrl.u32 %v5676_v46, 16  ;;  %v3045_v6 = vshll.u32 %v5676_v46, 16  ;;  %v5972_v56 = vpop.f32.mrf.mxu0 }
 0x282   : > { %3349 = vst [vmem:[#allocation2 + $0x50] sm:$0xf] %v3259_v25  ;;  %v3040_v59 = vsel %vm7607_vm7, %v3032_v60, %v3039_v36  ;;  %v2662_v51 = vadd.f32 %v5967_v61, %v7920_v54  ;;  %v5973_v62 = vadd.f32 %v5972_v56, %v5971_v55  ;;  %v2867_v18 = vmax.f32 %v2847_v14, 0.0  ;;  %v8111_v55 = vpop.f32.mrf.mxu1 }
 0x283   : > { %v3262_v32 = vrot.slane %v3261_v1, 4  ;;  %3172 = vst [vmem:[#allocation2 + $0x54] sm:$0xf] %v3040_v59  ;;  %v8089_v50 = vrot.slane %v3042_v23, 7  ;;  %v3263_v34 = vrot.slane %v3042_v23, 4  ;;  %v3264_v39 = vrot.slane %v3045_v6, 5  ;;  %v5974_v26 = vpop.f32.mrf.mxu0 }
 0x284   : > { %v2846_v45 = vadd.f32 %v7994_v17, %v2819_v15  ;;  %v2775_v60 = vadd.f32 %v8063_v33, %v2662_v51  ;;  %v2667_v53 = vadd.f32 %v5970_v30, %v7924_v58  ;;  %v5678_v28 = vpack.c.bf16 %v2867_v18, %v2867_v18  ;;  %v3177_v30 = vld [vmem:[#allocation2 + $0x78] sm:$0xf] }
 0x285   : > { %v3351_v38 = vsel %vm7529_vm3, %v3262_v32, %v3350_v52  ;;  %v3206_v54 = vld [vmem:[#allocation2 + $0x48] sm:$0x1]  ;;  %v3047_v22 = vor.u32 %v3045_v6, %v8089_v50  ;;  %v3048_v12 = vrot.slane %v8089_v50, 4  ;;  %v3265_v21 = vor.u32 %v3264_v39, %v3263_v34  ;;  %v5975_v44 = vpop.f32.mrf.mxu0 }
 0x286   : > { %3352 = vst [vmem:[#allocation2 + $0x5c] sm:$0xf] %v3351_v38  ;;  %v3207_v49 = vsel %vm7637_vm8, 0, %v3206_v54  ;;  %v3383_v47 = vld [vmem:[#allocation2 + $0x44] sm:$0x8]  ;;  %v2866_v20 = vmax.f32 %v2846_v45, 0.0  ;;  %v2821_v37 = vadd.f32 %v2775_v60, %v7968_v19  ;;  %v2780_v31 = vadd.f32 %v2779_v16, %v2667_v53 }
 0x287   : > { %3208 = vst [vmem:[#allocation2 + $0x48] sm:$0x1] %v3207_v49  ;;  %v3384_v58 = vsel %vm7744_vm13, 0, %v3383_v47  ;;  %v3174_v33 = vsel %vm7388_vm1, %v3047_v22, %v3173_v4  ;;  %v3266_v11 = vrot.slane %v3265_v21, 4  ;;  %2967 = vst [vmem:[#allocation2 + $0x7c] sm:$0xf] %v5678_v28  ;;  %v8105_v2 = vpop.f32.mrf.mxu0  ;;  %v5976_v36 = vadd.f32 %v5975_v44, %v5974_v26  ;;  %v2782_v4 = vpop.f32.mrf.mxu1 }
 0x288   : > { %v3058_v43 = vshrl.u32 %v5678_v28, 16  ;;  %3385 = vst [vmem:[#allocation2 + $0x44] sm:$0x8] %v3384_v58  ;;  %3175 = vst [vmem:[#allocation2 + $0x60] sm:$0xf] %v3174_v33  ;;  %v3061_v13 = vshll.u32 %v5678_v28, 16  ;;  %v5677_v46 = vpack.c.bf16 %v2866_v20, %v2866_v20  ;;  %v2848_v9 = vadd.f32 %v7994_v17, %v2821_v37 }
 0x289   : > { %v2822_v19 = vadd.f32 %v2780_v31, %v7974_v57  ;;  %v2670_v25 = vadd.f32 %v5973_v62, %v7928_v0  ;;  %v8114_v1 = vpop.f32.mrf.mxu0  ;;  %v2675_v59 = vadd.f32 %v5976_v36, %v7932_v27  ;;  %v3354_v21 = vld [vmem:[#allocation2 + $0x74] sm:$0xf] }
 0x28a   : > { %v8109_v40 = vrot.slane %v3058_v43, 7  ;;  %v3272_v61 = vrot.slane %v3058_v43, 4  ;;  %v3273_v52 = vrot.slane %v3061_v13, 5  ;;  %2966 = vst [vmem:[#allocation2 + $0x70] sm:$0xf] %v5677_v46  ;;  %v3050_v23 = vshrl.u32 %v5677_v46, 16 }
 0x28b   : > { %v3053_v6 = vshll.u32 %v5677_v46, 16  ;;  %v2868_v14 = vmax.f32 %v2848_v9, 0.0  ;;  %v2849_v56 = vadd.f32 %v7994_v17, %v2822_v19  ;;  %v8120_v32 = vpop.f32.mrf.mxu0  ;;  %v2788_v47 = vadd.f32 %v8080_v48, %v2675_v59 }
 0x28c   : > { %v3063_v15 = vor.u32 %v3061_v13, %v8109_v40  ;;  %v3064_v57 = vrot.slane %v8109_v40, 4  ;;  %v3274_v0 = vor.u32 %v3273_v52, %v3272_v61  ;;  %v3052_v62 = vrot.slane %v3050_v23, 7  ;;  %v3358_v52 = vld [vmem:[#allocation2 + $0x8c] sm:$0xf] }
 0x28d   : > { %v3386_v51 = vld [vmem:[#allocation2 + $0x5c] sm:$0x8]  ;;  %v3267_v34 = vrot.slane %v3053_v6, 5  ;;  %v3269_v39 = vrot.slane %v3050_v23, 4  ;;  %v5679_v26 = vpack.c.bf16 %v2868_v14, %v2868_v14  ;;  %v2869_v38 = vmax.f32 %v2849_v56, 0.0  ;;  %v5981_v45 = vpop.f32.mrf.mxu0  ;;  %v8149_v56 = vpop.f32.mrf.mxu1 }
 0x28e   : > { %v3387_v18 = vsel %vm7744_vm13, 0, %v3386_v51  ;;  %v3178_v16 = vsel %vm7388_vm1, %v3063_v15, %v3177_v30  ;;  %v3275_v27 = vrot.slane %v3274_v0, 4  ;;  %v3055_v60 = vor.u32 %v3053_v6, %v3052_v62  ;;  %v3181_v23 = vld [vmem:[#allocation2 + $0x90] sm:$0xf] }
 0x28f   : > { %3388 = vst [vmem:[#allocation2 + $0x5c] sm:$0x8] %v3387_v18  ;;  %3179 = vst [vmem:[#allocation2 + $0x78] sm:$0xf] %v3178_v16  ;;  %v3268_v53 = vsel %vm7712_vm10, %v3266_v11, %v3267_v34  ;;  %v3270_v54 = vor.u32 %v3269_v39, %v3267_v34  ;;  %v3209_v22 = vld [vmem:[#allocation2 + $0x60] sm:$0x1]  ;;  %v5680_v49 = vpack.c.bf16 %v2869_v38, %v2869_v38  ;;  %v8129_v20 = vpop.f32.mrf.mxu0 }
 0x290   : > { %3353 = vst [vmem:[#allocation2 + $0x68] sm:$0xf] %v3268_v53  ;;  %2968 = vst [vmem:[#allocation2 + $0x88] sm:$0xf] %v5679_v26  ;;  %v3066_v28 = vshrl.u32 %v5679_v26, 16  ;;  %v3069_v44 = vshll.u32 %v5679_v26, 16  ;;  %v3056_v31 = vsel %vm7607_vm7, %v3048_v12, %v3055_v60  ;;  %v2783_v33 = vadd.f32 %v2782_v4, %v2670_v25  ;;  %v2795_v53 = vpop.f32.mrf.mxu1 }
 0x291   : > { %v3210_v37 = vsel %vm7637_vm8, 0, %v3209_v22  ;;  %v3271_v58 = vrot.slane %v3270_v54, 4  ;;  %3176 = vst [vmem:[#allocation2 + $0x6c] sm:$0xf] %v3056_v31  ;;  %2969 = vst [vmem:[#allocation2 + $0x94] sm:$0xf] %v5680_v49  ;;  %v8137_v48 = vpop.f32.mrf.mxu0  ;;  %v2824_v50 = vadd.f32 %v2788_v47, %v7972_v7  ;;  %v5982_v4 = vadd.f32 %v5981_v45, %v8120_v32 }
 0x292   : > { %3211 = vst [vmem:[#allocation2 + $0x60] sm:$0x1] %v3210_v37  ;;  %v3068_v11 = vrot.slane %v3066_v28, 7  ;;  %v3276_v43 = vrot.slane %v3069_v44, 5  ;;  %v3278_v13 = vrot.slane %v3066_v28, 4  ;;  %v3074_v46 = vshrl.u32 %v5680_v49, 16 }
 0x293   : > { %v3355_v9 = vsel %vm7529_vm3, %v3271_v58, %v3354_v21  ;;  %v3077_v19 = vshll.u32 %v5680_v49, 16  ;;  %v2823_v40 = vadd.f32 %v2783_v33, %v7978_v63  ;;  %v5986_v30 = vpop.f32.mrf.mxu0  ;;  %v2851_v15 = vadd.f32 %v7994_v17, %v2824_v50  ;;  %v8811_v22 = vld [vmem:[#allocation19_spill] sm:$0xff]  ;;  %v8812_v28 = vld [vmem:[#allocation20_spill] sm:$0xff] }
 0x294   : > { %3356 = vst [vmem:[#allocation2 + $0x74] sm:$0xf] %v3355_v9  ;;  %v3071_v12 = vor.u32 %v3069_v44, %v3068_v11  ;;  %v3277_v61 = vsel %vm7712_vm10, %v3275_v27, %v3276_v43  ;;  %v3279_v36 = vor.u32 %v3278_v13, %v3276_v43  ;;  %v8145_v25 = vrot.slane %v3074_v46, 7 }
 0x295   : > { %3357 = vst [vmem:[#allocation2 + $0x80] sm:$0xf] %v3277_v61  ;;  %v3281_v6 = vrot.slane %v3074_v46, 4  ;;  %v3282_v14 = vrot.slane %v3077_v19, 5  ;;  %v2850_v7 = vadd.f32 %v7994_v17, %v2823_v40  ;;  %v2871_v39 = vmax.f32 %v2851_v15, 0.0  ;;  %v5987_v16 = vpop.f32.mrf.mxu0 }
 0x296   : > { %v3212_v63 = vld [vmem:[#allocation2 + $0x78] sm:$0x1]  ;;  %v3072_v59 = vsel %vm7607_vm7, %v3064_v57, %v3071_v12  ;;  %v3280_v51 = vrot.slane %v3279_v36, 4  ;;  %v3079_v0 = vor.u32 %v3077_v19, %v8145_v25  ;;  %v5979_v57 = vadd.f32 %v8114_v1, %v8105_v2  ;;  %v3185_v19 = vld [vmem:[#allocation2 + $0xa8] sm:$0xf] }
 0x297   : > { %v3213_v62 = vsel %vm7637_vm8, 0, %v3212_v63  ;;  %3180 = vst [vmem:[#allocation2 + $0x84] sm:$0xf] %v3072_v59  ;;  %v3283_v34 = vor.u32 %v3282_v14, %v3281_v6  ;;  %v2870_v18 = vmax.f32 %v2850_v7, 0.0  ;;  %v5682_v27 = vpack.c.bf16 %v2871_v39, %v2871_v39  ;;  %v5989_v11 = vpop.f32.mrf.mxu0  ;;  %v8813_v12 = vld [vmem:[#allocation24_spill] sm:$0xff] }
 0x298   : > { %3214 = vst [vmem:[#allocation2 + $0x78] sm:$0x1] %v3213_v62  ;;  %v3359_v26 = vsel %vm7529_vm3, %v3280_v51, %v3358_v52  ;;  %v3182_v38 = vsel %vm7388_vm1, %v3079_v0, %v3181_v23  ;;  %v3080_v54 = vrot.slane %v8145_v25, 4  ;;  %v2678_v21 = vadd.f32 %v5979_v57, %v8811_v22  ;;  %v6357_v25 = vpop.f32.mrf.mxu1  ;;  %v8814_v23 = vld [vmem:[#allocation22_spill] sm:$0xff] }
 0x299   : > { %3360 = vst [vmem:[#allocation2 + $0x8c] sm:$0xf] %v3359_v26  ;;  %3183 = vst [vmem:[#allocation2 + $0x90] sm:$0xf] %v3182_v38  ;;  %v5681_v60 = vpack.c.bf16 %v2870_v18, %v2870_v18  ;;  %v2683_v44 = vadd.f32 %v5982_v4, %v8812_v28  ;;  %v5988_v49 = vadd.f32 %v5987_v16, %v5986_v30  ;;  %v3090_v37 = vshrl.u32 %v5682_v27, 16  ;;  %v8815_v4 = vld [vmem:[#allocation21_spill] sm:$0xff] }
 0x29a   : > { %2971 = vst [vmem:[#allocation2 + $0xac] sm:$0xf] %v5682_v27  ;;  %v3093_v31 = vshll.u32 %v5682_v27, 16  ;;  %v3284_v45 = vrot.slane %v3283_v34, 4  ;;  %v2791_v58 = vadd.f32 %v8111_v55, %v2678_v21  ;;  %v5985_v55 = vadd.f32 %v8137_v48, %v8129_v20  ;;  %v3362_v34 = vld [vmem:[#allocation2 + $0xa4] sm:$0xf]  ;;  %v2798_v38 = vpop.f32.mrf.mxu1 }
 0x29b   : > { %v3389_v47 = vld [vmem:[#allocation2 + $0x74] sm:$0x8]  ;;  %2970 = vst [vmem:[#allocation2 + $0xa0] sm:$0xf] %v5681_v60  ;;  %v3082_v2 = vshrl.u32 %v5681_v60, 16  ;;  %v3085_v1 = vshll.u32 %v5681_v60, 16  ;;  %v2796_v33 = vadd.f32 %v2795_v53, %v2683_v44  ;;  %v2691_v6 = vadd.f32 %v5988_v49, %v8814_v23 }
 0x29c   : > { %v3390_v32 = vsel %vm7744_vm13, 0, %v3389_v47  ;;  %v8169_v43 = vrot.slane %v3090_v37, 7  ;;  %v3290_v13 = vrot.slane %v3090_v37, 4  ;;  %v3291_v46 = vrot.slane %v3093_v31, 5  ;;  %v8816_v49 = vld [vmem:[#allocation23_spill] sm:$0xff] }
 0x29d   : > { %3391 = vst [vmem:[#allocation2 + $0x74] sm:$0x8] %v3390_v32  ;;  %v3084_v9 = vrot.slane %v3082_v2, 7  ;;  %v3285_v50 = vrot.slane %v3085_v1, 5  ;;  %v3287_v40 = vrot.slane %v3082_v2, 4  ;;  %v2825_v61 = vadd.f32 %v2791_v58, %v8813_v12 }
 0x29e   : > { %v2826_v36 = vadd.f32 %v2796_v33, %v7980_v8  ;;  %v3095_v30 = vor.u32 %v3093_v31, %v8169_v43  ;;  %v5990_v8 = vpop.f32.mrf.mxu0  ;;  %v3292_v48 = vor.u32 %v3291_v46, %v3290_v13  ;;  %v2804_v57 = vadd.f32 %v8149_v56, %v2691_v6 }
 0x29f   : > { %v3087_v52 = vor.u32 %v3085_v1, %v3084_v9  ;;  %v3286_v7 = vsel %vm7712_vm10, %v3284_v45, %v3285_v50  ;;  %v3288_v63 = vor.u32 %v3287_v40, %v3285_v50  ;;  %v2852_v59 = vadd.f32 %v7994_v17, %v2825_v61 }
 0x2a0   : > { %v3392_v14 = vld [vmem:[#allocation2 + $0x8c] sm:$0x8]  ;;  %v3215_v15 = vld [vmem:[#allocation2 + $0x90] sm:$0x1]  ;;  %v2853_v51 = vadd.f32 %v7994_v17, %v2826_v36  ;;  %v3186_v20 = vsel %vm7388_vm1, %v3095_v30, %v3185_v19  ;;  %3361 = vst [vmem:[#allocation2 + $0x98] sm:$0xf] %v3286_v7  ;;  %v2686_v27 = vadd.f32 %v5985_v55, %v8815_v4  ;;  %v5991_v60 = vadd.f32 %v5990_v8, %v5989_v11 }
 0x2a1   : > { %v3393_v0 = vsel %vm7744_vm13, 0, %v3392_v14  ;;  %v3216_v62 = vsel %vm7637_vm8, 0, %v3215_v15  ;;  %3187 = vst [vmem:[#allocation2 + $0xa8] sm:$0xf] %v3186_v20  ;;  %v3088_v39 = vsel %vm7607_vm7, %v3080_v54, %v3087_v52  ;;  %v3289_v18 = vrot.slane %v3288_v63, 4  ;;  %v8817_v7 = vld [vmem:[#allocation25_spill] sm:$0xff] }
 0x2a2   : > { %3394 = vst [vmem:[#allocation2 + $0x8c] sm:$0x8] %v3393_v0  ;;  %3217 = vst [vmem:[#allocation2 + $0x90] sm:$0x1] %v3216_v62  ;;  %v2872_v16 = vmax.f32 %v2852_v59, 0.0  ;;  %v2873_v26 = vmax.f32 %v2853_v51, 0.0  ;;  %v2828_v44 = vadd.f32 %v2804_v57, %v7982_v41  ;;  %v2799_v54 = vadd.f32 %v2798_v38, %v2686_v27 }
 0x2a3   : > { %3184 = vst [vmem:[#allocation2 + $0x9c] sm:$0xf] %v3088_v39  ;;  %v3363_v53 = vsel %vm7529_vm3, %v3289_v18, %v3362_v34  ;;  %v3293_v28 = vrot.slane %v3292_v48, 4  ;;  %v2694_v47 = vadd.f32 %v5991_v60, %v8816_v49  ;;  %v3096_v1 = vrot.slane %v8169_v43, 4  ;;  %v3189_v36 = vld [vmem:[#allocation2 + $0xc0] sm:$0xf] }
 0x2a4   : > { %v5683_v22 = vpack.c.bf16 %v2872_v16, %v2872_v16  ;;  %v5684_v21 = vpack.c.bf16 %v2873_v26, %v2873_v26  ;;  %3364 = vst [vmem:[#allocation2 + $0xa4] sm:$0xf] %v3363_v53  ;;  %v2855_v32 = vadd.f32 %v7994_v17, %v2828_v44  ;;  %v2827_v45 = vadd.f32 %v2799_v54, %v7984_v42  ;;  %v3193_v16 = vld [vmem:[#allocation2 + $0xd8] sm:$0xf] }
 0x2a5   : > { %v2807_v58 = vadd.f32 %v6357_v25, %v2694_v47  ;;  %v3366_v25 = vld [vmem:[#allocation2 + $0xbc] sm:$0xf] }
 0x2a6   : > { %2972 = vst [vmem:[#allocation2 + $0xb8] sm:$0xf] %v5683_v22  ;;  %v3098_v37 = vshrl.u32 %v5683_v22, 16  ;;  %v3101_v31 = vshll.u32 %v5683_v22, 16  ;;  %2973 = vst [vmem:[#allocation2 + $0xc4] sm:$0xf] %v5684_v21  ;;  %v2854_v40 = vadd.f32 %v7994_v17, %v2827_v45 }
 0x2a7   : > { %v3106_v56 = vshrl.u32 %v5684_v21, 16  ;;  %v3109_v2 = vshll.u32 %v5684_v21, 16  ;;  %v2875_v50 = vmax.f32 %v2855_v32, 0.0  ;;  %v2829_v63 = vadd.f32 %v2807_v58, %v8817_v7 }
 0x2a8   : > { %v3100_v33 = vrot.slane %v3098_v37, 7  ;;  %v3294_v11 = vrot.slane %v3101_v31, 5  ;;  %v3296_v13 = vrot.slane %v3098_v37, 4  ;;  %v3218_v46 = vld [vmem:[#allocation2 + $0xa8] sm:$0x1]  ;;  %v2874_v15 = vmax.f32 %v2854_v40, 0.0 }
 0x2a9   : > { %v8198_v41 = vrot.slane %v3106_v56, 7  ;;  %v3299_v9 = vrot.slane %v3106_v56, 4  ;;  %v3300_v19 = vrot.slane %v3109_v2, 5  ;;  %v3219_v12 = vsel %vm7637_vm8, 0, %v3218_v46  ;;  %v3370_v37 = vld [vmem:[#allocation2 + $0xd4] sm:$0xf] }
 0x2aa   : > { %v3103_v43 = vor.u32 %v3101_v31, %v3100_v33  ;;  %v3295_v61 = vsel %vm7712_vm10, %v3293_v28, %v3294_v11  ;;  %v3297_v42 = vor.u32 %v3296_v13, %v3294_v11  ;;  %3220 = vst [vmem:[#allocation2 + $0xa8] sm:$0x1] %v3219_v12  ;;  %v5686_v55 = vpack.c.bf16 %v2875_v50, %v2875_v50  ;;  %v3374_v12 = vld [vmem:[#allocation2 + $0xec] sm:$0xf] }
 0x2ab   : > { %3365 = vst [vmem:[#allocation2 + $0xb0] sm:$0xf] %v3295_v61  ;;  %v3111_v30 = vor.u32 %v3109_v2, %v8198_v41  ;;  %v3301_v52 = vor.u32 %v3300_v19, %v3299_v9  ;;  %v3395_v23 = vld [vmem:[#allocation2 + $0xa4] sm:$0x8]  ;;  %v5685_v20 = vpack.c.bf16 %v2874_v15, %v2874_v15  ;;  %v2856_v48 = vadd.f32 %v7994_v17, %v2829_v63 }
 0x2ac   : > { %v3104_v6 = vsel %vm7607_vm7, %v3096_v1, %v3103_v43  ;;  %v3298_v14 = vrot.slane %v3297_v42, 4  ;;  %v3396_v59 = vsel %vm7744_vm13, 0, %v3395_v23  ;;  %2975 = vst [vmem:[#allocation2 + $0xdc] sm:$0xf] %v5686_v55  ;;  %v3122_v8 = vshrl.u32 %v5686_v55, 16 }
 0x2ad   : > { %3188 = vst [vmem:[#allocation2 + $0xb4] sm:$0xf] %v3104_v6  ;;  %v3190_v51 = vsel %vm7388_vm1, %v3111_v30, %v3189_v36  ;;  %3397 = vst [vmem:[#allocation2 + $0xa4] sm:$0x8] %v3396_v59  ;;  %v3125_v62 = vshll.u32 %v5686_v55, 16  ;;  %v3302_v34 = vrot.slane %v3301_v52, 4 }
 0x2ae   : > { %v3367_v0 = vsel %vm7529_vm3, %v3298_v14, %v3366_v25  ;;  %3191 = vst [vmem:[#allocation2 + $0xc0] sm:$0xf] %v3190_v51  ;;  %v3124_v39 = vrot.slane %v3122_v8, 7  ;;  %v3308_v18 = vrot.slane %v3122_v8, 4  ;;  %2974 = vst [vmem:[#allocation2 + $0xd0] sm:$0xf] %v5685_v20 }
 0x2af   : > { %3368 = vst [vmem:[#allocation2 + $0xbc] sm:$0xf] %v3367_v0  ;;  %v3309_v26 = vrot.slane %v3125_v62, 5  ;;  %v3114_v38 = vshrl.u32 %v5685_v20, 16  ;;  %v3117_v57 = vshll.u32 %v5685_v20, 16  ;;  %v2876_v4 = vmax.f32 %v2856_v48, 0.0 }
 0x2b0   : > { %v3127_v27 = vor.u32 %v3125_v62, %v3124_v39  ;;  %v3112_v17 = vrot.slane %v8198_v41, 4  ;;  %v3128_v9 = vrot.slane %v3124_v39, 4 }
 0x2b1   : > { %v3310_v60 = vor.u32 %v3309_v26, %v3308_v18  ;;  %v3116_v53 = vrot.slane %v3114_v38, 7  ;;  %v3303_v22 = vrot.slane %v3117_v57, 5  ;;  %v3305_v21 = vrot.slane %v3114_v38, 4 }
 0x2b2   : > { %v3194_v28 = vsel %vm7388_vm1, %v3127_v27, %v3193_v16  ;;  %v5687_v44 = vpack.c.bf16 %v2876_v4, %v2876_v4 }
 0x2b3   : > { %3195 = vst [vmem:[#allocation2 + $0xd8] sm:$0xf] %v3194_v28  ;;  %v3119_v54 = vor.u32 %v3117_v57, %v3116_v53  ;;  %v3304_v49 = vsel %vm7712_vm10, %v3302_v34, %v3303_v22  ;;  %v3306_v47 = vor.u32 %v3305_v21, %v3303_v22  ;;  %v3311_v56 = vrot.slane %v3310_v60, 4 }
 0x2b4   : > { %3369 = vst [vmem:[#allocation2 + $0xc8] sm:$0xf] %v3304_v49  ;;  %2976 = vst [vmem:[#allocation2 + $0xe8] sm:$0xf] %v5687_v44  ;;  %v3130_v2 = vshrl.u32 %v5687_v44, 16  ;;  %v3133_v1 = vshll.u32 %v5687_v44, 16 }
 0x2b5   : > { %v3221_v31 = vld [vmem:[#allocation2 + $0xc0] sm:$0x1]  ;;  %v3120_v45 = vsel %vm7607_vm7, %v3112_v17, %v3119_v54  ;;  %v3307_v58 = vrot.slane %v3306_v47, 4 }
 0x2b6   : > { %v3398_v32 = vld [vmem:[#allocation2 + $0xbc] sm:$0x8]  ;;  %v3222_v29 = vsel %vm7637_vm8, 0, %v3221_v31  ;;  %3192 = vst [vmem:[#allocation2 + $0xcc] sm:$0xf] %v3120_v45  ;;  %v3132_v11 = vrot.slane %v3130_v2, 7 }
 0x2b7   : > { %v3399_v33 = vsel %vm7744_vm13, 0, %v3398_v32  ;;  %3223 = vst [vmem:[#allocation2 + $0xc0] sm:$0x1] %v3222_v29  ;;  %v3312_v13 = vrot.slane %v3133_v1, 5  ;;  %v3314_v41 = vrot.slane %v3130_v2, 4  ;;  %v3371_v46 = vsel %vm7529_vm3, %v3307_v58, %v3370_v37 }
 0x2b8   : > { %3400 = vst [vmem:[#allocation2 + $0xbc] sm:$0x8] %v3399_v33  ;;  %3372 = vst [vmem:[#allocation2 + $0xd4] sm:$0xf] %v3371_v46  ;;  %v3135_v19 = vor.u32 %v3133_v1, %v3132_v11 }
 0x2b9   : > { %v3313_v50 = vsel %vm7712_vm10, %v3311_v56, %v3312_v13  ;;  %v3315_v40 = vor.u32 %v3314_v41, %v3312_v13 }
 0x2ba   : > { %3373 = vst [vmem:[#allocation2 + $0xe0] sm:$0xf] %v3313_v50  ;;  %v3224_v43 = vld [vmem:[#allocation2 + $0xd8] sm:$0x1]  ;;  %v3136_v61 = vsel %vm7607_vm7, %v3128_v9, %v3135_v19 }
 0x2bb   : > { %v3316_v42 = vrot.slane %v3315_v40, 4  ;;  %v3225_v36 = vsel %vm7637_vm8, 0, %v3224_v43  ;;  %3196 = vst [vmem:[#allocation2 + $0xe4] sm:$0xf] %v3136_v61 }
 0x2bc   : > { %3226 = vst [vmem:[#allocation2 + $0xd8] sm:$0x1] %v3225_v36 }
 0x2bd   : > { %v3375_v25 = vsel %vm7529_vm3, %v3316_v42, %v3374_v12 }
 0x2be   : > { %3376 = vst [vmem:[#allocation2 + $0xec] sm:$0xf] %v3375_v25 }
 0x2bf   : > { %v3401_v30 = vld [vmem:[#allocation2 + $0xd4] sm:$0x8] }
 0x2c0   : > { %v3402_v10 = vsel %vm7744_vm13, 0, %v3401_v30 }
 0x2c1   : > { %3403 = vst [vmem:[#allocation2 + $0xd4] sm:$0x8] %v3402_v10 }
 0x2c3   : > { %3409 = sbr.rel (%p5311_p9) target bundleno = 715 (0x2cb), region = 72 }
 0x2c5   : > { %v3404_v52 = vld [vmem:[#allocation2 + $0xec] sm:$0x8] }
 0x2c6   : > { %v3405_v24 = vsel %vm7744_vm13, 0, %v3404_v52 }
 0x2c7   : > { %3406 = vst [vmem:[#allocation2 + $0xec] sm:$0x8] %v3405_v24 }
 0x2c8   : > { %v7068_v3 = vmov 0  }
 0x2c9   : > { %3410 = vst [vmem:[#allocation2] sm:$0xff] %v7068_v3  ;;  %3411 = vst [vmem:[#allocation2 + $0x8] sm:$0xf] %v7068_v3 }
 0x2ca   : > { %3412 = vst [vmem:[#allocation2 + $0xc] sm:$0xff] %v7068_v3  ;;  %3413 = vst [vmem:[#allocation2 + $0x14] sm:$0xf] %v7068_v3 }
 0x2cb PF: > { %3416 = sbr.rel (%p5318_p3) target bundleno = 723 (0x2d3), region = 76 }
 0x2d0   : > { %v7069_v5 = vmov 0  }
 0x2d1   : > { %3418 = vst [vmem:[#allocation2 + $0xd8] sm:$0xff] %v7069_v5  ;;  %3419 = vst [vmem:[#allocation2 + $0xe0] sm:$0xf] %v7069_v5 }
 0x2d2   : > { %3420 = vst [vmem:[#allocation2 + $0xe4] sm:$0xff] %v7069_v5  ;;  %3421 = vst [vmem:[#allocation2 + $0xec] sm:$0xf] %v7069_v5 }
 0x2d3 PF: > { %v6726_v35 = vld [vmem:[#allocation8 + $0x138] sm:$0xff]   ;;  %v6729_v6 = vld [vmem:[#allocation8 + $0x130] sm:$0xff]   ;;  %v6732_v7 = vld [vmem:[#allocation8 + $0x128] sm:$0xff]   ;;  %s8887_s30 = sld [smem:[#allocation14_spill]]  ;;  %s5688_s7 = sshll.u32 %s7040_s24, 4 }
 0x2d4   : > { %v6727_v55 = vld [vmem:[#allocation8 + $0x178] sm:$0xff]   ;;  %6010 = vmatprep.subr.bf16.mxu1 %v6726_v35  ;;  %v6730_v14 = vld [vmem:[#allocation8 + $0x170] sm:$0xff]   ;;  %v6733_v63 = vld [vmem:[#allocation8 + $0x168] sm:$0xff]   ;;  %s5182_s9 = sshll.u32 %s7286_s11, 4  ;;  %s8896_s8 = sld [smem:[#allocation57_spill]]  ;;  %s8651_s9 = int_to_ptr.vmem [resolvable:$true] %s5182_s9 }
 0x2d5   : > { %v6728_v23 = vld [vmem:[#allocation8 + $0xf8] sm:$0xff]   ;;  %6358 = vmatprep.subr.bf16.mxu0 %v6727_v55  ;;  %v6731_v15 = vld [vmem:[#allocation8 + $0xf0] sm:$0xff]   ;;  %v6734_v59 = vld [vmem:[#allocation8 + $0xe8] sm:$0xff]   ;;  %s8657_s21 = scalar_lea.sflag [#allocation5], %s283_s25  ;;  %s7070_s3 = smov [#allocation9]  }
 0x2d6   : > { %6011 = vmatpush3.bf16.msra.mxu1 %v6728_v23  ;;  %6359 = vmatpush3.bf16.msra.mxu0 %v6727_v55  ;;  %v6735_v51 = vld [vmem:[#allocation8 + $0x120] sm:$0xff]   ;;  %v6738_v62 = vld [vmem:[#allocation8 + $0x118] sm:$0xff]   ;;  %v6741_v34 = vld [vmem:[#allocation8 + $0x110] sm:$0xff]   ;;  %s6936_s29 = sshll.u32 %s7070_s3, 4  ;;  %s6937_s29 = int_to_ptr.vmem [resolvable:$false] %s6936_s29 }
 0x2d7   : > { %6012 = vmatprep.subr.bf16.mxu1 %v6729_v6  ;;  %6360 = vmatprep.subr.bf16.mxu0 %v6730_v14  ;;  %v6736_v8 = vld [vmem:[#allocation8 + $0x160] sm:$0xff]   ;;  %v6739_v20 = vld [vmem:[#allocation8 + $0x158] sm:$0xff]   ;;  %v6742_v39 = vld [vmem:[#allocation8 + $0x150] sm:$0xff]   ;;  %s6938_s13 = scalar_lea.vmem %s6937_s29, 4096  ;;  %p6939_p2 = scmp.lt.s32.totalorder %s8651_s9, %s6937_s29 }
 0x2d8   : > { %v6737_v0 = vld [vmem:[#allocation8 + $0xe0] sm:$0xff]   ;;  %v6740_v48 = vld [vmem:[#allocation8 + $0xd8] sm:$0xff]   ;;  %v6743_v18 = vld [vmem:[#allocation8 + $0xd0] sm:$0xff]  }
 0x2d9   : > { %v6744_v16 = vld [vmem:[#allocation8 + $0x108] sm:$0xff]   ;;  %v6747_v57 = vld [vmem:[#allocation8 + $0x100] sm:$0xff]   ;;  %v6755_v22 = vld [vmem:[#allocation8 + $0x1f8] sm:$0xff]   ;;  %s5659_s12 = sshll.u32 %s8887_s30, 5 }
 0x2da   : > { %6013 = vmatpush3.bf16.msra.mxu1 %v6731_v15  ;;  %6361 = vmatpush3.bf16.msra.mxu0 %v6730_v14  ;;  %v6745_v26 = vld [vmem:[#allocation8 + $0x148] sm:$0xff]   ;;  %v6748_v4 = vld [vmem:[#allocation8 + $0x140] sm:$0xff]   ;;  %v6756_v21 = vld [vmem:[#allocation8 + $0x238] sm:$0xff]   ;;  %s5179_s24 = sadd.s32 %s5688_s7, %s5659_s12 }
 0x2db   : > { %6014 = vmatprep.subr.bf16.mxu1 %v6732_v7  ;;  %6362 = vmatprep.subr.bf16.mxu0 %v6733_v63  ;;  %v6746_v38 = vld [vmem:[#allocation8 + $0xc8] sm:$0xff]   ;;  %v6749_v53 = vld [vmem:[#allocation8 + $0xc0] sm:$0xff]   ;;  %v6757_v17 = vld [vmem:[#allocation8 + $0x1b8] sm:$0xff]   ;;  %s5660_s15 = sshll.u32 %s5179_s24, 7 }
 0x2dc   : > { %v8245_v27 = vld [vmem:[#allocation2 + $0x1c] ss:$12 sps:$4 sm:$0xff]   ;;  %v6753_v60 = vld [vmem:[#allocation2 + $0x20] ss:$12 sps:$4 sm:$0xff]   ;;  %v8248_v28 = vld [vmem:[#allocation2 + $0x18] ss:$12 sps:$4 sm:$0xff]   ;;  %s8649_s17 = scalar_lea.hbm %s8896_s8, %s5660_s15 }
 0x2dd   : > { %3887 = vmatprep.mubr.bf16.mxu1 %v8245_v27  ;;  %6374 = vmatprep.mubr.bf16.mxu0 %v6753_v60  ;;  %v6754_v44 = vld [vmem:[#allocation2 + $0x38] ss:$12 sps:$4 sm:$0xff]   ;;  %v6758_v54 = vld [vmem:[#allocation8 + $0x230] sm:$0xff]   ;;  %v6765_v31 = vld [vmem:[#allocation8 + $0x228] sm:$0xff]  }
 0x2de   : > { %6015 = vmatpush3.bf16.msra.mxu1 %v6734_v59  ;;  %6363 = vmatpush3.bf16.msra.mxu0 %v6733_v63  ;;  %v8250_v49 = vld [vmem:[#allocation2 + $0x34] ss:$12 sps:$4 sm:$0xff]   ;;  %v6761_v47 = vld [vmem:[#allocation2 + $0x50] ss:$12 sps:$4 sm:$0xff]   ;;  %v8256_v29 = vld [vmem:[#allocation2 + $0x4c] ss:$12 sps:$4 sm:$0xff]  }
 0x2df   : > { %6016 = vmatprep.subr.bf16.mxu1 %v6735_v51  ;;  %6364 = vmatprep.subr.bf16.mxu0 %v6736_v8  ;;  %v6764_v37 = vld [vmem:[#allocation8 + $0x1f0] sm:$0xff]   ;;  %v6767_v32 = vld [vmem:[#allocation8 + $0x220] sm:$0xff]   ;;  %v6773_v58 = vld [vmem:[#allocation8 + $0x1e8] sm:$0xff]  }
 0x2e0   : > { %v6766_v56 = vld [vmem:[#allocation8 + $0x1b0] sm:$0xff]   ;;  %v6770_v45 = vld [vmem:[#allocation2 + $0x80] ss:$12 sps:$4 sm:$0xff]   ;;  %v6774_v13 = vld [vmem:[#allocation8 + $0x218] sm:$0xff]  }
 0x2e1   : > { %v8254_v2 = vld [vmem:[#allocation2 + $0x30] ss:$12 sps:$4 sm:$0xff]   ;;  %v6763_v1 = vld [vmem:[#allocation2 + $0x68] ss:$12 sps:$4 sm:$0xff]   ;;  %v6772_v41 = vld [vmem:[#allocation2 + $0x98] ss:$12 sps:$4 sm:$0xff]  }
 0x2e2   : > { %6017 = vmatpush3.bf16.msra.mxu1 %v6737_v0  ;;  %6365 = vmatpush3.bf16.msra.mxu0 %v6736_v8  ;;  %v6775_v33 = vld [vmem:[#allocation8 + $0x1a8] sm:$0xff]   ;;  %v6776_v46 = vld [vmem:[#allocation8 + $0x210] sm:$0xff]   ;;  %v6782_v50 = vld [vmem:[#allocation8 + $0x1e0] sm:$0xff]  }
 0x2e3   : > { %6018 = vmatprep.subr.bf16.mxu1 %v6738_v62  ;;  %6366 = vmatprep.subr.bf16.mxu0 %v6739_v20  ;;  %v8260_v11 = vld [vmem:[#allocation2 + $0x48] ss:$12 sps:$4 sm:$0xff]   ;;  %v8262_v9 = vld [vmem:[#allocation2 + $0x64] ss:$12 sps:$4 sm:$0xff]   ;;  %v8266_v12 = vld [vmem:[#allocation2 + $0x60] ss:$12 sps:$4 sm:$0xff]  }
 0x2e4   : > { %v6779_v19 = vld [vmem:[#allocation2 + $0xb0] ss:$12 sps:$4 sm:$0xff]   ;;  %v6784_v40 = vld [vmem:[#allocation8 + $0x1a0] sm:$0xff]   ;;  %v6783_v43 = vld [vmem:[#allocation8 + $0x208] sm:$0xff]  }
 0x2e5   : > { %v6781_v61 = vld [vmem:[#allocation2 + $0xc8] ss:$12 sps:$4 sm:$0xff]   ;;  %v6785_v42 = vld [vmem:[#allocation8 + $0x200] sm:$0xff]   ;;  %v6790_v25 = vld [vmem:[#allocation8 + $0x1d8] sm:$0xff]  }
 0x2e6   : > { %6019 = vmatpush3.bf16.msra.mxu1 %v6740_v48  ;;  %6367 = vmatpush3.bf16.msra.mxu0 %v6739_v20  ;;  %v8268_v36 = vld [vmem:[#allocation2 + $0x7c] ss:$12 sps:$4 sm:$0xff]   ;;  %v6788_v30 = vld [vmem:[#allocation2 + $0x38] ss:$12 sps:$4 sm:$0xff]   ;;  %v6795_v35 = vld [vmem:[#allocation8 + $0x70] sm:$0xff]  }
 0x2e7   : > { %6020 = vmatprep.subr.bf16.mxu1 %v6741_v34  ;;  %6368 = vmatprep.subr.bf16.mxu0 %v6742_v39  ;;  %v6793_v10 = vld [vmem:[#allocation8 + $0x198] sm:$0xff]   ;;  %v8274_v55 = vld [vmem:[#allocation2 + $0x94] ss:$12 sps:$4 sm:$0xff]   ;;  %v6803_v59 = vld [vmem:[#allocation8 + $0x68] sm:$0xff]  }
 0x2e8   : > { %v8272_v52 = vld [vmem:[#allocation2 + $0x78] ss:$12 sps:$4 sm:$0xff]   ;;  %v6791_v3 = vld [vmem:[#allocation2 + $0x50] ss:$12 sps:$4 sm:$0xff]   ;;  %v6799_v23 = vld [vmem:[#allocation2 + $0x68] ss:$12 sps:$4 sm:$0xff]  }
 0x2e9   : > { %v6792_v24 = vld [vmem:[#allocation8 + $0x78] sm:$0xff]   ;;  %v6801_v6 = vld [vmem:[#allocation8 + $0x1d0] sm:$0xff]   ;;  %v6802_v63 = vld [vmem:[#allocation2 + $0x80] ss:$12 sps:$4 sm:$0xff]  }
 0x2ea   : > { %6021 = vmatpush3.bf16.msra.mxu1 %v6743_v18  ;;  %6369 = vmatpush3.bf16.msra.mxu0 %v6742_v39  ;;  %v6794_v5 = vld [vmem:[#allocation8 + $0x38] sm:$0xff]   ;;  %v6796_v14 = vld [vmem:[#allocation8 + $0x30] sm:$0xff]   ;;  %v6805_v51 = vld [vmem:[#allocation8 + $0x28] sm:$0xff]  }
 0x2eb   : > { %6022 = vmatprep.subr.bf16.mxu1 %v6744_v16  ;;  %6370 = vmatprep.subr.bf16.mxu0 %v6745_v26  ;;  %v6804_v15 = vld [vmem:[#allocation8 + $0x190] sm:$0xff]   ;;  %v6806_v8 = vld [vmem:[#allocation8 + $0x60] sm:$0xff]   ;;  %v8280_v0 = vld [vmem:[#allocation2 + $0xac] ss:$12 sps:$4 sm:$0xff]  }
 0x2ec   : > { %v8278_v7 = vld [vmem:[#allocation2 + $0x90] ss:$12 sps:$4 sm:$0xff]   ;;  %v6810_v62 = vld [vmem:[#allocation2 + $0x98] ss:$12 sps:$4 sm:$0xff]   ;;  %v6812_v20 = vld [vmem:[#allocation8 + $0x1c8] sm:$0xff]  }
 0x2ed   : > { %v6807_v48 = vld [vmem:[#allocation8 + $0x20] sm:$0xff]   ;;  %v8284_v34 = vld [vmem:[#allocation2 + $0xa8] ss:$12 sps:$4 sm:$0xff]   ;;  %v6814_v39 = vld [vmem:[#allocation8 + $0x58] sm:$0xff]  }
 0x2ee   : > { %6023 = vmatpush3.bf16.msra.mxu1 %v6746_v38  ;;  %6371 = vmatpush3.bf16.msra.mxu0 %v6745_v26  ;;  %v6815_v18 = vld [vmem:[#allocation8 + $0x188] sm:$0xff]   ;;  %v6813_v16 = vld [vmem:[#allocation2 + $0xb0] ss:$12 sps:$4 sm:$0xff]  }
 0x2ef   : > { %6024 = vmatprep.subr.bf16.mxu1 %v6747_v57  ;;  %6372 = vmatprep.subr.bf16.mxu0 %v6748_v4  ;;  %v6816_v26 = vld [vmem:[#allocation8 + $0x18] sm:$0xff]   ;;  %v6817_v38 = vld [vmem:[#allocation8 + $0x50] sm:$0xff]  }
 0x2f0   : > { %v8286_v57 = vld [vmem:[#allocation2 + $0xc4] ss:$12 sps:$4 sm:$0xff]   ;;  %v6821_v60 = vld [vmem:[#allocation2 + $0xc8] ss:$12 sps:$4 sm:$0xff]  }
 0x2f2   : > { %6025 = vmatpush3.bf16.msra.mxu1 %v6749_v53  ;;  %6373 = vmatpush3.bf16.msra.mxu0 %v6748_v4  ;;  %v6818_v4 = vld [vmem:[#allocation8 + $0x10] sm:$0xff]   ;;  %v6823_v53 = vld [vmem:[#allocation8 + $0x1c0] sm:$0xff]  }
 0x2f3   : > { %6090 = vmatprep.subr.bf16.mxu1 %v6755_v22  ;;  %6390 = vmatprep.subr.bf16.mxu0 %v6756_v21  ;;  %v8290_v22 = vld [vmem:[#allocation2 + $0xc0] ss:$12 sps:$4 sm:$0xff]  }
 0x2f5   : > { %3888 = vmatmul.mubr.bf16.vlgmr.msra.gmra.mxu1 %v8248_v28  ;;  %6375 = vmatmul.mubr.bf16.vlgmr.msra.gmra.mxu0 %v6754_v44  ;;  %v6825_v44 = vld [vmem:[#allocation8 + $0x48] sm:$0xff]  }
 0x2f6   : > { %6091 = vmatpush3.bf16.msra.mxu1 %v6757_v17  ;;  %6391 = vmatpush3.bf16.msra.mxu0 %v6756_v21  ;;  %v6824_v21 = vld [vmem:[#allocation2 + $0xe0] ss:$12 sps:$4 sm:$0xff]  }
 0x2f7   : > { %6392 = vmatprep.subr.bf16.mxu0 %v6758_v54  ;;  %3895 = vmatprep.mubr.bf16.mxu1 %v8250_v49  ;;  %v6826_v17 = vld [vmem:[#allocation8 + $0x180] sm:$0xff]  }
 0x2f8   : > { %6378 = vmatprep.mubr.bf16.mxu0 %v6761_v47  ;;  %6092 = vmatprep.subr.bf16.mxu1 %v6764_v37  ;;  %v6828_v47 = vld [vmem:[#allocation8 + $0x40] sm:$0xff]  }
 0x2f9   : > { %v6829_v37 = vld [vmem:[#allocation8] sm:$0xff]  }
 0x2fa   : > { %6393 = vmatpush3.bf16.msra.mxu0 %v6758_v54  ;;  %6093 = vmatpush3.bf16.msra.mxu1 %v6766_v56  ;;  %v6827_v54 = vld [vmem:[#allocation8 + $0x8] sm:$0xff]   ;;  %v6833_v56 = vld [vmem:[#allocation8 + $0xb8] sm:$0xff]  }
 0x2fb   : > { %6394 = vmatprep.subr.bf16.mxu0 %v6765_v31  ;;  %6094 = vmatprep.subr.bf16.mxu1 %v6773_v58  ;;  %v6836_v58 = vld [vmem:[#allocation8 + $0xa0] sm:$0xff]  }
 0x2fd   : > { %3896 = vmatmul.mubr.bf16.gmra.mxu1 %v8254_v2  ;;  %6379 = vmatmul.mubr.bf16.gmra.mxu0 %v6763_v1  ;;  %v6830_v1 = vld [vmem:[#allocation2] ss:$12 sps:$4 sm:$0xff]  }
 0x2fe   : > { %6395 = vmatpush3.bf16.msra.mxu0 %v6765_v31  ;;  %3903 = vmatprep.mubr.bf16.mxu1 %v8256_v29  ;;  %v6832_v31 = vld [vmem:[#allocation2 + $0x4] ss:$12 sps:$4 sm:$0xff]  }
 0x2ff   : > { %6396 = vmatprep.subr.bf16.mxu0 %v6767_v32  ;;  %6382 = vmatprep.mubr.bf16.mxu0 %v6770_v45  ;;  %v6835_v45 = vld [vmem:[#allocation8 + $0xa8] sm:$0xff]  }
 0x300   : > { %6095 = vmatpush3.bf16.msra.mxu1 %v6775_v33  ;;  %v6837_v33 = vld [vmem:[#allocation8 + $0x98] sm:$0xff]  }
 0x301   : > { %6096 = vmatprep.subr.bf16.mxu1 %v6782_v50  ;;  %v6850_v50 = vld [vmem:[#allocation2 + $0x98] ss:$12 sps:$4 sm:$0xff]  }
 0x302   : > { %6397 = vmatpush3.bf16.msra.mxu0 %v6767_v32  ;;  %v6834_v32 = vld [vmem:[#allocation8 + $0xb0] sm:$0xff]  }
 0x303   : > { %6398 = vmatprep.subr.bf16.mxu0 %v6774_v13 }
 0x304   : > { %6097 = vmatpush3.bf16.msra.mxu1 %v6784_v40  ;;  %v6851_v40 = vld [vmem:[#allocation2 + $0xb0] ss:$12 sps:$4 sm:$0xff]  }
 0x305   : > { %3904 = vmatmul.mubr.bf16.gmra.mxu1 %v8260_v11  ;;  %6383 = vmatmul.mubr.bf16.gmra.mxu0 %v6772_v41  ;;  %v6846_v41 = vld [vmem:[#allocation2 + $0x38] ss:$12 sps:$4 sm:$0xff]  }
 0x306   : > { %6399 = vmatpush3.bf16.msra.mxu0 %v6774_v13  ;;  %3911 = vmatprep.mubr.bf16.mxu1 %v8262_v9  ;;  %v6838_v13 = vld [vmem:[#allocation8 + $0x90] sm:$0xff]  }
 0x307   : > { %6400 = vmatprep.subr.bf16.mxu0 %v6776_v46  ;;  %6386 = vmatprep.mubr.bf16.mxu0 %v6779_v19  ;;  %v6849_v19 = vld [vmem:[#allocation2 + $0x80] ss:$12 sps:$4 sm:$0xff]  }
 0x308   : > { %6098 = vmatprep.subr.bf16.mxu1 %v6790_v25 }
 0x309   : > { %6099 = vmatpush3.bf16.msra.mxu1 %v6793_v10 }
 0x30a   : > { %6401 = vmatpush3.bf16.msra.mxu0 %v6776_v46  ;;  %6100 = vmatprep.subr.bf16.mxu1 %v6801_v6  ;;  %v6847_v46 = vld [vmem:[#allocation2 + $0x50] ss:$12 sps:$4 sm:$0xff]  }
 0x30b   : > { %6402 = vmatprep.subr.bf16.mxu0 %v6783_v43 }
 0x30d   : > { %3912 = vmatmul.mubr.bf16.gmra.mxu1 %v8266_v12  ;;  %6387 = vmatmul.mubr.bf16.gmra.mxu0 %v6781_v61 }
 0x30e   : > { %6403 = vmatpush3.bf16.msra.mxu0 %v6783_v43  ;;  %3919 = vmatprep.mubr.bf16.mxu1 %v8268_v36 }
 0x30f   : > { %6404 = vmatprep.subr.bf16.mxu0 %v6785_v42  ;;  %6406 = vmatprep.mubr.bf16.mxu0 %v6788_v30 }
 0x310   : > { %6101 = vmatpush3.bf16.msra.mxu1 %v6804_v15 }
 0x311   : > { %6102 = vmatprep.subr.bf16.mxu1 %v6812_v20 }
 0x312   : > { %6405 = vmatpush3.bf16.msra.mxu0 %v6785_v42 }
 0x313   : > { %6170 = vmatprep.subr.bf16.mxu0 %v6792_v24 }
 0x314   : > { %6103 = vmatpush3.bf16.msra.mxu1 %v6815_v18 }
 0x315   : > { %3920 = vmatmul.mubr.bf16.gmra.mxu1 %v8272_v52  ;;  %6407 = vmatmul.mubr.bf16.vlgmr.msra.gmra.mxu0 %v6791_v3 }
 0x316   : > { %6171 = vmatpush3.bf16.msra.mxu0 %v6794_v5  ;;  %3927 = vmatprep.mubr.bf16.mxu1 %v8274_v55 }
 0x317   : > { %6172 = vmatprep.subr.bf16.mxu0 %v6795_v35  ;;  %6410 = vmatprep.mubr.bf16.mxu0 %v6799_v23 }
 0x318   : > { %6104 = vmatprep.subr.bf16.mxu1 %v6823_v53 }
 0x319   : > { %6105 = vmatpush3.bf16.msra.mxu1 %v6826_v17 }
 0x31a   : > { %6173 = vmatpush3.bf16.msra.mxu0 %v6796_v14  ;;  %6422 = vmatprep.subr.bf16.mxu1 %v6833_v56 }
 0x31b   : > { %6174 = vmatprep.subr.bf16.mxu0 %v6803_v59 }
 0x31d   : > { %3928 = vmatmul.mubr.bf16.gmra.mxu1 %v8278_v7  ;;  %6411 = vmatmul.mubr.bf16.gmra.mxu0 %v6802_v63 }
 0x31e   : > { %6175 = vmatpush3.bf16.msra.mxu0 %v6805_v51  ;;  %3935 = vmatprep.mubr.bf16.mxu1 %v8280_v0 }
 0x31f   : > { %6176 = vmatprep.subr.bf16.mxu0 %v6806_v8  ;;  %6414 = vmatprep.mubr.bf16.mxu0 %v6810_v62 }
 0x322   : > { %6177 = vmatpush3.bf16.msra.mxu0 %v6807_v48 }
 0x323   : > { %6178 = vmatprep.subr.bf16.mxu0 %v6814_v39 }
 0x325   : > { %3936 = vmatmul.mubr.bf16.gmra.mxu1 %v8284_v34  ;;  %6415 = vmatmul.mubr.bf16.gmra.mxu0 %v6813_v16 }
 0x326   : > { %6179 = vmatpush3.bf16.msra.mxu0 %v6816_v26  ;;  %3943 = vmatprep.mubr.bf16.mxu1 %v8286_v57 }
 0x327   : > { %6180 = vmatprep.subr.bf16.mxu0 %v6817_v38  ;;  %6418 = vmatprep.mubr.bf16.mxu0 %v6821_v60 }
 0x32a   : > { %6181 = vmatpush3.bf16.msra.mxu0 %v6818_v4 }
 0x32b   : > { %6182 = vmatprep.subr.bf16.mxu0 %v6825_v44 }
 0x32d   : > { %3944 = vmatmul.mubr.bf16.gmra.mxu1 %v8290_v22  ;;  %6419 = vmatmul.mubr.bf16.gmra.mxu0 %v6824_v21 }
 0x32e   : > { %6183 = vmatpush3.bf16.msra.mxu0 %v6827_v54  ;;  %4434 = vmatprep.mubr.bf16.mxu1 %v8250_v49 }
 0x32f   : > { %6184 = vmatprep.subr.bf16.mxu0 %v6828_v47  ;;  %4900 = vmatprep.mubr.bf16.mxu0 %v6832_v31 }
 0x332   : > { %6185 = vmatpush3.bf16.msra.mxu0 %v6829_v37 }
 0x335   : > { %4435 = vmatmul.mubr.bf16.vlgmr.msra.gmra.mxu1 %v8254_v2  ;;  %4901 = vmatmul.mubr.bf16.vlgmr.msra.gmra.mxu0 %v6830_v1 }
 0x336   : > { %6423 = vmatpush3.bf16.msra.mxu1 %v6833_v56  ;;  %4442 = vmatprep.mubr.bf16.mxu1 %v8256_v29 }
 0x337   : > { %4908 = vmatprep.mubr.bf16.mxu0 %v8245_v27  ;;  %6424 = vmatprep.subr.bf16.mxu1 %v6834_v32  ;;  %v6839_v27 = vld [vmem:[#allocation8 + $0x88] sm:$0xff]  }
 0x33a   : > { %6425 = vmatpush3.bf16.msra.mxu1 %v6834_v32 }
 0x33b   : > { %6426 = vmatprep.subr.bf16.mxu1 %v6835_v45 }
 0x33d   : > { %4443 = vmatmul.mubr.bf16.gmra.mxu1 %v8260_v11  ;;  %4909 = vmatmul.mubr.bf16.gmra.mxu0 %v8248_v28  ;;  %v6843_v28 = vld [vmem:[#allocation8 + $0x80] sm:$0xff]  }
 0x33e   : > { %4450 = vmatprep.mubr.bf16.mxu1 %v8262_v9  ;;  %4916 = vmatprep.mubr.bf16.mxu0 %v8250_v49  ;;  %v6840_v49 = vld [vmem:[#allocation2 + $0xdc] ss:$12 sps:$4 sm:$0xff]  }
 0x33f   : > { %6427 = vmatpush3.bf16.msra.mxu1 %v6835_v45 }
 0x340   : > { %6428 = vmatprep.subr.bf16.mxu1 %v6836_v58 }
 0x343   : > { %6429 = vmatpush3.bf16.msra.mxu1 %v6836_v58 }
 0x344   : > { %6430 = vmatprep.subr.bf16.mxu1 %v6837_v33 }
 0x345   : > { %4451 = vmatmul.mubr.bf16.gmra.mxu1 %v8266_v12  ;;  %4917 = vmatmul.mubr.bf16.gmra.mxu0 %v8254_v2  ;;  %v6842_v2 = vld [vmem:[#allocation2 + $0xd8] ss:$12 sps:$4 sm:$0xff]  }
 0x346   : > { %4458 = vmatprep.mubr.bf16.mxu1 %v8268_v36  ;;  %4924 = vmatprep.mubr.bf16.mxu0 %v8256_v29  ;;  %v6844_v29 = vld [vmem:[#allocation2 + $0x8] ss:$12 sps:$4 sm:$0xff]  }
 0x347   : > { %6431 = vmatpush3.bf16.msra.mxu1 %v6837_v33 }
 0x348   : > { %6432 = vmatprep.subr.bf16.mxu1 %v6838_v13 }
 0x34b   : > { %6433 = vmatpush3.bf16.msra.mxu1 %v6838_v13 }
 0x34c   : > { %6434 = vmatprep.subr.bf16.mxu1 %v6839_v27 }
 0x34d   : > { %4459 = vmatmul.mubr.bf16.gmra.mxu1 %v8272_v52  ;;  %4925 = vmatmul.mubr.bf16.gmra.mxu0 %v8260_v11  ;;  %v6845_v11 = vld [vmem:[#allocation2 + $0x20] ss:$12 sps:$4 sm:$0xff]  }
 0x34e   : > { %4466 = vmatprep.mubr.bf16.mxu1 %v8274_v55  ;;  %4932 = vmatprep.mubr.bf16.mxu0 %v8262_v9  ;;  %v6848_v9 = vld [vmem:[#allocation2 + $0x68] ss:$12 sps:$4 sm:$0xff]  }
 0x34f   : > { %6435 = vmatpush3.bf16.msra.mxu1 %v6839_v27 }
 0x350   : > { %6436 = vmatprep.subr.bf16.mxu1 %v6843_v28 }
 0x353   : > { %6437 = vmatpush3.bf16.msra.mxu1 %v6843_v28 }
 0x355   : > { %4467 = vmatmul.mubr.bf16.gmra.mxu1 %v8278_v7  ;;  %4933 = vmatmul.mubr.bf16.gmra.mxu0 %v8266_v12 }
 0x356   : > { %4474 = vmatprep.mubr.bf16.mxu1 %v8280_v0  ;;  %4940 = vmatprep.mubr.bf16.mxu0 %v8268_v36 }
 0x35d   : > { %4475 = vmatmul.mubr.bf16.gmra.mxu1 %v8284_v34  ;;  %4941 = vmatmul.mubr.bf16.gmra.mxu0 %v8272_v52 }
 0x35e   : > { %4482 = vmatprep.mubr.bf16.mxu1 %v8286_v57  ;;  %4948 = vmatprep.mubr.bf16.mxu0 %v8274_v55 }
 0x365   : > { %4483 = vmatmul.mubr.bf16.gmra.mxu1 %v8290_v22  ;;  %4949 = vmatmul.mubr.bf16.gmra.mxu0 %v8278_v7 }
 0x366   : > { %4490 = vmatprep.mubr.bf16.mxu1 %v6840_v49  ;;  %4956 = vmatprep.mubr.bf16.mxu0 %v8280_v0 }
 0x36d   : > { %4491 = vmatmul.mubr.bf16.gmra.mxu1 %v6842_v2  ;;  %4957 = vmatmul.mubr.bf16.gmra.mxu0 %v8284_v34 }
 0x36e   : > { %6438 = vmatprep.mubr.bf16.mxu1 %v6844_v29 }
 0x375   : > { %6439 = vmatmul.mubr.bf16.vlgmr.msra.gmra.mxu1 %v6845_v11 }
 0x376   : > { %6442 = vmatprep.mubr.bf16.mxu1 %v6846_v41 }
 0x37d   : > { %6443 = vmatmul.mubr.bf16.gmra.mxu1 %v6847_v46 }
 0x37e   : > { %6446 = vmatprep.mubr.bf16.mxu1 %v6848_v9 }
 0x385   : > { %6447 = vmatmul.mubr.bf16.gmra.mxu1 %v6849_v19 }
 0x386   : > { %6450 = vmatprep.mubr.bf16.mxu1 %v6850_v50 }
 0x38d   : > { %6451 = vmatmul.mubr.bf16.gmra.mxu1 %v6851_v40 }
 0x3b5   : > { %v6026_v12 = vpop.f32.mrf.mxu1  ;;  %v6376_v43 = vpop.f32.mrf.mxu0 }
 0x3b7   : > { %v6027_v61 = vpop.f32.mrf.mxu1  ;;  %v3986_v42 = vpop.f32.mrf.mxu0 }
 0x3b8   : > { %v6028_v36 = vadd.f32 %v6027_v61, %v6026_v12 }
 0x3b9   : > { %v6029_v25 = vpop.f32.mrf.mxu1  ;;  %v6377_v30 = vpop.f32.mrf.mxu0 }
 0x3ba   : > { %v8321_v10 = vadd.f32 %v6028_v36, %v3986_v42 }
 0x3bb   : > { %v6030_v52 = vpop.f32.mrf.mxu1  ;;  %v3989_v24 = vpop.f32.mrf.mxu0 }
 0x3bc   : > { %v6031_v3 = vadd.f32 %v6030_v52, %v6029_v25 }
 0x3bd   : > { %v6032_v5 = vpop.f32.mrf.mxu1  ;;  %v6380_v35 = vpop.f32.mrf.mxu0 }
 0x3be   : > { %v8323_v55 = vadd.f32 %v6031_v3, %v3989_v24 }
 0x3bf   : > { %v6033_v23 = vpop.f32.mrf.mxu1  ;;  %v4002_v6 = vpop.f32.mrf.mxu0 }
 0x3c0   : > { %v6034_v14 = vadd.f32 %v6033_v23, %v6032_v5 }
 0x3c1   : > { %v6035_v15 = vpop.f32.mrf.mxu1  ;;  %v6381_v7 = vpop.f32.mrf.mxu0 }
 0x3c2   : > { %v8325_v63 = vadd.f32 %v6376_v43, %v6034_v14 }
 0x3c3   : > { %v6036_v59 = vpop.f32.mrf.mxu1  ;;  %v4005_v51 = vpop.f32.mrf.mxu0 }
 0x3c4   : > { %v6037_v8 = vadd.f32 %v6036_v59, %v6035_v15 }
 0x3c5   : > { %v6038_v0 = vpop.f32.mrf.mxu1  ;;  %v6384_v62 = vpop.f32.mrf.mxu0 }
 0x3c6   : > { %v8327_v20 = vadd.f32 %v6377_v30, %v6037_v8 }
 0x3c7   : > { %v6039_v48 = vpop.f32.mrf.mxu1  ;;  %v4018_v34 = vpop.f32.mrf.mxu0 }
 0x3c8   : > { %v6040_v39 = vadd.f32 %v6039_v48, %v6038_v0 }
 0x3c9   : > { %v6041_v18 = vpop.f32.mrf.mxu1  ;;  %v6385_v16 = vpop.f32.mrf.mxu0 }
 0x3ca   : > { %v8329_v26 = vadd.f32 %v6040_v39, %v4002_v6 }
 0x3cb   : > { %v6042_v38 = vpop.f32.mrf.mxu1  ;;  %v4021_v57 = vpop.f32.mrf.mxu0 }
 0x3cc   : > { %v6043_v4 = vadd.f32 %v6042_v38, %v6041_v18 }
 0x3cd   : > { %v6044_v60 = vpop.f32.mrf.mxu1  ;;  %v6388_v53 = vpop.f32.mrf.mxu0 }
 0x3ce   : > { %v8331_v22 = vadd.f32 %v6043_v4, %v4005_v51 }
 0x3cf   : > { %v6045_v21 = vpop.f32.mrf.mxu1  ;;  %v4034_v44 = vpop.f32.mrf.mxu0 }
 0x3d0   : > { %v6046_v17 = vadd.f32 %v6045_v21, %v6044_v60 }
 0x3d1   : > { %v6047_v54 = vpop.f32.mrf.mxu1  ;;  %v6389_v47 = vpop.f32.mrf.mxu0 }
 0x3d2   : > { %v8333_v37 = vadd.f32 %v6380_v35, %v6046_v17 }
 0x3d3   : > { %v6048_v31 = vpop.f32.mrf.mxu1  ;;  %v4037_v56 = vpop.f32.mrf.mxu0 }
 0x3d4   : > { %v6049_v1 = vadd.f32 %v6048_v31, %v6047_v54 }
 0x3d5   : > { %v6050_v32 = vpop.f32.mrf.mxu1  ;;  %v8335_v45 = vpop.f32.mrf.mxu0 }
 0x3d6   : > { %v8337_v58 = vadd.f32 %v6381_v7, %v6049_v1 }
 0x3d7   : > { %v6051_v33 = vpop.f32.mrf.mxu1  ;;  %v4533_v13 = vpop.f32.mrf.mxu0 }
 0x3d8   : > { %v6052_v27 = vadd.f32 %v6051_v33, %v6050_v32 }
 0x3d9   : > { %v6053_v28 = vpop.f32.mrf.mxu1  ;;  %v8339_v49 = vpop.f32.mrf.mxu0 }
 0x3da   : > { %v8341_v2 = vadd.f32 %v6052_v27, %v4018_v34 }
 0x3db   : > { %v6054_v29 = vpop.f32.mrf.mxu1  ;;  %v4536_v11 = vpop.f32.mrf.mxu0 }
 0x3dc   : > { %8818 = vst [vmem:[#allocation19_spill] sm:$0xff] %v8341_v2  ;;  %v6055_v41 = vadd.f32 %v6054_v29, %v6053_v28 }
 0x3dd   : > { %v6056_v46 = vpop.f32.mrf.mxu1  ;;  %v8343_v9 = vpop.f32.mrf.mxu0 }
 0x3de   : > { %v8345_v19 = vadd.f32 %v6055_v41, %v4021_v57 }
 0x3df   : > { %v6057_v50 = vpop.f32.mrf.mxu1  ;;  %v8347_v40 = vpop.f32.mrf.mxu0 }
 0x3e0   : > { %8819 = vst [vmem:[#allocation20_spill] sm:$0xff] %v8345_v19  ;;  %v6058_v12 = vadd.f32 %v6057_v50, %v6056_v46 }
 0x3e1   : > { %v6059_v43 = vpop.f32.mrf.mxu1  ;;  %v8349_v61 = vpop.f32.mrf.mxu0 }
 0x3e2   : > { %v8351_v42 = vadd.f32 %v6384_v62, %v6058_v12 }
 0x3e3   : > { %v6060_v36 = vpop.f32.mrf.mxu1  ;;  %v8353_v25 = vpop.f32.mrf.mxu0 }
 0x3e4   : > { %8820 = vst [vmem:[#allocation24_spill] sm:$0xff] %v8351_v42  ;;  %v6061_v30 = vadd.f32 %v6060_v36, %v6059_v43 }
 0x3e5   : > { %v6062_v52 = vpop.f32.mrf.mxu1  ;;  %v8355_v24 = vpop.f32.mrf.mxu0 }
 0x3e6   : > { %8821 = vst [vmem:[#allocation22_spill] sm:$0xff] %v8355_v24  ;;  %v8357_v3 = vadd.f32 %v6385_v16, %v6061_v30 }
 0x3e7   : > { %v6063_v5 = vpop.f32.mrf.mxu1  ;;  %v8359_v35 = vpop.f32.mrf.mxu0 }
 0x3e8   : > { %8822 = vst [vmem:[#allocation21_spill] sm:$0xff] %v8357_v3  ;;  %8823 = vst [vmem:[#allocation23_spill] sm:$0xff] %v8359_v35  ;;  %v6064_v23 = vadd.f32 %v6063_v5, %v6062_v52 }
 0x3e9   : > { %v6065_v6 = vpop.f32.mrf.mxu1  ;;  %v8361_v14 = vpop.f32.mrf.mxu0 }
 0x3ea   : > { %8824 = vst [vmem:[#allocation25_spill] sm:$0xff] %v8361_v14  ;;  %v8363_v15 = vadd.f32 %v6064_v23, %v4034_v44 }
 0x3eb   : > { %v6066_v7 = vpop.f32.mrf.mxu1  ;;  %v8365_v59 = vpop.f32.mrf.mxu0 }
 0x3ec   : > { %8825 = vst [vmem:[#allocation26_spill] sm:$0xff] %v8363_v15  ;;  %8826 = vst [vmem:[#allocation27_spill] sm:$0xff] %v8365_v59  ;;  %v6067_v51 = vadd.f32 %v6066_v7, %v6065_v6 }
 0x3ed   : > { %v6068_v8 = vpop.f32.mrf.mxu1  ;;  %v8367_v0 = vpop.f32.mrf.mxu0 }
 0x3ee   : > { %8827 = vst [vmem:[#allocation28_spill] sm:$0xff] %v8367_v0  ;;  %v8369_v62 = vadd.f32 %v6067_v51, %v4037_v56 }
 0x3ef   : > { %v6069_v48 = vpop.f32.mrf.mxu1  ;;  %v8371_v34 = vpop.f32.mrf.mxu0 }
 0x3f0   : > { %8828 = vst [vmem:[#allocation29_spill] sm:$0xff] %v8369_v62  ;;  %8829 = vst [vmem:[#allocation30_spill] sm:$0xff] %v8371_v34  ;;  %v6070_v39 = vadd.f32 %v6069_v48, %v6068_v8 }
 0x3f1   : > { %v6071_v18 = vpop.f32.mrf.mxu1  ;;  %v8373_v16 = vpop.f32.mrf.mxu0 }
 0x3f2   : > { %8830 = vst [vmem:[#allocation31_spill] sm:$0xff] %v8373_v16  ;;  %v8375_v38 = vadd.f32 %v6388_v53, %v6070_v39 }
 0x3f3   : > { %v6072_v57 = vpop.f32.mrf.mxu1  ;;  %v8377_v4 = vpop.f32.mrf.mxu0 }
 0x3f4   : > { %8831 = vst [vmem:[#allocation32_spill] sm:$0xff] %v8375_v38  ;;  %8832 = vst [vmem:[#allocation33_spill] sm:$0xff] %v8377_v4  ;;  %v6073_v60 = vadd.f32 %v6072_v57, %v6071_v18 }
 0x3f5   : > { %v6106_v21 = vpop.f32.mrf.mxu1  ;;  %v8379_v44 = vpop.f32.mrf.mxu0 }
 0x3f6   : > { %v8381_v17 = vadd.f32 %v6389_v47, %v6073_v60 }
 0x3f7   : > { %v6107_v54 = vpop.f32.mrf.mxu1  ;;  %v6187_v31 = vpop.f32.mrf.mxu0 }
 0x3f8   : > { %8833 = vst [vmem:[#allocation34_spill] sm:$0xff] %v8381_v17  ;;  %v6108_v56 = vadd.f32 %v6107_v54, %v6106_v21 }
 0x3f9   : > { %v6109_v1 = vpop.f32.mrf.mxu1  ;;  %v8383_v32 = vpop.f32.mrf.mxu0 }
 0x3fa   : > { %v8385_v33 = vadd.f32 %v6108_v56, %v4533_v13 }
 0x3fb   : > { %v6110_v27 = vpop.f32.mrf.mxu1  ;;  %v8387_v53 = vpop.f32.mrf.mxu0 }
 0x3fc   : > { %v6111_v28 = vadd.f32 %v6110_v27, %v6109_v1 }
 0x3fd   : > { %v6112_v29 = vpop.f32.mrf.mxu1  ;;  %v6192_v41 = vpop.f32.mrf.mxu0 }
 0x3fe   : > { %v8389_v46 = vadd.f32 %v6111_v28, %v4536_v11 }
 0x3ff   : > { %v6113_v50 = vpop.f32.mrf.mxu1  ;;  %v6193_v12 = vpop.f32.mrf.mxu0 }
 0x401   : > { %v8391_v47 = vpop.f32.mrf.mxu1  ;;  %v6195_v43 = vpop.f32.mrf.mxu0 }
 0x403   : > { %v8393_v36 = vpop.f32.mrf.mxu1  ;;  %v6196_v30 = vpop.f32.mrf.mxu0 }
 0x405   : > { %v8395_v52 = vpop.f32.mrf.mxu1  ;;  %v8397_v13 = vpop.f32.mrf.mxu0 }
 0x407   : > { %v8399_v5 = vpop.f32.mrf.mxu1  ;;  %v8401_v23 = vpop.f32.mrf.mxu0 }
 0x409   : > { %v8403_v6 = vpop.f32.mrf.mxu1  ;;  %v8405_v11 = vpop.f32.mrf.mxu0 }
 0x40b   : > { %v8407_v7 = vpop.f32.mrf.mxu1  ;;  %v8409_v51 = vpop.f32.mrf.mxu0 }
 0x40d   : > { %v8411_v8 = vpop.f32.mrf.mxu1  ;;  %v6204_v48 = vpop.f32.mrf.mxu0 }
 0x40f   : > { %v8413_v39 = vpop.f32.mrf.mxu1  ;;  %v6205_v18 = vpop.f32.mrf.mxu0 }
 0x411   : > { %v8415_v57 = vpop.f32.mrf.mxu1  ;;  %v8417_v60 = vpop.f32.mrf.mxu0 }
 0x413   : > { %v8419_v21 = vpop.f32.mrf.mxu1  ;;  %v8421_v54 = vpop.f32.mrf.mxu0 }
 0x415   : > { %v8423_v56 = vpop.f32.mrf.mxu1  ;;  %v8425_v1 = vpop.f32.mrf.mxu0 }
 0x417   : > { %v8427_v27 = vpop.f32.mrf.mxu1  ;;  %v8429_v28 = vpop.f32.mrf.mxu0 }
 0x418   : > { %8834 = vst [vmem:[#allocation35_spill] sm:$0xff] %v8427_v27  ;;  %v6206_v27 = vadd.f32 %v6205_v18, %v6204_v48 }
 0x419   : > { %v8431_v4 = vpop.f32.mrf.mxu1  ;;  %v8433_v62 = vpop.f32.mrf.mxu0 }
 0x41a   : > { %8835 = vst [vmem:[#allocation36_spill] sm:$0xff] %v8431_v4  ;;  %8836 = vst [vmem:[#allocation37_spill] sm:$0xff] %v8433_v62 }
 0x41b   : > { %v8435_v16 = vpop.f32.mrf.mxu1  ;;  %v8437_v17 = vpop.f32.mrf.mxu0 }
 0x41c   : > { %8837 = vst [vmem:[#allocation38_spill] sm:$0xff] %v8435_v16  ;;  %8838 = vst [vmem:[#allocation39_spill] sm:$0xff] %v8437_v17 }
 0x41d   : > { %v8439_v34 = vpop.f32.mrf.mxu1  ;;  %v8441_v15 = vpop.f32.mrf.mxu0 }
 0x41f   : > { %v8443_v0 = vpop.f32.mrf.mxu1  ;;  %v8445_v38 = vpop.f32.mrf.mxu0 }
 0x421   : > { %v8447_v59 = vpop.f32.mrf.mxu1  ;;  %v8451_v14 = vpop.f32.mrf.mxu0 }
 0x422   : > { %8839 = vst [vmem:[#allocation40_spill] sm:$0xff] %v8447_v59  ;;  %8841 = vst [vmem:[#allocation42_spill] sm:$0xff] %v8451_v14 }
 0x423   : > { %v8449_v19 = vpop.f32.mrf.mxu1  ;;  %v8457_v4 = vpop.f32.mrf.mxu0 }
 0x424   : > { %8840 = vst [vmem:[#allocation41_spill] sm:$0xff] %v8449_v19  ;;  %8844 = vst [vmem:[#allocation45_spill] sm:$0xff] %v8457_v4  ;;  %v6194_v19 = vadd.f32 %v6193_v12, %v6192_v41  ;;  %v6114_v4 = vadd.f32 %v6113_v50, %v6112_v29  ;;  %v6197_v12 = vadd.f32 %v6196_v30, %v6195_v43  ;;  %v8503_v30 = vld [vmem:[%s7338_s1 + $0x20] sm:$0xff]  }
 0x425   : > { %v8453_v3 = vpop.f32.mrf.mxu1  ;;  %v8463_v24 = vpop.f32.mrf.mxu0 }
 0x426   : > { %8842 = vst [vmem:[#allocation43_spill] sm:$0xff] %v8453_v3  ;;  %8847 = vst [vmem:[#allocation48_spill] sm:$0xff] %v8463_v24  ;;  %v8472_v3 = vld [vmem:[%s7338_s1 + $0x8] sm:$0xff]   ;;  %v8484_v24 = vld [vmem:[%s7338_s1 + $0x10] sm:$0xff]  }
 0x427   : > { %v8455_v16 = vpop.f32.mrf.mxu1  ;;  %v8469_v62 = vpop.f32.mrf.mxu0  ;;  %v5695_v41 = vunpack.c.l.bf16 %v8472_v3  ;;  %v5696_v14 = vunpack.c.h.bf16 %v8472_v3  ;;  %v5700_v43 = vunpack.c.h.bf16 %v8484_v24 }
 0x428   : > { %8843 = vst [vmem:[#allocation44_spill] sm:$0xff] %v8455_v16  ;;  %8850 = vst [vmem:[#allocation51_spill] sm:$0xff] %v8469_v62  ;;  %v8477_v16 = vld [vmem:[%s7338_s1] sm:$0xff]   ;;  %v4911_v62 = vadd.f32 %v6194_v19, %v8325_v63  ;;  %v4542_v63 = vadd.f32 %v8335_v45, %v6114_v4  ;;  %v6117_v19 = vadd.f32 %v8393_v36, %v8391_v47 }
 0x429   : > { %v8459_v35 = vpop.f32.mrf.mxu1  ;;  %v6126_v36 = vadd.f32 %v8413_v39, %v8411_v8  ;;  %v4927_v8 = vadd.f32 %v6206_v27, %v8333_v37 }
 0x42a   : > { %8845 = vst [vmem:[#allocation46_spill] sm:$0xff] %v8459_v35  ;;  %v6188_v35 = vadd.f32 %v6187_v31, %v8379_v44  ;;  %v8495_v44 = vld [vmem:[%s7338_s1 + $0x28] sm:$0xff]   ;;  %v6191_v31 = vadd.f32 %v8387_v53, %v8383_v32  ;;  %v8512_v32 = vld [vmem:[%s8721_s4] ss:$0 sm:$0xff]  ;;  %v4545_v50 = vadd.f32 %v8339_v49, %v6117_v19 }
 0x42b   : > { %v8461_v2 = vpop.f32.mrf.mxu1 }
 0x42c   : > { %8846 = vst [vmem:[#allocation47_spill] sm:$0xff] %v8461_v2  ;;  %v8481_v2 = vld [vmem:[%s7338_s1 + $0x18] sm:$0xff]   ;;  %v4906_v18 = vadd.f32 %v6191_v31, %v8323_v55  ;;  %v5708_v55 = vunpack.c.h.bf16 %v8503_v30 }
 0x42d   : > { %v8465_v17 = vpop.f32.mrf.mxu1 }
 0x42e   : > { %8848 = vst [vmem:[#allocation49_spill] sm:$0xff] %v8465_v17 }
 0x42f   : > { %v8467_v59 = vpop.f32.mrf.mxu1 }
 0x430   : > { %8849 = vst [vmem:[#allocation50_spill] sm:$0xff] %v8467_v59  ;;  %v8489_v59 = vpop.f32.mrf.mxu0 }
 0x431   : > { %v8474_v42 = vpop.f32.mrf.mxu1  ;;  %8853 = vst [vmem:[#allocation54_spill] sm:$0xff] %v8489_v59  ;;  %v4903_v59 = vadd.f32 %v6188_v35, %v8321_v10  ;;  %v5707_v10 = vunpack.c.l.bf16 %v8503_v30  ;;  %v6200_v35 = vadd.f32 %v8401_v23, %v8397_v13  ;;  %v6209_v13 = vadd.f32 %v8421_v54, %v8417_v60 }
 0x432   : > { %8851 = vst [vmem:[#allocation52_spill] sm:$0xff] %v8474_v42  ;;  %v5691_v42 = vunpack.c.l.bf16 %v8477_v16  ;;  %v8517_v45 = vpop.f32.mrf.mxu0 }
 0x433   : > { %v8486_v17 = vpop.f32.mrf.mxu1  ;;  %v4919_v37 = vadd.f32 %v6200_v35, %v8329_v26 }
 0x434   : > { %8852 = vst [vmem:[#allocation53_spill] sm:$0xff] %v8486_v17  ;;  %v5704_v17 = vunpack.c.h.bf16 %v8481_v2  ;;  %v6228_v39 = vpop.f32.mrf.mxu0 }
 0x435   : > { %v6440_v29 = vpop.f32.mrf.mxu1 }
 0x436   : > { %v5008_v3 = vadd.f32 %v6440_v29, %v4911_v62  ;;  %v4914_v62 = vadd.f32 %v6197_v12, %v8327_v20  ;;  %v5712_v29 = vunpack.c.h.bf16 %v8495_v44  ;;  %v6120_v12 = vadd.f32 %v8399_v5, %v8395_v52  ;;  %v6229_v26 = vpop.f32.mrf.mxu0 }
 0x437   : > { %v4999_v53 = vpop.f32.mrf.mxu1  ;;  %v4558_v52 = vadd.f32 %v8343_v9, %v6126_v36  ;;  %v6129_v5 = vadd.f32 %v8419_v21, %v8415_v57  ;;  %v6218_v9 = vadd.f32 %v8445_v38, %v8441_v15  ;;  %v4930_v57 = vadd.f32 %v6209_v13, %v8337_v58  ;;  %v8855_v36 = vld [vmem:[#allocation35_spill] sm:$0xff] }
 0x438   : > { %v5064_v4 = vadd.f32 %v5008_v3, %v4542_v63  ;;  %v5000_v47 = vadd.f32 %v4999_v53, %v4903_v59  ;;  %v4550_v53 = vadd.f32 %v6120_v12, %v8347_v40  ;;  %v6212_v40 = vadd.f32 %v8429_v28, %v8425_v1  ;;  %v8856_v28 = vld [vmem:[#allocation42_spill] sm:$0xff] }
 0x439   : > { %v6441_v48 = vpop.f32.mrf.mxu1  ;;  %v8854_v58 = vunpack.c.h.bf16 %v8477_v16  ;;  %v6132_v1 = vadd.f32 %v8855_v36, %v8423_v56  ;;  %v8859_v16 = vunpack.c.l.bf16 %v8481_v2  ;;  %v8876_v36 = vld [vmem:[#allocation20_spill] sm:$0xff] }
 0x43a   : > { %v5087_v63 = vadd.f32 %v8512_v32, %v5064_v4  ;;  %v5062_v59 = vadd.f32 %v5000_v47, %v8385_v33  ;;  %v5011_v20 = vadd.f32 %v6441_v48, %v4914_v62  ;;  %v6203_v33 = vadd.f32 %v8409_v51, %v8405_v11  ;;  %v8857_v48 = vld [vmem:[#allocation45_spill] sm:$0xff] }
 0x43b   : > { %v5002_v23 = vpop.f32.mrf.mxu1  ;;  %v6123_v11 = vadd.f32 %v8407_v7, %v8403_v6  ;;  %v4561_v47 = vadd.f32 %v8349_v61, %v6129_v5  ;;  %v6138_v6 = vadd.f32 %v8443_v0, %v8439_v34  ;;  %v6221_v0 = vadd.f32 %v8857_v48, %v8856_v28 }
 0x43c   : > { %v5135_v31 = vadd.f32 %v5695_v41, %v5087_v63  ;;  %v5085_v49 = vadd.f32 %v8512_v32, %v5062_v59  ;;  %v5065_v19 = vadd.f32 %v5011_v20, %v4545_v50  ;;  %v5003_v3 = vadd.f32 %v5002_v23, %v4906_v18  ;;  %v8858_v18 = vld [vmem:[#allocation24_spill] sm:$0xff]  ;;  %v6231_v63 = vpop.f32.mrf.mxu0  ;;  %v8861_v23 = vld [vmem:[#allocation39_spill] sm:$0xff] }
 0x43d   : > { %v6444_v60 = vpop.f32.mrf.mxu1  ;;  %v4922_v38 = vadd.f32 %v6203_v33, %v8331_v22  ;;  %v4553_v61 = vadd.f32 %v6123_v11, %v8353_v25  ;;  %v4943_v22 = vadd.f32 %v6218_v9, %v8858_v18  ;;  %v8860_v25 = vld [vmem:[#allocation37_spill] sm:$0xff]  ;;  %v8868_v11 = vld [vmem:[#allocation36_spill] sm:$0xff]  ;;  %v8869_v9 = vld [vmem:[#allocation38_spill] sm:$0xff] }
 0x43e   : > { %5151 = vst [vmem:[%s7286_s11 + $0x10] sm:$0xff] %v5135_v31  ;;  %v5133_v54 = vadd.f32 %v5691_v42, %v5085_v49  ;;  %v5088_v27 = vadd.f32 %v8512_v32, %v5065_v19  ;;  %v5063_v41 = vadd.f32 %v5003_v3, %v8389_v46  ;;  %v5024_v50 = vadd.f32 %v6444_v60, %v4927_v8  ;;  %v8862_v31 = vld [vmem:[#allocation22_spill] sm:$0xff]  ;;  %v8863_v49 = vld [vmem:[#allocation40_spill] sm:$0xff]  ;;  %v8864_v19 = vld [vmem:[#allocation41_spill] sm:$0xff] }
 0x43f   : > { %v5015_v51 = vpop.f32.mrf.mxu1  ;;  %v6215_v8 = vadd.f32 %v8861_v23, %v8860_v25  ;;  %v4574_v56 = vadd.f32 %v8862_v31, %v6138_v6  ;;  %v6141_v3 = vadd.f32 %v8864_v19, %v8863_v49  ;;  %v8866_v60 = vunpack.c.l.bf16 %v8484_v24  ;;  %v8878_v18 = vld [vmem:[#allocation43_spill] sm:$0xff]  ;;  %v5727_v31 = vld [vmem:[%s7338_s1 + $0x38] sm:$0xff]   ;;  %v8883_v19 = vld [vmem:[#allocation28_spill] sm:$0xff] }
 0x440   : > { %5149 = vst [vmem:[%s7286_s11] sm:$0xff] %v5133_v54  ;;  %v5136_v42 = vadd.f32 %v5696_v14, %v5088_v27  ;;  %v5086_v21 = vadd.f32 %v8512_v32, %v5063_v41  ;;  %v5068_v4 = vadd.f32 %v5024_v50, %v4558_v52  ;;  %v5016_v46 = vadd.f32 %v5015_v51, %v4919_v37  ;;  %v8865_v52 = vld [vmem:[#allocation19_spill] sm:$0xff] }
 0x441   : > { %v6445_v15 = vpop.f32.mrf.mxu1  ;;  %v4935_v5 = vadd.f32 %v6212_v40, %v8865_v52  ;;  %v8867_v50 = vld [vmem:[#allocation23_spill] sm:$0xff]  ;;  %v6135_v51 = vadd.f32 %v8869_v9, %v8868_v11  ;;  %v8881_v25 = vunpack.c.l.bf16 %v8495_v44  ;;  %v8889_v9 = vld [vmem:[#allocation46_spill] sm:$0xff] }
 0x442   : > { %5152 = vst [vmem:[%s7286_s11 + $0x18] sm:$0xff] %v5136_v42  ;;  %v5134_v14 = vadd.f32 %v8854_v58, %v5086_v21  ;;  %v5091_v7 = vadd.f32 %v8512_v32, %v5068_v4  ;;  %v5066_v62 = vadd.f32 %v5016_v46, %v4550_v53  ;;  %v5027_v35 = vadd.f32 %v6445_v15, %v4930_v57  ;;  %v8870_v21 = vld [vmem:[#allocation21_spill] sm:$0xff]  ;;  %v6232_v46 = vpop.f32.mrf.mxu0 }
 0x443   : > { %v5018_v34 = vpop.f32.mrf.mxu1  ;;  %v4566_v53 = vadd.f32 %v6132_v1, %v8867_v50  ;;  %v6230_v57 = vadd.f32 %v6229_v26, %v6228_v39  ;;  %v4946_v4 = vadd.f32 %v6221_v0, %v8870_v21  ;;  %v8875_v39 = vld [vmem:[#allocation50_spill] sm:$0xff]  ;;  %v4938_v1 = vadd.f32 %v6215_v8, %v8876_v36  ;;  %v8877_v0 = vld [vmem:[#allocation27_spill] sm:$0xff] }
 0x444   : > { %5150 = vst [vmem:[%s7286_s11 + $0x8] sm:$0xff] %v5134_v14  ;;  %v5139_v59 = vadd.f32 %v8859_v16, %v5091_v7  ;;  %v5089_v20 = vadd.f32 %v8512_v32, %v5066_v62  ;;  %v5069_v12 = vadd.f32 %v5027_v35, %v4561_v47  ;;  %v5019_v13 = vadd.f32 %v5018_v34, %v4922_v38  ;;  %v8871_v38 = vld [vmem:[#allocation25_spill] sm:$0xff]  ;;  %v8872_v14 = vld [vmem:[#allocation48_spill] sm:$0xff]  ;;  %v8873_v7 = vld [vmem:[#allocation51_spill] sm:$0xff] }
 0x445   : > { %v6448_v33 = vpop.f32.mrf.mxu1  ;;  %v4577_v58 = vadd.f32 %v8871_v38, %v6141_v3  ;;  %v6224_v62 = vadd.f32 %v8873_v7, %v8872_v14  ;;  %v8874_v35 = vld [vmem:[#allocation49_spill] sm:$0xff]  ;;  %v4569_v34 = vadd.f32 %v6135_v51, %v8877_v0  ;;  %v8890_v51 = vld [vmem:[#allocation47_spill] sm:$0xff]  ;;  %v5720_v36 = vunpack.c.h.bf16 %v5727_v31 }
 0x446   : > { %5155 = vst [vmem:[%s7286_s11 + $0x30] sm:$0xff] %v5139_v59  ;;  %v5137_v37 = vadd.f32 %v8866_v60, %v5089_v20  ;;  %v5092_v54 = vadd.f32 %v8512_v32, %v5069_v12  ;;  %v5067_v27 = vadd.f32 %v5019_v13, %v4553_v61  ;;  %v5040_v41 = vadd.f32 %v6448_v33, %v4943_v22  ;;  %v8879_v22 = vld [vmem:[#allocation44_spill] sm:$0xff]  ;;  %v8885_v33 = vld [vmem:[#allocation53_spill] sm:$0xff]  ;;  %v8886_v60 = vld [vmem:[#allocation26_spill] sm:$0xff] }
 0x447   : > { %v5031_v42 = vpop.f32.mrf.mxu1  ;;  %v6150_v26 = vadd.f32 %v8875_v39, %v8874_v35  ;;  %v6144_v16 = vadd.f32 %v8879_v22, %v8878_v18  ;;  %v6233_v59 = vadd.f32 %v6232_v46, %v6231_v63  ;;  %v8880_v12 = vld [vmem:[#allocation32_spill] sm:$0xff]  ;;  %v8893_v7 = vld [vmem:[#allocation29_spill] sm:$0xff] }
 0x448   : > { %5153 = vst [vmem:[%s7286_s11 + $0x20] sm:$0xff] %v5137_v37  ;;  %v5140_v47 = vadd.f32 %v5704_v17, %v5092_v54  ;;  %v5090_v40 = vadd.f32 %v8512_v32, %v5067_v27  ;;  %v5072_v6 = vadd.f32 %v5040_v41, %v4574_v56  ;;  %v5032_v15 = vadd.f32 %v5031_v42, %v4935_v5  ;;  %v8882_v56 = vld [vmem:[#allocation54_spill] sm:$0xff]  ;;  %v8884_v63 = vld [vmem:[#allocation52_spill] sm:$0xff] }
 0x449   : > { %v6449_v61 = vpop.f32.mrf.mxu1  ;;  %v4959_v13 = vadd.f32 %v6230_v57, %v8880_v12  ;;  %v6227_v49 = vadd.f32 %v8517_v45, %v8882_v56  ;;  %v4590_v3 = vadd.f32 %v8883_v19, %v6150_v26  ;;  %v6153_v52 = vadd.f32 %v8885_v33, %v8884_v63  ;;  %v5726_v45 = vld [vmem:[%s7338_s1 + $0x30] sm:$0xff]   ;;  %s6932_s1 = scalar_lea.vmem %s8651_s9, 2048 }
 0x44a   : > { %5156 = vst [vmem:[%s7286_s11 + $0x38] sm:$0xff] %v5140_v47  ;;  %v5138_v2 = vadd.f32 %v5700_v43, %v5090_v40  ;;  %v5095_v17 = vadd.f32 %v8512_v32, %v5072_v6  ;;  %v5070_v28 = vadd.f32 %v5032_v15, %v4566_v53  ;;  %v5043_v48 = vadd.f32 %v6449_v61, %v4946_v4  ;;  %v8888_v53 = vld [vmem:[#allocation30_spill] sm:$0xff]  ;;  %v8892_v15 = vld [vmem:[#allocation31_spill] sm:$0xff]  ;;  %v8894_v26 = vld [vmem:[#allocation33_spill] sm:$0xff]  ;;  %p6933_p5 = scmp.ne.s32.totalorder %s8651_s9, %s6932_s1  ;;  %p6940_p4 = scmp.lt.s32.totalorder %s6938_s13, %s6932_s1 }
 0x44b   : > { %v5034_v20 = vpop.f32.mrf.mxu1  ;;  %v4951_v37 = vadd.f32 %v6224_v62, %v8886_v60  ;;  %v4582_v11 = vadd.f32 %v6144_v16, %v8888_v53  ;;  %v6147_v57 = vadd.f32 %v8890_v51, %v8889_v9  ;;  %v5719_v42 = vunpack.c.l.bf16 %v5727_v31  ;;  %v8891_v4 = vld [vmem:[#allocation34_spill] sm:$0xff] }
 0x44c   : > { %5154 = vst [vmem:[%s7286_s11 + $0x28] sm:$0xff] %v5138_v2  ;;  %v5143_v24 = vadd.f32 %v8881_v25, %v5095_v17  ;;  %v5093_v43 = vadd.f32 %v8512_v32, %v5070_v28  ;;  %v5073_v23 = vadd.f32 %v5043_v48, %v4577_v58  ;;  %v5035_v8 = vadd.f32 %v5034_v20, %v4938_v1  ;;  %p6934_p12 = pnand %p6933_p5, %p7174_p7  ;;  %p6941_p13 = por %p6940_p4, %p6939_p2 }
 0x44d   : > { %v6452_v5 = vpop.f32.mrf.mxu1  ;;  %v4962_v46 = vadd.f32 %v6233_v59, %v8891_v4  ;;  %v4593_v38 = vadd.f32 %v8892_v15, %v6153_v52  ;;  %v5715_v58 = vunpack.c.l.bf16 %v5726_v45  ;;  %v4954_v62 = vadd.f32 %v6227_v49, %v8893_v7 }
 0x44e   : > { %5159 = vst [vmem:[%s7286_s11 + $0x50] sm:$0xff] %v5143_v24  ;;  %v5141_v54 = vadd.f32 %v5707_v10, %v5093_v43  ;;  %v5096_v27 = vadd.f32 %v8512_v32, %v5073_v23  ;;  %v5071_v41 = vadd.f32 %v5035_v8, %v4569_v34  ;;  %v5056_v50 = vadd.f32 %v6452_v5, %v4959_v13  ;;  %p6935_p0 = pneg %p6934_p12 }
 0x44f   : > { %v5047_v21 = vpop.f32.mrf.mxu1  ;;  %v4585_v61 = vadd.f32 %v6147_v57, %v8894_v26  ;;  %v5716_v34 = vunpack.c.h.bf16 %v5726_v45 }
 0x450   : > { %5157 = vst [vmem:[%s7286_s11 + $0x40] sm:$0xff] %v5141_v54  ;;  %v5144_v10 = vadd.f32 %v5712_v29, %v5096_v27  ;;  %v5094_v47 = vadd.f32 %v8512_v32, %v5071_v41  ;;  %v5076_v40 = vadd.f32 %v5056_v50, %v4590_v3  ;;  %v5048_v6 = vadd.f32 %v5047_v21, %v4951_v37  ;;  %p6942_p8 = pnand %p6941_p13, %p6935_p0 }
 0x451   : > { %v6453_v14 = vpop.f32.mrf.mxu1 }
 0x452   : > { %5160 = vst [vmem:[%s7286_s11 + $0x58] sm:$0xff] %v5144_v10  ;;  %v5142_v35 = vadd.f32 %v5708_v55, %v5094_v47  ;;  %v5099_v44 = vadd.f32 %v8512_v32, %v5076_v40  ;;  %v5074_v29 = vadd.f32 %v5048_v6, %v4582_v11  ;;  %v5059_v39 = vadd.f32 %v6453_v14, %v4962_v46 }
 0x453   : > { %v5050_v1 = vpop.f32.mrf.mxu1 }
 0x454   : > { %5158 = vst [vmem:[%s7286_s11 + $0x48] sm:$0xff] %v5142_v35  ;;  %v5147_v2 = vadd.f32 %v5719_v42, %v5099_v44  ;;  %v5097_v17 = vadd.f32 %v8512_v32, %v5074_v29  ;;  %v5077_v28 = vadd.f32 %v5059_v39, %v4593_v38  ;;  %v5051_v30 = vadd.f32 %v5050_v1, %v4954_v62 }
 0x456   : > { %5163 = vst [vmem:[%s7286_s11 + $0x70] sm:$0xff] %v5147_v2  ;;  %v5145_v55 = vadd.f32 %v5715_v58, %v5097_v17  ;;  %v5100_v48 = vadd.f32 %v8512_v32, %v5077_v28  ;;  %v5075_v0 = vadd.f32 %v5051_v30, %v4585_v61 }
 0x458   : > { %5161 = vst [vmem:[%s7286_s11 + $0x60] sm:$0xff] %v5145_v55  ;;  %v5148_v18 = vadd.f32 %v5720_v36, %v5100_v48  ;;  %v5098_v22 = vadd.f32 %v8512_v32, %v5075_v0 }
 0x45a   : > { %5164 = vst [vmem:[%s7286_s11 + $0x78] sm:$0xff] %v5148_v18  ;;  %v5146_v16 = vadd.f32 %v5716_v34, %v5098_v22 }
 0x45c   : > { %5162 = vst [vmem:[%s7286_s11 + $0x68] sm:$0xff] %v5146_v16 }
 0x45d   : > { %6945 = shalt.err (!%p6942_p8)
}
 0x45e   : > { %s6946_s25 = scalar_lea.hbm %s8649_s17, 2048  ;;  %s6950_s30 = scalar_lea.hbm %s8896_s8, 8192 }
 0x45f   : > { %p6947_p10 = scmp.ne.s32.totalorder %s8649_s17, %s6946_s25  ;;  %p6951_p1 = scmp.lt.s32.totalorder %s8649_s17, %s8896_s8 }
 0x460   : > { %p6952_p3 = scmp.lt.s32.totalorder %s6950_s30, %s6946_s25 }
 0x461   : > { %p6948_p6 = pnand %p6947_p10, %p7174_p7 }
 0x462   : > { %p6953_p11 = por %p6952_p3, %p6951_p1 }
 0x463   : > { %p6949_p9 = pneg %p6948_p6 }
 0x465   : > { %p6954_p5 = pnand %p6953_p11, %p6949_p9 }
 0x467   : > { %6957 = shalt.err (!%p6954_p5)
}
 0x468   : > { %s7071_s24 = smov 128   ;;  %s7072_s15 = smov 8  }
 0x469   : > { %6464 = dma.vmem_to_hbm [thread:$0]  (%p7174_p7), %s8651_s9, 2048, %s8649_s17, %s8657_s21, %s7071_s24, %s7071_s24, %s7072_s15  }
 0x46a PF: > { %s8897_s10 = sld [smem:[#allocation13_spill]]  ;;  %p6486_p12 = scmp.ge.s32.totalorder %s7056_s28, 2 }
 0x46b   : > { %s8898_s6 = sld [smem:[#allocation17_spill]] }
 0x470   : > { %s5197_s1 = sand.u32 1, %s8897_s10  }
 0x471   : > { %p8899_p0 = scmp.ne.s32.totalorder %s8898_s6, 0  ;;  %s5198_s3 = scalar_lea.sflag [#allocation5], %s5197_s1 }
 0x473   : > { %p6478_p2 = pnand %p6486_p12, %p8899_p0 }
 0x475   : > { %p6479_p4 = pneg %p6478_p2 }
 0x477   : > { %7011 = dma.done.wait (%p6479_p4), %s5198_s3, 2048  }
 0x478   : > { %7013 = vsyncadd (%p6479_p4), %s5198_s3, 4294965248  ;;  %s22_s28 = sadd.s32 1, %s7056_s28   ;;  %s8900_s16 = smov %s7246_s18 }
 0x479   : > { %p19_p13 = scmp.ge.s32.totalorder %s22_s28, 6   ;;  %s8901_s24 = sld [smem:[#allocation15_spill]] }
 0x47a   : > { %s8902_s9 = sld [smem:[#allocation18_spill]]  ;;  %s8903_s18 = smov %s7020_s19 }
 0x47b   : > { %s8904_s19 = smov %s7024_s20  ;;  %s8905_s20 = smov %s7251_s26 }
 0x47c   : > { %s8906_s21 = smov %s7032_s22  ;;  %s8907_s22 = smov %s7036_s23 }
 0x47d   : > { %s8908_s23 = smov %s8900_s16  ;;  %s8909_s25 = smov %s7052_s27 }
 0x47e   : > { %s8911_s27 = smov %s8917_s14  ;;  %21 = sbr.rel (!%p19_p13) target bundleno = 14 (0xe), region = 129 }
 0x480   : > { %s8910_s26 = smov %s8902_s9 }
 0x483   :  { %5203 = vsyncpa [#allocation4], 1 }
 0x484   :  { %5205 = vsyncpa [#allocation4 + $0x1], 1 }
 0x485   :  { %5206 = vsyncpa [#allocation7], 1 }
 0x486   :  { %5207 = vsyncpa [#allocation5], 1 }
 0x487   :  { %5209 = vsyncpa [#allocation5 + $0x1], 1 }

</bundles_post_ra>
